<compile_context>
chip_gen: v7x
topology: tpu7x:2x2x1
jax: 0.10.0
libtpu: 0.0.40
codegen_flags: <defaults>
</compile_context>

<pallas_src>
import jax
import jax.numpy as jnp
from jax import lax
from jax.experimental import pallas as pl
from jax.experimental.pallas import tpu as pltpu

EPS = 1e-5
MXU_DTYPE = jnp.bfloat16   # MXU operand dtype; accumulation is f32.
ACT_DTYPE = jnp.bfloat16   # HBM storage dtype for h1/h2 intermediates.


# ---------------------------------------------------------------------------
# Kernels
# ---------------------------------------------------------------------------

def _stats_kernel(x_ref, s_ref, q_ref):
    """bn1 batch statistics straight off the NCHW tile (C on sublanes, H*W on lanes)."""
    x = x_ref[...]                                        # (C, HW) f32
    s_ref[...] = jnp.sum(x, axis=1, keepdims=True)        # (C, 1)
    q_ref[...] = jnp.sum(x * x, axis=1, keepdims=True)


def _stage1_kernel(x_ref, sc_ref, sh_ref, w_ref, h_ref, s_ref, q_ref):
    """h1 = conv1x1(relu(bn1(x))); bn2 partial stats. NCHW tile in, rows-layout bf16 out."""
    x = x_ref[...]                                        # (C, HW) f32
    a = jnp.maximum(x * sc_ref[...] + sh_ref[...], 0.0)   # (C, HW), affine bn1 + relu
    h = jnp.dot(w_ref[...], a.astype(MXU_DTYPE),
                preferred_element_type=jnp.float32)       # (P, HW) f32, channel-major
    s_ref[...] = jnp.sum(h, axis=1, keepdims=True)        # (P, 1) bn2 partial sums (f32)
    q_ref[...] = jnp.sum(h * h, axis=1, keepdims=True)
    h_ref[...] = jnp.transpose(h).astype(h_ref.dtype)     # (HW, P) rows, bf16 to HBM


def _make_stage2_kernel(W, TM, P, PAD):
    """h2 = conv3x3(relu(bn2(h1))), stride 1 / pad 1; also bn3 partial stats."""

    def kernel(h1_ref, sc_ref, sh_ref, w2_ref, h2_ref, s_ref, q_ref, pad_ref):
        a = jnp.maximum(h1_ref[...].astype(jnp.float32) * sc_ref[...] + sh_ref[...], 0.0)

        # Padded row buffer: zero only the halos (scratch persists across grid steps, so
        # re-zero every tile); the interior is fully overwritten each tile.
        halo = jnp.zeros((PAD, P), jnp.float32)
        pad_ref[pl.ds(0, PAD), :] = halo
        pad_ref[pl.ds(PAD + TM, PAD), :] = halo
        pad_ref[pl.ds(PAD, TM), :] = a

        # One image per tile: vertically out-of-image taps read the zero halo, so only the
        # horizontal (ox = +/-1) validity masks are needed (6 selects instead of 9).
        xpos = lax.broadcasted_iota(jnp.int32, (TM, 1), 0) % W
        left_ok = xpos >= 1            # source column xpos-1 is inside the row
        right_ok = xpos < (W - 1)      # source column xpos+1 is inside the row

        acc = jnp.zeros((TM, P), jnp.float32)
        for oy in (-1, 0, 1):
            for ox in (-1, 0, 1):
                shift = oy * W + ox
                tap = pad_ref[pl.ds(PAD + shift, TM), :]
                if ox == -1:
                    tap = jnp.where(left_ok, tap, jnp.zeros_like(tap))
                elif ox == 1:
                    tap = jnp.where(right_ok, tap, jnp.zeros_like(tap))
                k = (oy + 1) * 3 + (ox + 1)
                acc = acc + jnp.dot(tap.astype(MXU_DTYPE), w2_ref[k],
                                    preferred_element_type=jnp.float32)

        s_ref[...] = jnp.sum(acc, axis=0, keepdims=True)          # (1, P) bn3 partials, f32
        q_ref[...] = jnp.sum(acc * acc, axis=0, keepdims=True)
        h2_ref[...] = acc.astype(h2_ref.dtype)                    # (TM, P) bf16 to HBM

    return kernel


def _stage3_kernel(h2_ref, sc_ref, sh_ref, w_ref, x_ref, o_ref):
    """out = conv1x1(relu(bn3(h2))) + x; written directly in NCHW layout."""
    a = jnp.maximum(h2_ref[...].astype(jnp.float32) * sc_ref[...] + sh_ref[...], 0.0)
    a_c = jnp.transpose(a).astype(MXU_DTYPE)                      # (P, HW) channel-major
    y = jnp.dot(w_ref[...], a_c, preferred_element_type=jnp.float32)   # (C, HW) f32
    o_ref[...] = (y + x_ref[...]).astype(o_ref.dtype)             # + identity residual


# ---------------------------------------------------------------------------
# Wrapper
# ---------------------------------------------------------------------------

def _fold_bn(psum, psumsq, gamma, beta, count):
    """Fold batch statistics into a per-channel affine: y = x*scale + shift."""
    mean = psum / count
    var = jnp.maximum(psumsq / count - mean * mean, 0.0)
    scale = (gamma * lax.rsqrt(var + EPS)).astype(jnp.float32)
    shift = (beta - mean * scale).astype(jnp.float32)
    return scale, shift


@jax.jit
def bottleneck_forward(x_nchw, params):
    g1, b1, w1, g2, b2, w2, g3, b3, w3 = params
    N, C, H, W = x_nchw.shape
    P = w1.shape[0]                      # planes (conv1 weight is (planes, inplanes, 1, 1))
    assert C == 4 * P, "identity residual requires inplanes == planes * expansion"

    HW = H * W                           # rows per image
    TM = HW
    M = N * HW
    assert TM % 8 == 0 or N == 1, "H*W must be a multiple of 8 when N > 1"
    PAD = ((W + 1 + 7) // 8) * 8         # halo rows: >= W+1 and a multiple of 8
    f32 = jnp.float32

    # Free trailing-dim reshape (no data movement): NCHW -> (N, C, H*W).
    x3 = x_nchw.reshape(N, C, HW).astype(f32)

    # Conv weights as MXU operands (bf16).
    w1m = w1[:, :, 0, 0].astype(MXU_DTYPE)                                      # (P, C)
    w2t = jnp.stack([jnp.transpose(w2[:, :, dy, dx])
                     for dy in range(3) for dx in range(3)]).astype(MXU_DTYPE)  # (9, P, P)
    w3m = w3[:, :, 0, 0].astype(MXU_DTYPE)                                      # (C, P)

    cparams = pltpu.CompilerParams(
        dimension_semantics=("parallel",),        # grid=(N,) >= 2 keeps both v7x TCs busy
        vmem_limit_bytes=48 * 1024 * 1024,        # safe within v7x's 64 MiB physical VMEM
    )

    img_C = pl.BlockSpec((None, C, HW), lambda n: (n, 0, 0))     # NCHW image tile (C, HW)
    rows_P = pl.BlockSpec((TM, P), lambda n: (n, 0))             # rows-layout tile (HW, P)
    colvec_C = pl.BlockSpec((C, 1), lambda n: (0, 0))
    rowvec_P = pl.BlockSpec((1, P), lambda n: (0, 0))
    stat_C = pl.BlockSpec((None, C, 1), lambda n: (n, 0, 0))
    stat_Pc = pl.BlockSpec((None, P, 1), lambda n: (n, 0, 0))
    stat_Pr = pl.BlockSpec((None, 1, P), lambda n: (n, 0, 0))
    w1_spec = pl.BlockSpec((P, C), lambda n: (0, 0))
    w2_spec = pl.BlockSpec((9, P, P), lambda n: (0, 0, 0))
    w3_spec = pl.BlockSpec((C, P), lambda n: (0, 0))

    # ---- phase 0: bn1 batch statistics of x (read NCHW directly, no transpose) ----
    s0, q0 = pl.pallas_call(
        _stats_kernel,
        grid=(N,),
        in_specs=[img_C],
        out_specs=(stat_C, stat_C),
        out_shape=(jax.ShapeDtypeStruct((N, C, 1), f32),
                   jax.ShapeDtypeStruct((N, C, 1), f32)),
        compiler_params=cparams,
        cost_estimate=pl.CostEstimate(flops=3 * M * C, transcendentals=0,
                                      bytes_accessed=4 * (M * C + 2 * N * C)),
    )(x3)
    scale1, shift1 = _fold_bn(jnp.sum(s0, axis=(0, 2)), jnp.sum(q0, axis=(0, 2)), g1, b1, M)

    # ---- phase 1: bn1 + relu + conv1 (1x1) channel-major, bn2 statistics ----
    h1, s1, q1 = pl.pallas_call(
        _stage1_kernel,
        grid=(N,),
        in_specs=[img_C, colvec_C, colvec_C, w1_spec],
        out_specs=(rows_P, stat_Pc, stat_Pc),
        out_shape=(jax.ShapeDtypeStruct((M, P), ACT_DTYPE),
                   jax.ShapeDtypeStruct((N, P, 1), f32),
                   jax.ShapeDtypeStruct((N, P, 1), f32)),
        compiler_params=cparams,
        cost_estimate=pl.CostEstimate(flops=2 * M * C * P + 8 * M * C,
                                      transcendentals=0,
                                      bytes_accessed=4 * M * C + 2 * M * P),
    )(x3, scale1.reshape(C, 1), shift1.reshape(C, 1), w1m)
    scale2, shift2 = _fold_bn(jnp.sum(s1, axis=(0, 2)), jnp.sum(q1, axis=(0, 2)), g2, b2, M)

    # ---- phase 2: bn2 + relu + conv2 (3x3, stride 1, pad 1), bn3 statistics ----
    h2, s2, q2 = pl.pallas_call(
        _make_stage2_kernel(W, TM, P, PAD),
        grid=(N,),
        in_specs=[rows_P, rowvec_P, rowvec_P, w2_spec],
        out_specs=(rows_P, stat_Pr, stat_Pr),
        out_shape=(jax.ShapeDtypeStruct((M, P), ACT_DTYPE),
                   jax.ShapeDtypeStruct((N, 1, P), f32),
                   jax.ShapeDtypeStruct((N, 1, P), f32)),
        scratch_shapes=[pltpu.VMEM((TM + 2 * PAD, P), f32)],
        compiler_params=cparams,
        cost_estimate=pl.CostEstimate(flops=18 * M * P * P + 16 * M * P,
                                      transcendentals=0,
                                      bytes_accessed=2 * (2 * M * P)),
    )(h1, scale2.reshape(1, P), shift2.reshape(1, P), w2t)
    scale3, shift3 = _fold_bn(jnp.sum(s2, axis=(0, 1)), jnp.sum(q2, axis=(0, 1)), g3, b3, M)

    # ---- phase 3: bn3 + relu + conv3 (1x1) + identity residual, NCHW output ----
    out3 = pl.pallas_call(
        _stage3_kernel,
        grid=(N,),
        in_specs=[rows_P, rowvec_P, rowvec_P, w3_spec, img_C],
        out_specs=img_C,
        out_shape=jax.ShapeDtypeStruct((N, C, HW), f32),
        compiler_params=cparams,
        cost_estimate=pl.CostEstimate(flops=2 * M * P * C + 4 * M * P + M * C,
                                      transcendentals=0,
                                      bytes_accessed=2 * M * P + 8 * M * C),
    )(h2, scale3.reshape(1, P), shift3.reshape(1, P), w3m, x3)

    # Free trailing-dim reshape back to NCHW (no data movement).
    return out3.reshape(N, C, H, W)


# ---------------------------------------------------------------------------
# Pure-JAX reference
# ---------------------------------------------------------------------------

def bottleneck_reference(x, params, matmul_dtype=jnp.float32):
    """NCHW reference mirroring the PyTorch module (training-mode BN).

    matmul_dtype=float32 reproduces the module exactly; matmul_dtype=bfloat16 mirrors the
    kernel's bf16-MXU-operand choice (f32 accumulation) for a tighter implementation check.
    """
    g1, b1, w1, g2, b2, w2, g3, b3, w3 = params

    def bn(h, g, b):
        mean = jnp.mean(h, axis=(0, 2, 3), keepdims=True)
        var = jnp.mean((h - mean) ** 2, axis=(0, 2, 3), keepdims=True)
        return ((h - mean) / jnp.sqrt(var + EPS) * g.reshape(1, -1, 1, 1)
                + b.reshape(1, -1, 1, 1))

    def conv(h, w, pad):
        return lax.conv_general_dilated(
            h.astype(matmul_dtype), w.astype(matmul_dtype), (1, 1), pad,
            dimension_numbers=('NCHW', 'OIHW', 'NCHW'),
            preferred_element_type=jnp.float32)

    out = conv(jnp.maximum(bn(x, g1, b1), 0.0), w1, 'VALID')
    out = conv(jnp.maximum(bn(out, g2, b2), 0.0), w2, ((1, 1), (1, 1)))
    out = conv(jnp.maximum(bn(out, g3, b3), 0.0), w3, 'VALID')
    return out + x


if __name__ == "__main__":
    key = jax.random.PRNGKey(0)
    ks = jax.random.split(key, 10)

    N, H, W = 2, 16, 16
    planes = 4
    inplanes = planes * 4      # identity residual (downsample=None) needs inplanes == 4*planes

    x = jax.random.normal(ks[0], (N, inplanes, H, W), jnp.float32)
    g1 = 1.0 + 0.1 * jax.random.normal(ks[1], (inplanes,), jnp.float32)
    b1 = 0.1 * jax.random.normal(ks[2], (inplanes,), jnp.float32)
    w1 = 0.2 * jax.random.normal(ks[3], (planes, inplanes, 1, 1), jnp.float32)
    g2 = 1.0 + 0.1 * jax.random.normal(ks[4], (planes,), jnp.float32)
    b2 = 0.1 * jax.random.normal(ks[5], (planes,), jnp.float32)
    w2 = 0.2 * jax.random.normal(ks[6], (planes, planes, 3, 3), jnp.float32)
    g3 = 1.0 + 0.1 * jax.random.normal(ks[7], (planes,), jnp.float32)
    b3 = 0.1 * jax.random.normal(ks[8], (planes,), jnp.float32)
    w3 = 0.2 * jax.random.normal(ks[9], (planes * 4, planes, 1, 1), jnp.float32)
    params = (g1, b1, w1, g2, b2, w2, g3, b3, w3)

    out = jax.block_until_ready(bottleneck_forward(x, params))

    ref_impl = jax.block_until_ready(bottleneck_reference(x, params, MXU_DTYPE))
    ref_mod = jax.block_until_ready(bottleneck_reference(x, params, jnp.float32))

    assert out.shape == ref_mod.shape == (N, inplanes, H, W)
    err_impl = float(jnp.max(jnp.abs(out - ref_impl)))
    err_mod = float(jnp.max(jnp.abs(out - ref_mod)))
    # Check vs a reference that also feeds the MXU bf16 operands (slightly looser than before
    # because h1/h2 are now stored in bf16, which the reference does not round).
    assert jnp.allclose(out, ref_impl, rtol=2e-2, atol=2e-2), f"impl mismatch: {err_impl}"
    # Looser check vs the exact f32 module semantics (precision cost of bf16 MXU/storage).
    assert jnp.allclose(out, ref_mod, rtol=5e-2, atol=5e-2), f"module mismatch: {err_mod}"
    print("KERNEL_OK")
</pallas_src>

<mosaic_0001>
module attributes {stable_mosaic.version = 11 : i64} {
  func.func @_stats_kernel(%arg0: i32, %arg1: memref<1x16x256xf32, #tpu.memory_space<vmem>>, %arg2: memref<1x16x1xf32, #tpu.memory_space<vmem>>, %arg3: memref<1x16x1xf32, #tpu.memory_space<vmem>>) attributes {dimension_semantics = [#tpu.dimension_semantics<parallel>], iteration_bounds = array<i64: 2>, scalar_prefetch = 0 : i64, scratch_operands = 0 : i64, tpu.core_type = #tpu.core_type<tc>, window_params = [{transform_indices = @transform_0, window_bounds = array<i64: 1, 16, 256>}, {transform_indices = @transform_1, window_bounds = array<i64: 1, 16, 1>}, {transform_indices = @transform_2, window_bounds = array<i64: 1, 16, 1>}]} {
    %c0 = arith.constant 0 : index
    %c0_0 = arith.constant 0 : index
    %c0_1 = arith.constant 0 : index
    %0 = vector.load %arg1[%c0, %c0_0, %c0_1] : memref<1x16x256xf32, #tpu.memory_space<vmem>>, vector<1x16x256xf32>
    %1 = vector.shape_cast %0 : vector<1x16x256xf32> to vector<16x256xf32>
    %cst = arith.constant dense<0.000000e+00> : vector<16xf32>
    %2 = vector.multi_reduction <add>, %1, %cst [1] : vector<16x256xf32> to vector<16xf32>
    %3 = vector.shape_cast %2 : vector<16xf32> to vector<16x1xf32>
    %c0_2 = arith.constant 0 : index
    %c0_3 = arith.constant 0 : index
    %c0_4 = arith.constant 0 : index
    %4 = vector.load %arg2[%c0_2, %c0_3, %c0_4] : memref<1x16x1xf32, #tpu.memory_space<vmem>>, vector<1x16x1xf32>
    %5 = vector.shape_cast %4 : vector<1x16x1xf32> to vector<16x1xf32>
    %6 = vector.shape_cast %3 : vector<16x1xf32> to vector<1x16x1xf32>
    tpu.vector_store %arg2[%c0_2, %c0_3, %c0_4], %6 {strides = array<i32>} : memref<1x16x1xf32, #tpu.memory_space<vmem>>, vector<1x16x1xf32>,
    %7 = arith.mulf %1, %1 : vector<16x256xf32>
    %cst_5 = arith.constant dense<0.000000e+00> : vector<16xf32>
    %8 = vector.multi_reduction <add>, %7, %cst_5 [1] : vector<16x256xf32> to vector<16xf32>
    %9 = vector.shape_cast %8 : vector<16xf32> to vector<16x1xf32>
    %c0_6 = arith.constant 0 : index
    %c0_7 = arith.constant 0 : index
    %c0_8 = arith.constant 0 : index
    %10 = vector.load %arg3[%c0_6, %c0_7, %c0_8] : memref<1x16x1xf32, #tpu.memory_space<vmem>>, vector<1x16x1xf32>
    %11 = vector.shape_cast %10 : vector<1x16x1xf32> to vector<16x1xf32>
    %12 = vector.shape_cast %9 : vector<16x1xf32> to vector<1x16x1xf32>
    tpu.vector_store %arg3[%c0_6, %c0_7, %c0_8], %12 {strides = array<i32>} : memref<1x16x1xf32, #tpu.memory_space<vmem>>, vector<1x16x1xf32>,
    return
  }
  func.func @transform_0(%arg0: i32) -> (i32, i32, i32) {
    %c0_i32 = arith.constant 0 : i32
    %c0_i32_0 = arith.constant 0 : i32
    %c0_i32_1 = arith.constant 0 : i32
    return %arg0, %c0_i32, %c0_i32_0 : i32, i32, i32
  }
  func.func @transform_1(%arg0: i32) -> (i32, i32, i32) {
    %c0_i32 = arith.constant 0 : i32
    %c0_i32_0 = arith.constant 0 : i32
    %c0_i32_1 = arith.constant 0 : i32
    return %arg0, %c0_i32, %c0_i32_0 : i32, i32, i32
  }
  func.func @transform_2(%arg0: i32) -> (i32, i32, i32) {
    %c0_i32 = arith.constant 0 : i32
    %c0_i32_0 = arith.constant 0 : i32
    %c0_i32_1 = arith.constant 0 : i32
    return %arg0, %c0_i32, %c0_i32_0 : i32, i32, i32
  }
}

module attributes {stable_mosaic.version = 11 : i64} {
  func.func @_stage1_kernel(%arg0: i32, %arg1: memref<1x16x256xf32, #tpu.memory_space<vmem>>, %arg2: memref<16x1xf32, #tpu.memory_space<vmem>>, %arg3: memref<16x1xf32, #tpu.memory_space<vmem>>, %arg4: memref<4x16xbf16, #tpu.memory_space<vmem>>, %arg5: memref<256x4xbf16, #tpu.memory_space<vmem>>, %arg6: memref<1x4x1xf32, #tpu.memory_space<vmem>>, %arg7: memref<1x4x1xf32, #tpu.memory_space<vmem>>) attributes {dimension_semantics = [#tpu.dimension_semantics<parallel>], iteration_bounds = array<i64: 2>, scalar_prefetch = 0 : i64, scratch_operands = 0 : i64, tpu.core_type = #tpu.core_type<tc>, window_params = [{transform_indices = @transform_0, window_bounds = array<i64: 1, 16, 256>}, {pipeline_mode = #tpu.pipeline_mode<synchronous>, transform_indices = @transform_1, window_bounds = array<i64: 16, 1>}, {pipeline_mode = #tpu.pipeline_mode<synchronous>, transform_indices = @transform_2, window_bounds = array<i64: 16, 1>}, {pipeline_mode = #tpu.pipeline_mode<synchronous>, transform_indices = @transform_3, window_bounds = array<i64: 4, 16>}, {transform_indices = @transform_4, window_bounds = array<i64: 256, 4>}, {transform_indices = @transform_5, window_bounds = array<i64: 1, 4, 1>}, {transform_indices = @transform_6, window_bounds = array<i64: 1, 4, 1>}]} {
    %c0 = arith.constant 0 : index
    %c0_0 = arith.constant 0 : index
    %c0_1 = arith.constant 0 : index
    %0 = vector.load %arg1[%c0, %c0_0, %c0_1] : memref<1x16x256xf32, #tpu.memory_space<vmem>>, vector<1x16x256xf32>
    %1 = vector.shape_cast %0 : vector<1x16x256xf32> to vector<16x256xf32>
    %c0_2 = arith.constant 0 : index
    %c0_3 = arith.constant 0 : index
    %2 = vector.load %arg2[%c0_2, %c0_3] : memref<16x1xf32, #tpu.memory_space<vmem>>, vector<16x1xf32>
    %3 = vector.broadcast %2 : vector<16x1xf32> to vector<16x256xf32>
    %4 = arith.mulf %1, %3 : vector<16x256xf32>
    %c0_4 = arith.constant 0 : index
    %c0_5 = arith.constant 0 : index
    %5 = vector.load %arg3[%c0_4, %c0_5] : memref<16x1xf32, #tpu.memory_space<vmem>>, vector<16x1xf32>
    %6 = vector.broadcast %5 : vector<16x1xf32> to vector<16x256xf32>
    %7 = arith.addf %4, %6 : vector<16x256xf32>
    %cst = arith.constant 0.000000e+00 : f32
    %8 = vector.broadcast %cst : f32 to vector<16x256xf32>
    %9 = arith.maximumf %7, %8 : vector<16x256xf32>
    %c0_6 = arith.constant 0 : index
    %c0_7 = arith.constant 0 : index
    %10 = vector.load %arg4[%c0_6, %c0_7] : memref<4x16xbf16, #tpu.memory_space<vmem>>, vector<4x16xbf16>
    %11 = arith.truncf %9 : vector<16x256xf32> to vector<16x256xbf16>
    %cst_8 = arith.constant dense<0.000000e+00> : vector<4x256xf32>
    %12 = tpu.matmul %10, %11, %cst_8 {dimension_numbers = #tpu.dot_dimension_numbers<[1], [0], [0], [1], [0, 0, 1, 1], [], []>} : vector<4x16xbf16>, vector<16x256xbf16>, vector<4x256xf32> -> vector<4x256xf32>
    %cst_9 = arith.constant dense<0.000000e+00> : vector<4xf32>
    %13 = vector.multi_reduction <add>, %12, %cst_9 [1] : vector<4x256xf32> to vector<4xf32>
    %14 = vector.shape_cast %13 : vector<4xf32> to vector<4x1xf32>
    %c0_10 = arith.constant 0 : index
    %c0_11 = arith.constant 0 : index
    %c0_12 = arith.constant 0 : index
    %15 = vector.load %arg6[%c0_10, %c0_11, %c0_12] : memref<1x4x1xf32, #tpu.memory_space<vmem>>, vector<1x4x1xf32>
    %16 = vector.shape_cast %15 : vector<1x4x1xf32> to vector<4x1xf32>
    %17 = vector.shape_cast %14 : vector<4x1xf32> to vector<1x4x1xf32>
    tpu.vector_store %arg6[%c0_10, %c0_11, %c0_12], %17 {strides = array<i32>} : memref<1x4x1xf32, #tpu.memory_space<vmem>>, vector<1x4x1xf32>,
    %18 = arith.mulf %12, %12 : vector<4x256xf32>
    %cst_13 = arith.constant dense<0.000000e+00> : vector<4xf32>
    %19 = vector.multi_reduction <add>, %18, %cst_13 [1] : vector<4x256xf32> to vector<4xf32>
    %20 = vector.shape_cast %19 : vector<4xf32> to vector<4x1xf32>
    %c0_14 = arith.constant 0 : index
    %c0_15 = arith.constant 0 : index
    %c0_16 = arith.constant 0 : index
    %21 = vector.load %arg7[%c0_14, %c0_15, %c0_16] : memref<1x4x1xf32, #tpu.memory_space<vmem>>, vector<1x4x1xf32>
    %22 = vector.shape_cast %21 : vector<1x4x1xf32> to vector<4x1xf32>
    %23 = vector.shape_cast %20 : vector<4x1xf32> to vector<1x4x1xf32>
    tpu.vector_store %arg7[%c0_14, %c0_15, %c0_16], %23 {strides = array<i32>} : memref<1x4x1xf32, #tpu.memory_space<vmem>>, vector<1x4x1xf32>,
    %24 = tpu.transpose %12, [1, 0] : vector<4x256xf32> -> vector<256x4xf32>
    %25 = arith.truncf %24 : vector<256x4xf32> to vector<256x4xbf16>
    %c0_17 = arith.constant 0 : index
    %c0_18 = arith.constant 0 : index
    %26 = vector.load %arg5[%c0_17, %c0_18] : memref<256x4xbf16, #tpu.memory_space<vmem>>, vector<256x4xbf16>
    tpu.vector_store %arg5[%c0_17, %c0_18], %25 {strides = array<i32>} : memref<256x4xbf16, #tpu.memory_space<vmem>>, vector<256x4xbf16>,
    return
  }
  func.func @transform_0(%arg0: i32) -> (i32, i32, i32) {
    %c0_i32 = arith.constant 0 : i32
    %c0_i32_0 = arith.constant 0 : i32
    %c0_i32_1 = arith.constant 0 : i32
    return %arg0, %c0_i32, %c0_i32_0 : i32, i32, i32
  }
  func.func @transform_1(%arg0: i32) -> (i32, i32) {
    %c0_i32 = arith.constant 0 : i32
    %c0_i32_0 = arith.constant 0 : i32
    %c0_i32_1 = arith.constant 0 : i32
    return %c0_i32, %c0_i32_0 : i32, i32
  }
  func.func @transform_2(%arg0: i32) -> (i32, i32) {
    %c0_i32 = arith.constant 0 : i32
    %c0_i32_0 = arith.constant 0 : i32
    %c0_i32_1 = arith.constant 0 : i32
    return %c0_i32, %c0_i32_0 : i32, i32
  }
  func.func @transform_3(%arg0: i32) -> (i32, i32) {
    %c0_i32 = arith.constant 0 : i32
    %c0_i32_0 = arith.constant 0 : i32
    %c0_i32_1 = arith.constant 0 : i32
    return %c0_i32, %c0_i32_0 : i32, i32
  }
  func.func @transform_4(%arg0: i32) -> (i32, i32) {
    %c0_i32 = arith.constant 0 : i32
    %c0_i32_0 = arith.constant 0 : i32
    return %arg0, %c0_i32 : i32, i32
  }
  func.func @transform_5(%arg0: i32) -> (i32, i32, i32) {
    %c0_i32 = arith.constant 0 : i32
    %c0_i32_0 = arith.constant 0 : i32
    %c0_i32_1 = arith.constant 0 : i32
    return %arg0, %c0_i32, %c0_i32_0 : i32, i32, i32
  }
  func.func @transform_6(%arg0: i32) -> (i32, i32, i32) {
    %c0_i32 = arith.constant 0 : i32
    %c0_i32_0 = arith.constant 0 : i32
    %c0_i32_1 = arith.constant 0 : i32
    return %arg0, %c0_i32, %c0_i32_0 : i32, i32, i32
  }
}

module attributes {stable_mosaic.version = 11 : i64} {
  func.func @kernel(%arg0: i32, %arg1: memref<256x4xbf16, #tpu.memory_space<vmem>>, %arg2: memref<1x4xf32, #tpu.memory_space<vmem>>, %arg3: memref<1x4xf32, #tpu.memory_space<vmem>>, %arg4: memref<9x4x4xbf16, #tpu.memory_space<vmem>>, %arg5: memref<256x4xbf16, #tpu.memory_space<vmem>>, %arg6: memref<1x1x4xf32, #tpu.memory_space<vmem>>, %arg7: memref<1x1x4xf32, #tpu.memory_space<vmem>>, %arg8: memref<304x4xf32, #tpu.memory_space<vmem>>) attributes {dimension_semantics = [#tpu.dimension_semantics<parallel>], iteration_bounds = array<i64: 2>, scalar_prefetch = 0 : i64, scratch_operands = 1 : i64, tpu.core_type = #tpu.core_type<tc>, window_params = [{transform_indices = @transform_0, window_bounds = array<i64: 256, 4>}, {pipeline_mode = #tpu.pipeline_mode<synchronous>, transform_indices = @transform_1, window_bounds = array<i64: 1, 4>}, {pipeline_mode = #tpu.pipeline_mode<synchronous>, transform_indices = @transform_2, window_bounds = array<i64: 1, 4>}, {pipeline_mode = #tpu.pipeline_mode<synchronous>, transform_indices = @transform_3, window_bounds = array<i64: 9, 4, 4>}, {transform_indices = @transform_4, window_bounds = array<i64: 256, 4>}, {transform_indices = @transform_5, window_bounds = array<i64: 1, 1, 4>}, {transform_indices = @transform_6, window_bounds = array<i64: 1, 1, 4>}]} {
    %c0 = arith.constant 0 : index
    %c0_0 = arith.constant 0 : index
    %0 = vector.load %arg1[%c0, %c0_0] : memref<256x4xbf16, #tpu.memory_space<vmem>>, vector<256x4xbf16>
    %1 = arith.extf %0 : vector<256x4xbf16> to vector<256x4xf32>
    %c0_1 = arith.constant 0 : index
    %c0_2 = arith.constant 0 : index
    %2 = vector.load %arg2[%c0_1, %c0_2] : memref<1x4xf32, #tpu.memory_space<vmem>>, vector<1x4xf32>
    %3 = vector.broadcast %2 : vector<1x4xf32> to vector<256x4xf32>
    %4 = arith.mulf %1, %3 : vector<256x4xf32>
    %c0_3 = arith.constant 0 : index
    %c0_4 = arith.constant 0 : index
    %5 = vector.load %arg3[%c0_3, %c0_4] : memref<1x4xf32, #tpu.memory_space<vmem>>, vector<1x4xf32>
    %6 = vector.broadcast %5 : vector<1x4xf32> to vector<256x4xf32>
    %7 = arith.addf %4, %6 : vector<256x4xf32>
    %cst = arith.constant 0.000000e+00 : f32
    %8 = vector.broadcast %cst : f32 to vector<256x4xf32>
    %9 = arith.maximumf %7, %8 : vector<256x4xf32>
    %cst_5 = arith.constant 0.000000e+00 : f32
    %10 = vector.broadcast %cst_5 : f32 to vector<24x4xf32>
    %c0_6 = arith.constant 0 : index
    %c0_7 = arith.constant 0 : index
    %11 = vector.load %arg8[%c0_6, %c0_7] : memref<304x4xf32, #tpu.memory_space<vmem>>, vector<24x4xf32>
    tpu.vector_store %arg8[%c0_6, %c0_7], %10 {strides = array<i32>} : memref<304x4xf32, #tpu.memory_space<vmem>>, vector<24x4xf32>,
    %c280 = arith.constant 280 : index
    %c0_8 = arith.constant 0 : index
    %12 = vector.load %arg8[%c280, %c0_8] : memref<304x4xf32, #tpu.memory_space<vmem>>, vector<24x4xf32>
    tpu.vector_store %arg8[%c280, %c0_8], %10 {strides = array<i32>} : memref<304x4xf32, #tpu.memory_space<vmem>>, vector<24x4xf32>,
    %c24 = arith.constant 24 : index
    %c0_9 = arith.constant 0 : index
    %13 = vector.load %arg8[%c24, %c0_9] : memref<304x4xf32, #tpu.memory_space<vmem>>, vector<256x4xf32>
    tpu.vector_store %arg8[%c24, %c0_9], %9 {strides = array<i32>} : memref<304x4xf32, #tpu.memory_space<vmem>>, vector<256x4xf32>,
    %14 = tpu.iota {dimensions = array<i32: 0>} : vector<256x1xi32>
    %c16_i32 = arith.constant 16 : i32
    %c0_i32 = arith.constant 0 : i32
    %15 = arith.cmpi eq, %c16_i32, %c0_i32 : i32
    %c1_i32 = arith.constant 1 : i32
    %16 = arith.select %15, %c1_i32, %c16_i32 : i32
    %17 = vector.broadcast %16 : i32 to vector<256x1xi32>
    %18 = arith.remsi %14, %17 : vector<256x1xi32>
    %c0_i32_10 = arith.constant 0 : i32
    %19 = vector.broadcast %c0_i32_10 : i32 to vector<256x1xi32>
    %20 = arith.cmpi ne, %18, %19 : vector<256x1xi32>
    %c0_i32_11 = arith.constant 0 : i32
    %21 = vector.broadcast %c0_i32_11 : i32 to vector<256x1xi32>
    %22 = arith.cmpi slt, %18, %21 : vector<256x1xi32>
    %c0_i32_12 = arith.constant 0 : i32
    %23 = arith.cmpi slt, %16, %c0_i32_12 : i32
    %24 = vector.broadcast %23 : i1 to vector<256x1xi1>
    %25 = vector.broadcast %24 : vector<256x1xi1> to vector<256x1xi1>
    %26 = arith.xori %22, %25 : vector<256x1xi1>
    %27 = arith.andi %26, %20 : vector<256x1xi1>
    %28 = vector.broadcast %16 : i32 to vector<256x1xi32>
    %29 = arith.addi %18, %28 : vector<256x1xi32>
    %30 = arith.select %27, %29, %18 : vector<256x1xi1>, vector<256x1xi32>
    %c1_i32_13 = arith.constant 1 : i32
    %31 = vector.broadcast %c1_i32_13 : i32 to vector<256x1xi32>
    %32 = arith.cmpi sge, %30, %31 : vector<256x1xi32>
    %c15_i32 = arith.constant 15 : i32
    %33 = vector.broadcast %c15_i32 : i32 to vector<256x1xi32>
    %34 = arith.cmpi slt, %30, %33 : vector<256x1xi32>
    %cst_14 = arith.constant 0.000000e+00 : f32
    %35 = vector.broadcast %cst_14 : f32 to vector<256x4xf32>
    %c7 = arith.constant 7 : index
    %c0_15 = arith.constant 0 : index
    %36 = vector.load %arg8[%c7, %c0_15] : memref<304x4xf32, #tpu.memory_space<vmem>>, vector<256x4xf32>
    %cst_16 = arith.constant 0.000000e+00 : f32
    %37 = vector.broadcast %cst_16 : f32 to vector<256x4xf32>
    %38 = vector.shape_cast %32 : vector<256x1xi1> to vector<256x1xi1>
    %39 = vector.broadcast %38 : vector<256x1xi1> to vector<256x4xi1>
    %40 = arith.select %39, %36, %37 : vector<256x4xi1>, vector<256x4xf32>
    %41 = arith.truncf %40 : vector<256x4xf32> to vector<256x4xbf16>
    %c0_17 = arith.constant 0 : index
    %c0_18 = arith.constant 0 : index
    %c0_19 = arith.constant 0 : index
    %42 = vector.load %arg4[%c0_17, %c0_18, %c0_19] : memref<9x4x4xbf16, #tpu.memory_space<vmem>>, vector<1x4x4xbf16>
    %43 = vector.shape_cast %42 : vector<1x4x4xbf16> to vector<4x4xbf16>
    %cst_20 = arith.constant dense<0.000000e+00> : vector<256x4xf32>
    %44 = tpu.matmul %41, %43, %cst_20 {dimension_numbers = #tpu.dot_dimension_numbers<[1], [0], [0], [1], [0, 0, 1, 1], [], []>} : vector<256x4xbf16>, vector<4x4xbf16>, vector<256x4xf32> -> vector<256x4xf32>
    %45 = arith.addf %35, %44 : vector<256x4xf32>
    %c8 = arith.constant 8 : index
    %c0_21 = arith.constant 0 : index
    %46 = vector.load %arg8[%c8, %c0_21] : memref<304x4xf32, #tpu.memory_space<vmem>>, vector<256x4xf32>
    %47 = arith.truncf %46 : vector<256x4xf32> to vector<256x4xbf16>
    %c1 = arith.constant 1 : index
    %c0_22 = arith.constant 0 : index
    %c0_23 = arith.constant 0 : index
    %48 = vector.load %arg4[%c1, %c0_22, %c0_23] : memref<9x4x4xbf16, #tpu.memory_space<vmem>>, vector<1x4x4xbf16>
    %49 = vector.shape_cast %48 : vector<1x4x4xbf16> to vector<4x4xbf16>
    %cst_24 = arith.constant dense<0.000000e+00> : vector<256x4xf32>
    %50 = tpu.matmul %47, %49, %cst_24 {dimension_numbers = #tpu.dot_dimension_numbers<[1], [0], [0], [1], [0, 0, 1, 1], [], []>} : vector<256x4xbf16>, vector<4x4xbf16>, vector<256x4xf32> -> vector<256x4xf32>
    %51 = arith.addf %45, %50 : vector<256x4xf32>
    %c9 = arith.constant 9 : index
    %c0_25 = arith.constant 0 : index
    %52 = vector.load %arg8[%c9, %c0_25] : memref<304x4xf32, #tpu.memory_space<vmem>>, vector<256x4xf32>
    %cst_26 = arith.constant 0.000000e+00 : f32
    %53 = vector.broadcast %cst_26 : f32 to vector<256x4xf32>
    %54 = vector.shape_cast %34 : vector<256x1xi1> to vector<256x1xi1>
    %55 = vector.broadcast %54 : vector<256x1xi1> to vector<256x4xi1>
    %56 = arith.select %55, %52, %53 : vector<256x4xi1>, vector<256x4xf32>
    %57 = arith.truncf %56 : vector<256x4xf32> to vector<256x4xbf16>
    %c2 = arith.constant 2 : index
    %c0_27 = arith.constant 0 : index
    %c0_28 = arith.constant 0 : index
    %58 = vector.load %arg4[%c2, %c0_27, %c0_28] : memref<9x4x4xbf16, #tpu.memory_space<vmem>>, vector<1x4x4xbf16>
    %59 = vector.shape_cast %58 : vector<1x4x4xbf16> to vector<4x4xbf16>
    %cst_29 = arith.constant dense<0.000000e+00> : vector<256x4xf32>
    %60 = tpu.matmul %57, %59, %cst_29 {dimension_numbers = #tpu.dot_dimension_numbers<[1], [0], [0], [1], [0, 0, 1, 1], [], []>} : vector<256x4xbf16>, vector<4x4xbf16>, vector<256x4xf32> -> vector<256x4xf32>
    %61 = arith.addf %51, %60 : vector<256x4xf32>
    %c23 = arith.constant 23 : index
    %c0_30 = arith.constant 0 : index
    %62 = vector.load %arg8[%c23, %c0_30] : memref<304x4xf32, #tpu.memory_space<vmem>>, vector<256x4xf32>
    %cst_31 = arith.constant 0.000000e+00 : f32
    %63 = vector.broadcast %cst_31 : f32 to vector<256x4xf32>
    %64 = vector.shape_cast %32 : vector<256x1xi1> to vector<256x1xi1>
    %65 = vector.broadcast %64 : vector<256x1xi1> to vector<256x4xi1>
    %66 = arith.select %65, %62, %63 : vector<256x4xi1>, vector<256x4xf32>
    %67 = arith.truncf %66 : vector<256x4xf32> to vector<256x4xbf16>
    %c3 = arith.constant 3 : index
    %c0_32 = arith.constant 0 : index
    %c0_33 = arith.constant 0 : index
    %68 = vector.load %arg4[%c3, %c0_32, %c0_33] : memref<9x4x4xbf16, #tpu.memory_space<vmem>>, vector<1x4x4xbf16>
    %69 = vector.shape_cast %68 : vector<1x4x4xbf16> to vector<4x4xbf16>
    %cst_34 = arith.constant dense<0.000000e+00> : vector<256x4xf32>
    %70 = tpu.matmul %67, %69, %cst_34 {dimension_numbers = #tpu.dot_dimension_numbers<[1], [0], [0], [1], [0, 0, 1, 1], [], []>} : vector<256x4xbf16>, vector<4x4xbf16>, vector<256x4xf32> -> vector<256x4xf32>
    %71 = arith.addf %61, %70 : vector<256x4xf32>
    %c24_35 = arith.constant 24 : index
    %c0_36 = arith.constant 0 : index
    %72 = vector.load %arg8[%c24_35, %c0_36] : memref<304x4xf32, #tpu.memory_space<vmem>>, vector<256x4xf32>
    %73 = arith.truncf %72 : vector<256x4xf32> to vector<256x4xbf16>
    %c4 = arith.constant 4 : index
    %c0_37 = arith.constant 0 : index
    %c0_38 = arith.constant 0 : index
    %74 = vector.load %arg4[%c4, %c0_37, %c0_38] : memref<9x4x4xbf16, #tpu.memory_space<vmem>>, vector<1x4x4xbf16>
    %75 = vector.shape_cast %74 : vector<1x4x4xbf16> to vector<4x4xbf16>
    %cst_39 = arith.constant dense<0.000000e+00> : vector<256x4xf32>
    %76 = tpu.matmul %73, %75, %cst_39 {dimension_numbers = #tpu.dot_dimension_numbers<[1], [0], [0], [1], [0, 0, 1, 1], [], []>} : vector<256x4xbf16>, vector<4x4xbf16>, vector<256x4xf32> -> vector<256x4xf32>
    %77 = arith.addf %71, %76 : vector<256x4xf32>
    %c25 = arith.constant 25 : index
    %c0_40 = arith.constant 0 : index
    %78 = vector.load %arg8[%c25, %c0_40] : memref<304x4xf32, #tpu.memory_space<vmem>>, vector<256x4xf32>
    %cst_41 = arith.constant 0.000000e+00 : f32
    %79 = vector.broadcast %cst_41 : f32 to vector<256x4xf32>
    %80 = vector.shape_cast %34 : vector<256x1xi1> to vector<256x1xi1>
    %81 = vector.broadcast %80 : vector<256x1xi1> to vector<256x4xi1>
    %82 = arith.select %81, %78, %79 : vector<256x4xi1>, vector<256x4xf32>
    %83 = arith.truncf %82 : vector<256x4xf32> to vector<256x4xbf16>
    %c5 = arith.constant 5 : index
    %c0_42 = arith.constant 0 : index
    %c0_43 = arith.constant 0 : index
    %84 = vector.load %arg4[%c5, %c0_42, %c0_43] : memref<9x4x4xbf16, #tpu.memory_space<vmem>>, vector<1x4x4xbf16>
    %85 = vector.shape_cast %84 : vector<1x4x4xbf16> to vector<4x4xbf16>
    %cst_44 = arith.constant dense<0.000000e+00> : vector<256x4xf32>
    %86 = tpu.matmul %83, %85, %cst_44 {dimension_numbers = #tpu.dot_dimension_numbers<[1], [0], [0], [1], [0, 0, 1, 1], [], []>} : vector<256x4xbf16>, vector<4x4xbf16>, vector<256x4xf32> -> vector<256x4xf32>
    %87 = arith.addf %77, %86 : vector<256x4xf32>
    %c39 = arith.constant 39 : index
    %c0_45 = arith.constant 0 : index
    %88 = vector.load %arg8[%c39, %c0_45] : memref<304x4xf32, #tpu.memory_space<vmem>>, vector<256x4xf32>
    %cst_46 = arith.constant 0.000000e+00 : f32
    %89 = vector.broadcast %cst_46 : f32 to vector<256x4xf32>
    %90 = vector.shape_cast %32 : vector<256x1xi1> to vector<256x1xi1>
    %91 = vector.broadcast %90 : vector<256x1xi1> to vector<256x4xi1>
    %92 = arith.select %91, %88, %89 : vector<256x4xi1>, vector<256x4xf32>
    %93 = arith.truncf %92 : vector<256x4xf32> to vector<256x4xbf16>
    %c6 = arith.constant 6 : index
    %c0_47 = arith.constant 0 : index
    %c0_48 = arith.constant 0 : index
    %94 = vector.load %arg4[%c6, %c0_47, %c0_48] : memref<9x4x4xbf16, #tpu.memory_space<vmem>>, vector<1x4x4xbf16>
    %95 = vector.shape_cast %94 : vector<1x4x4xbf16> to vector<4x4xbf16>
    %cst_49 = arith.constant dense<0.000000e+00> : vector<256x4xf32>
    %96 = tpu.matmul %93, %95, %cst_49 {dimension_numbers = #tpu.dot_dimension_numbers<[1], [0], [0], [1], [0, 0, 1, 1], [], []>} : vector<256x4xbf16>, vector<4x4xbf16>, vector<256x4xf32> -> vector<256x4xf32>
    %97 = arith.addf %87, %96 : vector<256x4xf32>
    %c40 = arith.constant 40 : index
    %c0_50 = arith.constant 0 : index
    %98 = vector.load %arg8[%c40, %c0_50] : memref<304x4xf32, #tpu.memory_space<vmem>>, vector<256x4xf32>
    %99 = arith.truncf %98 : vector<256x4xf32> to vector<256x4xbf16>
    %c7_51 = arith.constant 7 : index
    %c0_52 = arith.constant 0 : index
    %c0_53 = arith.constant 0 : index
    %100 = vector.load %arg4[%c7_51, %c0_52, %c0_53] : memref<9x4x4xbf16, #tpu.memory_space<vmem>>, vector<1x4x4xbf16>
    %101 = vector.shape_cast %100 : vector<1x4x4xbf16> to vector<4x4xbf16>
    %cst_54 = arith.constant dense<0.000000e+00> : vector<256x4xf32>
    %102 = tpu.matmul %99, %101, %cst_54 {dimension_numbers = #tpu.dot_dimension_numbers<[1], [0], [0], [1], [0, 0, 1, 1], [], []>} : vector<256x4xbf16>, vector<4x4xbf16>, vector<256x4xf32> -> vector<256x4xf32>
    %103 = arith.addf %97, %102 : vector<256x4xf32>
    %c41 = arith.constant 41 : index
    %c0_55 = arith.constant 0 : index
    %104 = vector.load %arg8[%c41, %c0_55] : memref<304x4xf32, #tpu.memory_space<vmem>>, vector<256x4xf32>
    %cst_56 = arith.constant 0.000000e+00 : f32
    %105 = vector.broadcast %cst_56 : f32 to vector<256x4xf32>
    %106 = vector.shape_cast %34 : vector<256x1xi1> to vector<256x1xi1>
    %107 = vector.broadcast %106 : vector<256x1xi1> to vector<256x4xi1>
    %108 = arith.select %107, %104, %105 : vector<256x4xi1>, vector<256x4xf32>
    %109 = arith.truncf %108 : vector<256x4xf32> to vector<256x4xbf16>
    %c8_57 = arith.constant 8 : index
    %c0_58 = arith.constant 0 : index
    %c0_59 = arith.constant 0 : index
    %110 = vector.load %arg4[%c8_57, %c0_58, %c0_59] : memref<9x4x4xbf16, #tpu.memory_space<vmem>>, vector<1x4x4xbf16>
    %111 = vector.shape_cast %110 : vector<1x4x4xbf16> to vector<4x4xbf16>
    %cst_60 = arith.constant dense<0.000000e+00> : vector<256x4xf32>
    %112 = tpu.matmul %109, %111, %cst_60 {dimension_numbers = #tpu.dot_dimension_numbers<[1], [0], [0], [1], [0, 0, 1, 1], [], []>} : vector<256x4xbf16>, vector<4x4xbf16>, vector<256x4xf32> -> vector<256x4xf32>
    %113 = arith.addf %103, %112 : vector<256x4xf32>
    %cst_61 = arith.constant dense<0.000000e+00> : vector<4xf32>
    %114 = vector.multi_reduction <add>, %113, %cst_61 [0] : vector<256x4xf32> to vector<4xf32>
    %115 = vector.shape_cast %114 : vector<4xf32> to vector<1x4xf32>
    %c0_62 = arith.constant 0 : index
    %c0_63 = arith.constant 0 : index
    %c0_64 = arith.constant 0 : index
    %116 = vector.load %arg6[%c0_62, %c0_63, %c0_64] : memref<1x1x4xf32, #tpu.memory_space<vmem>>, vector<1x1x4xf32>
    %117 = vector.shape_cast %116 : vector<1x1x4xf32> to vector<1x4xf32>
    %118 = vector.shape_cast %115 : vector<1x4xf32> to vector<1x1x4xf32>
    tpu.vector_store %arg6[%c0_62, %c0_63, %c0_64], %118 {strides = array<i32>} : memref<1x1x4xf32, #tpu.memory_space<vmem>>, vector<1x1x4xf32>,
    %119 = arith.mulf %113, %113 : vector<256x4xf32>
    %cst_65 = arith.constant dense<0.000000e+00> : vector<4xf32>
    %120 = vector.multi_reduction <add>, %119, %cst_65 [0] : vector<256x4xf32> to vector<4xf32>
    %121 = vector.shape_cast %120 : vector<4xf32> to vector<1x4xf32>
    %c0_66 = arith.constant 0 : index
    %c0_67 = arith.constant 0 : index
    %c0_68 = arith.constant 0 : index
    %122 = vector.load %arg7[%c0_66, %c0_67, %c0_68] : memref<1x1x4xf32, #tpu.memory_space<vmem>>, vector<1x1x4xf32>
    %123 = vector.shape_cast %122 : vector<1x1x4xf32> to vector<1x4xf32>
    %124 = vector.shape_cast %121 : vector<1x4xf32> to vector<1x1x4xf32>
    tpu.vector_store %arg7[%c0_66, %c0_67, %c0_68], %124 {strides = array<i32>} : memref<1x1x4xf32, #tpu.memory_space<vmem>>, vector<1x1x4xf32>,
    %125 = arith.truncf %113 : vector<256x4xf32> to vector<256x4xbf16>
    %c0_69 = arith.constant 0 : index
    %c0_70 = arith.constant 0 : index
    %126 = vector.load %arg5[%c0_69, %c0_70] : memref<256x4xbf16, #tpu.memory_space<vmem>>, vector<256x4xbf16>
    tpu.vector_store %arg5[%c0_69, %c0_70], %125 {strides = array<i32>} : memref<256x4xbf16, #tpu.memory_space<vmem>>, vector<256x4xbf16>,
    return
  }
  func.func @transform_0(%arg0: i32) -> (i32, i32) {
    %c0_i32 = arith.constant 0 : i32
    %c0_i32_0 = arith.constant 0 : i32
    return %arg0, %c0_i32 : i32, i32
  }
  func.func @transform_1(%arg0: i32) -> (i32, i32) {
    %c0_i32 = arith.constant 0 : i32
    %c0_i32_0 = arith.constant 0 : i32
    %c0_i32_1 = arith.constant 0 : i32
    return %c0_i32, %c0_i32_0 : i32, i32
  }
  func.func @transform_2(%arg0: i32) -> (i32, i32) {
    %c0_i32 = arith.constant 0 : i32
    %c0_i32_0 = arith.constant 0 : i32
    %c0_i32_1 = arith.constant 0 : i32
    return %c0_i32, %c0_i32_0 : i32, i32
  }
  func.func @transform_3(%arg0: i32) -> (i32, i32, i32) {
    %c0_i32 = arith.constant 0 : i32
    %c0_i32_0 = arith.constant 0 : i32
    %c0_i32_1 = arith.constant 0 : i32
    %c0_i32_2 = arith.constant 0 : i32
    return %c0_i32, %c0_i32_0, %c0_i32_1 : i32, i32, i32
  }
  func.func @transform_4(%arg0: i32) -> (i32, i32) {
    %c0_i32 = arith.constant 0 : i32
    %c0_i32_0 = arith.constant 0 : i32
    return %arg0, %c0_i32 : i32, i32
  }
  func.func @transform_5(%arg0: i32) -> (i32, i32, i32) {
    %c0_i32 = arith.constant 0 : i32
    %c0_i32_0 = arith.constant 0 : i32
    %c0_i32_1 = arith.constant 0 : i32
    return %arg0, %c0_i32, %c0_i32_0 : i32, i32, i32
  }
  func.func @transform_6(%arg0: i32) -> (i32, i32, i32) {
    %c0_i32 = arith.constant 0 : i32
    %c0_i32_0 = arith.constant 0 : i32
    %c0_i32_1 = arith.constant 0 : i32
    return %arg0, %c0_i32, %c0_i32_0 : i32, i32, i32
  }
}

module attributes {stable_mosaic.version = 11 : i64} {
  func.func @_stage3_kernel(%arg0: i32, %arg1: memref<256x4xbf16, #tpu.memory_space<vmem>>, %arg2: memref<1x4xf32, #tpu.memory_space<vmem>>, %arg3: memref<1x4xf32, #tpu.memory_space<vmem>>, %arg4: memref<16x4xbf16, #tpu.memory_space<vmem>>, %arg5: memref<1x16x256xf32, #tpu.memory_space<vmem>>, %arg6: memref<1x16x256xf32, #tpu.memory_space<vmem>>) attributes {dimension_semantics = [#tpu.dimension_semantics<parallel>], iteration_bounds = array<i64: 2>, scalar_prefetch = 0 : i64, scratch_operands = 0 : i64, tpu.core_type = #tpu.core_type<tc>, window_params = [{transform_indices = @transform_0, window_bounds = array<i64: 256, 4>}, {pipeline_mode = #tpu.pipeline_mode<synchronous>, transform_indices = @transform_1, window_bounds = array<i64: 1, 4>}, {pipeline_mode = #tpu.pipeline_mode<synchronous>, transform_indices = @transform_2, window_bounds = array<i64: 1, 4>}, {pipeline_mode = #tpu.pipeline_mode<synchronous>, transform_indices = @transform_3, window_bounds = array<i64: 16, 4>}, {transform_indices = @transform_4, window_bounds = array<i64: 1, 16, 256>}, {transform_indices = @transform_5, window_bounds = array<i64: 1, 16, 256>}]} {
    %c0 = arith.constant 0 : index
    %c0_0 = arith.constant 0 : index
    %0 = vector.load %arg1[%c0, %c0_0] : memref<256x4xbf16, #tpu.memory_space<vmem>>, vector<256x4xbf16>
    %1 = arith.extf %0 : vector<256x4xbf16> to vector<256x4xf32>
    %c0_1 = arith.constant 0 : index
    %c0_2 = arith.constant 0 : index
    %2 = vector.load %arg2[%c0_1, %c0_2] : memref<1x4xf32, #tpu.memory_space<vmem>>, vector<1x4xf32>
    %3 = vector.broadcast %2 : vector<1x4xf32> to vector<256x4xf32>
    %4 = arith.mulf %1, %3 : vector<256x4xf32>
    %c0_3 = arith.constant 0 : index
    %c0_4 = arith.constant 0 : index
    %5 = vector.load %arg3[%c0_3, %c0_4] : memref<1x4xf32, #tpu.memory_space<vmem>>, vector<1x4xf32>
    %6 = vector.broadcast %5 : vector<1x4xf32> to vector<256x4xf32>
    %7 = arith.addf %4, %6 : vector<256x4xf32>
    %cst = arith.constant 0.000000e+00 : f32
    %8 = vector.broadcast %cst : f32 to vector<256x4xf32>
    %9 = arith.maximumf %7, %8 : vector<256x4xf32>
    %10 = tpu.transpose %9, [1, 0] : vector<256x4xf32> -> vector<4x256xf32>
    %11 = arith.truncf %10 : vector<4x256xf32> to vector<4x256xbf16>
    %c0_5 = arith.constant 0 : index
    %c0_6 = arith.constant 0 : index
    %12 = vector.load %arg4[%c0_5, %c0_6] : memref<16x4xbf16, #tpu.memory_space<vmem>>, vector<16x4xbf16>
    %cst_7 = arith.constant dense<0.000000e+00> : vector<16x256xf32>
    %13 = tpu.matmul %12, %11, %cst_7 {dimension_numbers = #tpu.dot_dimension_numbers<[1], [0], [0], [1], [0, 0, 1, 1], [], []>} : vector<16x4xbf16>, vector<4x256xbf16>, vector<16x256xf32> -> vector<16x256xf32>
    %c0_8 = arith.constant 0 : index
    %c0_9 = arith.constant 0 : index
    %c0_10 = arith.constant 0 : index
    %14 = vector.load %arg5[%c0_8, %c0_9, %c0_10] : memref<1x16x256xf32, #tpu.memory_space<vmem>>, vector<1x16x256xf32>
    %15 = vector.shape_cast %14 : vector<1x16x256xf32> to vector<16x256xf32>
    %16 = arith.addf %13, %15 : vector<16x256xf32>
    %c0_11 = arith.constant 0 : index
    %c0_12 = arith.constant 0 : index
    %c0_13 = arith.constant 0 : index
    %17 = vector.load %arg6[%c0_11, %c0_12, %c0_13] : memref<1x16x256xf32, #tpu.memory_space<vmem>>, vector<1x16x256xf32>
    %18 = vector.shape_cast %17 : vector<1x16x256xf32> to vector<16x256xf32>
    %19 = vector.shape_cast %16 : vector<16x256xf32> to vector<1x16x256xf32>
    tpu.vector_store %arg6[%c0_11, %c0_12, %c0_13], %19 {strides = array<i32>} : memref<1x16x256xf32, #tpu.memory_space<vmem>>, vector<1x16x256xf32>,
    return
  }
  func.func @transform_0(%arg0: i32) -> (i32, i32) {
    %c0_i32 = arith.constant 0 : i32
    %c0_i32_0 = arith.constant 0 : i32
    return %arg0, %c0_i32 : i32, i32
  }
  func.func @transform_1(%arg0: i32) -> (i32, i32) {
    %c0_i32 = arith.constant 0 : i32
    %c0_i32_0 = arith.constant 0 : i32
    %c0_i32_1 = arith.constant 0 : i32
    return %c0_i32, %c0_i32_0 : i32, i32
  }
  func.func @transform_2(%arg0: i32) -> (i32, i32) {
    %c0_i32 = arith.constant 0 : i32
    %c0_i32_0 = arith.constant 0 : i32
    %c0_i32_1 = arith.constant 0 : i32
    return %c0_i32, %c0_i32_0 : i32, i32
  }
  func.func @transform_3(%arg0: i32) -> (i32, i32) {
    %c0_i32 = arith.constant 0 : i32
    %c0_i32_0 = arith.constant 0 : i32
    %c0_i32_1 = arith.constant 0 : i32
    return %c0_i32, %c0_i32_0 : i32, i32
  }
  func.func @transform_4(%arg0: i32) -> (i32, i32, i32) {
    %c0_i32 = arith.constant 0 : i32
    %c0_i32_0 = arith.constant 0 : i32
    %c0_i32_1 = arith.constant 0 : i32
    return %arg0, %c0_i32, %c0_i32_0 : i32, i32, i32
  }
  func.func @transform_5(%arg0: i32) -> (i32, i32, i32) {
    %c0_i32 = arith.constant 0 : i32
    %c0_i32_0 = arith.constant 0 : i32
    %c0_i32_1 = arith.constant 0 : i32
    return %arg0, %c0_i32, %c0_i32_0 : i32, i32, i32
  }
}

</mosaic_0001>

<bundles_post_ra>
// kernel: bottleneck_forward.4
= control target key start
LH: loop header
LB: loop body
LE: loop exit
PB: predicated region body
PF: predicated region fallthrough
CT: control target
= control target key end

     0   :  { %s317_s9 = smov 0   ;;  %s337_s0 = inlined_call_operand.vmem [shape: f32[2,16,256], index: 0, kind: input, shape index: {}]   ;;  %s338_s1 = inlined_call_operand.vmem [shape: f32[2,16,1], index: 1, kind: output, shape index: {0}]   ;;  %s339_s2 = inlined_call_operand.vmem [shape: f32[2,16,1], index: 2, kind: output, shape index: {1}]  }
   0x1 LB: > { %s270_s10 = sadd.s32 4294967295, %s300_s9   ;;  %p274_p0 = scmp.ge.s32.totalorder %s300_s9, 1  ;;  %s300_s9 = sphi %s317_s9, %s13_s9  }
   0x2   : > { %p115_p1 = scmp.lt.s32.totalorder %s300_s9, 3 }
   0x4   : > { %p116_p2 = pnand %p274_p0, %p115_p1 }
   0x5   : > { %p142_p3 = scmp.lt.s32.totalorder (!%p116_p2), %s270_s10, 1  ;;  %vm167_vm0 = vcmask (!%p116_p2), 7168  }
   0x6   : > { %119 = sbr.rel (%p116_p2) target bundleno = 168 (0xa8), region = 24 }
   0xd   : > { %s341_s10 = smov (!%p142_p3, %s270_s10), 1 }
   0xe   : > { %s283_s11 = sshll.u32 %s341_s10, 5  ;;  %s284_s15 = sshll.u32 %s341_s10, 4 }
   0xf   : > { %s146_s14 = scalar_lea.vmem %s337_s0, %s283_s11  ;;  %s151_s18 = scalar_lea.vmem %s338_s1, %s284_s15 }
  0x10   : > { %v157_v0 = vld [vmem:[%s146_s14] sm:$0xff]  ;;  %v158_v1 = vld [vmem:[%s146_s14 + $0x8] sm:$0xff]  ;;  %v159_v2 = vld [vmem:[%s146_s14 + $0x10] sm:$0xff]  ;;  %s156_s21 = scalar_lea.vmem %s339_s2, %s284_s15 }
  0x11   : > { %v170_v3 = vmul.f32 %v157_v0, %v157_v0  ;;  %v171_v4 = vmul.f32 %v158_v1, %v158_v1  ;;  %v161_v5 = vadd.f32 %v158_v1, %v157_v0  ;;  %v160_v6 = vld [vmem:[%s146_s14 + $0x18] sm:$0xff]  ;;  %v172_v7 = vmul.f32 %v159_v2, %v159_v2 }
  0x12   : > { %v173_v8 = vmul.f32 %v160_v6, %v160_v6  ;;  %v164_v10 = vadd.f32 %v160_v6, %v159_v2 }
  0x13   : > { %v174_v9 = vadd.f32 %v171_v4, %v170_v3  ;;  %162 = vadd.xlane.f32.xlu0 %v161_v5 }
  0x14   : > { %v177_v11 = vadd.f32 %v173_v8, %v172_v7 }
  0x15   : > { %175 = vadd.xlane.f32.xlu1 %v174_v9 }
  0x17   : > { %165 = vadd.xlane.f32.xlu0 %v164_v10 }
  0x19   : > { %178 = vadd.xlane.f32.xlu1 %v177_v11 }
  0xa0   : > { %v163_v12 = vpop.xlane.xlu0 %162 }
  0xa1   : > { %168 = vst.msk [vmem:[%s151_s18] sm:$0xff] %vm167_vm0, %v163_v12 }
  0xa2   : > { %v176_v13 = vpop.xlane.xlu1 %175 }
  0xa3   : > { %180 = vst.msk [vmem:[%s156_s21] sm:$0xff] %vm167_vm0, %v176_v13 }
  0xa4   : > { %v166_v14 = vpop.xlane.xlu0 %165 }
  0xa5   : > { %169 = vst.msk [vmem:[%s151_s18 + $0x8] sm:$0xff] %vm167_vm0, %v166_v14 }
  0xa6   : > { %v179_v15 = vpop.xlane.xlu1 %178 }
  0xa7   : > { %181 = vst.msk [vmem:[%s156_s21 + $0x8] sm:$0xff] %vm167_vm0, %v179_v15 }
  0xa8 PF: > { %s13_s9 = sadd.s32 1, %s300_s9  }
  0xa9   : > { %p10_p4 = scmp.ge.s32.totalorder %s13_s9, 4  }
  0xab   :  { %12 = sbr.rel (!%p10_p4) target bundleno = 1 (0x1), region = 66 }

// kernel: bottleneck_forward.5
= control target key start
LH: loop header
LB: loop body
LE: loop exit
PB: predicated region body
PF: predicated region fallthrough
CT: control target
= control target key end

     0   :  { %s939_s21 = smov 0   ;;  %s1052_s0 = inlined_call_operand.vmem [shape: f32[2,16,256], index: 0, kind: input, shape index: {}]   ;;  %s1053_s1 = inlined_call_operand.vmem [shape: f32[16,1], index: 1, kind: input, shape index: {}]   ;;  %s1054_s2 = inlined_call_operand.vmem [shape: f32[16,1], index: 2, kind: input, shape index: {}]   ;;  %s1055_s3 = inlined_call_operand.vmem [shape: bf16[4,16], index: 3, kind: input, shape index: {}]   ;;  %s1056_s4 = inlined_call_operand.vmem [shape: bf16[512,4], index: 4, kind: output, shape index: {0}]   ;;  %s1057_s5 = inlined_call_operand.vmem [shape: f32[2,4,1], index: 5, kind: output, shape index: {1}]   ;;  %s1058_s6 = inlined_call_operand.vmem [shape: f32[2,4,1], index: 6, kind: output, shape index: {2}]  }
   0x1 LB: > { %s945_s22 = sadd.s32 4294967295, %s901_s21   ;;  %p726_p0 = scmp.ge.s32.totalorder %s901_s21, 1  ;;  %s901_s21 = sphi %s939_s21, %s17_s21  }
   0x2   : > { %p217_p1 = scmp.lt.s32.totalorder %s901_s21, 3 }
   0x4   : > { %p218_p2 = pnand %p726_p0, %p217_p1 }
   0x5   : > { %v295_v0 = vld [vmem:[%s1054_s2] sm:$0xff] (!%p218_p2)  ;;  %v903_v2 = vmov (!%p218_p2), 0   ;;  %v296_v3 = vld [vmem:[%s1054_s2 + $0x8] sm:$0xff] (!%p218_p2)  ;;  %p255_p3 = scmp.lt.s32.totalorder (!%p218_p2), %s945_s22, 1  ;;  %vm318_vm0 = vcmask (!%p218_p2), 130048   ;;  %vm363_vm1 = vcmask (!%p218_p2), 1043456  }
   0x6   : > { %221 = sbr.rel (%p218_p2) target bundleno = 606 (0x25e), region = 36  ;;  %v279_v1 = vld [vmem:[%s1053_s1] sm:$0xff] (!%p218_p2)  ;;  %812 = vset.pattern.permute.xlu1 (!%p218_p2), %v903_v2  ;;  %811 = vset.pattern.permute.xlu0 (!%p218_p2), %v903_v2  ;;  %v280_v4 = vld [vmem:[%s1053_s1 + $0x8] sm:$0xff] (!%p218_p2)  ;;  %vm369_vm2 = vcmask (!%p218_p2), 3072   ;;  %s729_s23 = sshll.u32 (!%p218_p2), %s945_s22, 5  ;;  %vm571_vm3 = vcmask (!%p218_p2), 27648  }
   0x7   : > { %299 = vperm.xlu1 (!%p218_p2), %812, %v295_v0   ;;  %283 = vperm.xlu0 (!%p218_p2), %811, %v279_v1   ;;  %v315_v27 = vld [vmem:[%s1055_s3] sm:$0x3] (!%p218_p2)  ;;  %p261_p4 = scmp.lt.s32.totalorder (!%p218_p2), %s729_s23, 63 }
   0x8   : > { %354 = vmatprep.mubr.bf16.mxu0 (!%p218_p2), %v903_v2 }
   0xb   : > { %304 = vperm.xlu1 (!%p218_p2), %812, %v296_v3   ;;  %288 = vperm.xlu0 (!%p218_p2), %811, %v280_v4  }
   0xd   : > { %s963_s7 = scalar_select %p255_p3, %s945_s22, 1 }
   0xe   : > { %s1060_s23 = smov (!%p261_p4, %s729_s23), 63 }
   0xf   : > { %s768_s8 = sshll.u32 %s963_s7, 5  ;;  %s731_s14 = sshll.u32 %s963_s7, 2 }
  0x10   : > { %s259_s11 = scalar_lea.vmem %s1052_s0, %s768_s8  ;;  %s269_s17 = scalar_lea.vmem %s1057_s5, %s731_s14 }
  0x11   : > { %v275_v5 = vld [vmem:[%s259_s11] sm:$0xff]  ;;  %v276_v6 = vld [vmem:[%s259_s11 + $0x8] sm:$0xff]  ;;  %v277_v11 = vld [vmem:[%s259_s11 + $0x10] sm:$0xff]  ;;  %s273_s20 = scalar_lea.vmem %s1058_s6, %s731_s14  ;;  %s730_s24 = sshll.u32 %s1060_s23, 2 }
  0x12   : > { %v278_v12 = vld [vmem:[%s259_s11 + $0x18] sm:$0xff]  ;;  %s983_s27 = scalar_lea.vmem %s1056_s4, %s730_s24 }
  0x86   : > { %v300_v7 = vpop.permute.xlu1 %299  ;;  %v284_v8 = vpop.permute.xlu0 %283 }
  0x87   : > { %v291_v9 = vmul.f32 %v284_v8, %v275_v5  ;;  %v292_v10 = vmul.f32 %v284_v8, %v276_v6 }
  0x89   : > { %v307_v14 = vadd.f32 %v300_v7, %v291_v9  ;;  %v308_v17 = vadd.f32 %v300_v7, %v292_v10 }
  0x8a   : > { %v289_v13 = vpop.permute.xlu0 %288  ;;  %v305_v18 = vpop.permute.xlu1 %304 }
  0x8b   : > { %v293_v15 = vmul.f32 %v289_v13, %v277_v11  ;;  %v294_v16 = vmul.f32 %v289_v13, %v278_v12  ;;  %v312_v21 = vmax.f32 %v308_v17, 0.0  ;;  %v311_v23 = vmax.f32 %v307_v14, 0.0 }
  0x8d   : > { %v309_v19 = vadd.f32 %v305_v18, %v293_v15  ;;  %v310_v20 = vadd.f32 %v305_v18, %v294_v16 }
  0x8f   : > { %v314_v22 = vmax.f32 %v310_v20, 0.0  ;;  %v313_v24 = vmax.f32 %v309_v19, 0.0 }
  0x91   : > { %v317_v25 = vpack.c.bf16 %v314_v22, %v312_v21  ;;  %v316_v26 = vpack.c.bf16 %v313_v24, %v311_v23 }
  0x93   : > { %322 = vmatprep.subr.bf16.mxu0 %v317_v25 }
  0x94   : > { %323 = vmatpush1.bf16.msra.mxu0 %v316_v26 }
  0x97   : > { %733 = vmatmul.mubr.msk.bf16.vlgmr.msra.gmra.mrb[0].mxu0 %vm318_vm0, %v315_v27 }
 0x16a   : > { %v356_v28 = vpop.f32.mrb[0].mxu0 }
 0x16b   : > { %v371_v29 = vmul.f32 %v356_v28, %v356_v28  ;;  %v358_v30 = vpop.f32.mrb[1].mxu0  ;;  %v364_v31 = vsel %vm363_vm1, %v356_v28, 0.0 }
 0x16c   : > { %v813_v32 = vpack.i.bf16 %v358_v30, %v356_v28  ;;  %v372_v33 = vmul.f32 %v358_v30, %v358_v30  ;;  %v360_v34 = vpop.f32.mrb[2].mxu0  ;;  %v365_v35 = vsel %vm363_vm1, %v358_v30, 0.0 }
 0x16d   : > { %v361_v36 = vpop.f32.mrb[3].mxu0  ;;  %v366_v37 = vadd.f32 %v365_v35, %v364_v31  ;;  %v373_v38 = vsel %vm363_vm1, %v371_v29, 0.0 }
 0x16e   : > { %v374_v39 = vsel %vm363_vm1, %v372_v33, 0.0 }
 0x16f   : > { %367 = vadd.xlane.f32.xlu0 %v366_v37  ;;  %v375_v40 = vadd.f32 %v374_v39, %v373_v38 }
 0x171   : > { %376 = vadd.xlane.f32.xlu1 %v375_v40 }
 0x19c   : > { %814 = vxpose.xlu0.b32.start.end [1/1] (short) %v813_v32, 128 }
 0x1fc   : > { %v368_v41 = vpop.xlane.xlu0 %367 }
 0x1fd   : > { %370 = vst.msk [vmem:[%s269_s17] sm:$0xf] %vm369_vm2, %v368_v41 }
 0x1fe   : > { %v377_v42 = vpop.xlane.xlu1 %376 }
 0x1ff   : > { %378 = vst.msk [vmem:[%s273_s20] sm:$0xf] %vm369_vm2, %v377_v42 }
 0x21c   : > { %v815_v43 = vpop.trf.xlu0 }
 0x21d   : > { %v819_v44 = vunpack.i.h.bf16 %v815_v43  ;;  %v816_v45 = vunpack.i.l.bf16 %v815_v43 }
 0x21f   : > { %v785_v46 = vpack.c.bf16 %v819_v44, %v819_v44  ;;  %v769_v47 = vpack.c.bf16 %v816_v45, %v816_v45 }
 0x220   : > { %v820_v48 = vpop.trf.xlu0 }
 0x221   : > { %588 = vst.msk [vmem:[%s983_s27 + $0x40] sm:$0xf] %vm571_vm3, %v785_v46  ;;  %572 = vst.msk [vmem:[%s983_s27] sm:$0xf] %vm571_vm3, %v769_v47  ;;  %v824_v49 = vunpack.i.h.bf16 %v820_v48  ;;  %v821_v50 = vunpack.i.l.bf16 %v820_v48 }
 0x223   : > { %v786_v51 = vpack.c.bf16 %v824_v49, %v824_v49  ;;  %v770_v52 = vpack.c.bf16 %v821_v50, %v821_v50 }
 0x224   : > { %v825_v53 = vpop.trf.xlu0 }
 0x225   : > { %589 = vst.msk [vmem:[%s983_s27 + $0x44] sm:$0xf] %vm571_vm3, %v786_v51  ;;  %573 = vst.msk [vmem:[%s983_s27 + $0x4] sm:$0xf] %vm571_vm3, %v770_v52  ;;  %v829_v54 = vunpack.i.h.bf16 %v825_v53  ;;  %v826_v55 = vunpack.i.l.bf16 %v825_v53 }
 0x227   : > { %v787_v56 = vpack.c.bf16 %v829_v54, %v829_v54  ;;  %v771_v57 = vpack.c.bf16 %v826_v55, %v826_v55 }
 0x228   : > { %v830_v58 = vpop.trf.xlu0 }
 0x229   : > { %590 = vst.msk [vmem:[%s983_s27 + $0x48] sm:$0xf] %vm571_vm3, %v787_v56  ;;  %574 = vst.msk [vmem:[%s983_s27 + $0x8] sm:$0xf] %vm571_vm3, %v771_v57  ;;  %v834_v59 = vunpack.i.h.bf16 %v830_v58  ;;  %v831_v60 = vunpack.i.l.bf16 %v830_v58 }
 0x22b   : > { %v788_v61 = vpack.c.bf16 %v834_v59, %v834_v59  ;;  %v772_v62 = vpack.c.bf16 %v831_v60, %v831_v60 }
 0x22c   : > { %v835_v63 = vpop.trf.xlu0 }
 0x22d   : > { %591 = vst.msk [vmem:[%s983_s27 + $0x4c] sm:$0xf] %vm571_vm3, %v788_v61  ;;  %575 = vst.msk [vmem:[%s983_s27 + $0xc] sm:$0xf] %vm571_vm3, %v772_v62  ;;  %v839_v0 = vunpack.i.h.bf16 %v835_v63  ;;  %v836_v1 = vunpack.i.l.bf16 %v835_v63 }
 0x22f   : > { %v789_v2 = vpack.c.bf16 %v839_v0, %v839_v0  ;;  %v773_v3 = vpack.c.bf16 %v836_v1, %v836_v1 }
 0x230   : > { %v840_v4 = vpop.trf.xlu0 }
 0x231   : > { %592 = vst.msk [vmem:[%s983_s27 + $0x50] sm:$0xf] %vm571_vm3, %v789_v2  ;;  %576 = vst.msk [vmem:[%s983_s27 + $0x10] sm:$0xf] %vm571_vm3, %v773_v3  ;;  %v844_v5 = vunpack.i.h.bf16 %v840_v4  ;;  %v841_v6 = vunpack.i.l.bf16 %v840_v4 }
 0x233   : > { %v790_v7 = vpack.c.bf16 %v844_v5, %v844_v5  ;;  %v774_v8 = vpack.c.bf16 %v841_v6, %v841_v6 }
 0x234   : > { %v845_v9 = vpop.trf.xlu0 }
 0x235   : > { %593 = vst.msk [vmem:[%s983_s27 + $0x54] sm:$0xf] %vm571_vm3, %v790_v7  ;;  %577 = vst.msk [vmem:[%s983_s27 + $0x14] sm:$0xf] %vm571_vm3, %v774_v8  ;;  %v849_v10 = vunpack.i.h.bf16 %v845_v9  ;;  %v846_v11 = vunpack.i.l.bf16 %v845_v9 }
 0x237   : > { %v791_v12 = vpack.c.bf16 %v849_v10, %v849_v10  ;;  %v775_v13 = vpack.c.bf16 %v846_v11, %v846_v11 }
 0x238   : > { %v850_v14 = vpop.trf.xlu0 }
 0x239   : > { %594 = vst.msk [vmem:[%s983_s27 + $0x58] sm:$0xf] %vm571_vm3, %v791_v12  ;;  %578 = vst.msk [vmem:[%s983_s27 + $0x18] sm:$0xf] %vm571_vm3, %v775_v13  ;;  %v854_v15 = vunpack.i.h.bf16 %v850_v14  ;;  %v851_v16 = vunpack.i.l.bf16 %v850_v14 }
 0x23b   : > { %v792_v17 = vpack.c.bf16 %v854_v15, %v854_v15  ;;  %v776_v18 = vpack.c.bf16 %v851_v16, %v851_v16 }
 0x23c   : > { %v855_v19 = vpop.trf.xlu0 }
 0x23d   : > { %595 = vst.msk [vmem:[%s983_s27 + $0x5c] sm:$0xf] %vm571_vm3, %v792_v17  ;;  %579 = vst.msk [vmem:[%s983_s27 + $0x1c] sm:$0xf] %vm571_vm3, %v776_v18  ;;  %v859_v20 = vunpack.i.h.bf16 %v855_v19  ;;  %v856_v21 = vunpack.i.l.bf16 %v855_v19 }
 0x23f   : > { %v793_v22 = vpack.c.bf16 %v859_v20, %v859_v20  ;;  %v777_v23 = vpack.c.bf16 %v856_v21, %v856_v21 }
 0x240   : > { %v860_v24 = vpop.trf.xlu0 }
 0x241   : > { %596 = vst.msk [vmem:[%s983_s27 + $0x60] sm:$0xf] %vm571_vm3, %v793_v22  ;;  %580 = vst.msk [vmem:[%s983_s27 + $0x20] sm:$0xf] %vm571_vm3, %v777_v23  ;;  %v864_v25 = vunpack.i.h.bf16 %v860_v24  ;;  %v861_v26 = vunpack.i.l.bf16 %v860_v24 }
 0x243   : > { %v794_v27 = vpack.c.bf16 %v864_v25, %v864_v25  ;;  %v778_v28 = vpack.c.bf16 %v861_v26, %v861_v26 }
 0x244   : > { %v865_v29 = vpop.trf.xlu0 }
 0x245   : > { %597 = vst.msk [vmem:[%s983_s27 + $0x64] sm:$0xf] %vm571_vm3, %v794_v27  ;;  %581 = vst.msk [vmem:[%s983_s27 + $0x24] sm:$0xf] %vm571_vm3, %v778_v28  ;;  %v869_v30 = vunpack.i.h.bf16 %v865_v29  ;;  %v866_v31 = vunpack.i.l.bf16 %v865_v29 }
 0x247   : > { %v795_v32 = vpack.c.bf16 %v869_v30, %v869_v30  ;;  %v779_v33 = vpack.c.bf16 %v866_v31, %v866_v31 }
 0x248   : > { %v870_v34 = vpop.trf.xlu0 }
 0x249   : > { %598 = vst.msk [vmem:[%s983_s27 + $0x68] sm:$0xf] %vm571_vm3, %v795_v32  ;;  %582 = vst.msk [vmem:[%s983_s27 + $0x28] sm:$0xf] %vm571_vm3, %v779_v33  ;;  %v874_v35 = vunpack.i.h.bf16 %v870_v34  ;;  %v871_v36 = vunpack.i.l.bf16 %v870_v34 }
 0x24b   : > { %v796_v37 = vpack.c.bf16 %v874_v35, %v874_v35  ;;  %v780_v38 = vpack.c.bf16 %v871_v36, %v871_v36 }
 0x24c   : > { %v875_v39 = vpop.trf.xlu0 }
 0x24d   : > { %599 = vst.msk [vmem:[%s983_s27 + $0x6c] sm:$0xf] %vm571_vm3, %v796_v37  ;;  %583 = vst.msk [vmem:[%s983_s27 + $0x2c] sm:$0xf] %vm571_vm3, %v780_v38  ;;  %v879_v40 = vunpack.i.h.bf16 %v875_v39  ;;  %v876_v41 = vunpack.i.l.bf16 %v875_v39 }
 0x24f   : > { %v797_v42 = vpack.c.bf16 %v879_v40, %v879_v40  ;;  %v781_v43 = vpack.c.bf16 %v876_v41, %v876_v41 }
 0x250   : > { %v880_v44 = vpop.trf.xlu0 }
 0x251   : > { %600 = vst.msk [vmem:[%s983_s27 + $0x70] sm:$0xf] %vm571_vm3, %v797_v42  ;;  %584 = vst.msk [vmem:[%s983_s27 + $0x30] sm:$0xf] %vm571_vm3, %v781_v43  ;;  %v884_v45 = vunpack.i.h.bf16 %v880_v44  ;;  %v881_v46 = vunpack.i.l.bf16 %v880_v44 }
 0x253   : > { %v798_v47 = vpack.c.bf16 %v884_v45, %v884_v45  ;;  %v782_v48 = vpack.c.bf16 %v881_v46, %v881_v46 }
 0x254   : > { %v885_v49 = vpop.trf.xlu0 }
 0x255   : > { %601 = vst.msk [vmem:[%s983_s27 + $0x74] sm:$0xf] %vm571_vm3, %v798_v47  ;;  %585 = vst.msk [vmem:[%s983_s27 + $0x34] sm:$0xf] %vm571_vm3, %v782_v48  ;;  %v889_v50 = vunpack.i.h.bf16 %v885_v49  ;;  %v886_v51 = vunpack.i.l.bf16 %v885_v49 }
 0x257   : > { %v799_v52 = vpack.c.bf16 %v889_v50, %v889_v50  ;;  %v783_v53 = vpack.c.bf16 %v886_v51, %v886_v51 }
 0x258   : > { %v890_v54 = vpop.trf.xlu0 }
 0x259   : > { %602 = vst.msk [vmem:[%s983_s27 + $0x78] sm:$0xf] %vm571_vm3, %v799_v52  ;;  %586 = vst.msk [vmem:[%s983_s27 + $0x38] sm:$0xf] %vm571_vm3, %v783_v53  ;;  %v894_v55 = vunpack.i.h.bf16 %v890_v54  ;;  %v891_v56 = vunpack.i.l.bf16 %v890_v54 }
 0x25b   : > { %v800_v57 = vpack.c.bf16 %v894_v55, %v894_v55  ;;  %v784_v58 = vpack.c.bf16 %v891_v56, %v891_v56 }
 0x25d   : > { %603 = vst.msk [vmem:[%s983_s27 + $0x7c] sm:$0xf] %vm571_vm3, %v800_v57  ;;  %587 = vst.msk [vmem:[%s983_s27 + $0x3c] sm:$0xf] %vm571_vm3, %v784_v58 }
 0x25e PF: > { %s17_s21 = sadd.s32 1, %s901_s21  }
 0x25f   : > { %p14_p5 = scmp.ge.s32.totalorder %s17_s21, 4  }
 0x261   :  { %16 = sbr.rel (!%p14_p5) target bundleno = 1 (0x1), region = 90 }

// kernel: bottleneck_forward.7
= control target key start
LH: loop header
LB: loop body
LE: loop exit
PB: predicated region body
PF: predicated region fallthrough
CT: control target
= control target key end

     0   :  { %s809_s18 = smov 0   ;;  %s929_s0 = inlined_call_operand.vmem [shape: bf16[512,4], index: 0, kind: input, shape index: {}]   ;;  %s930_s1 = inlined_call_operand.vmem [shape: f32[1,4], index: 1, kind: input, shape index: {}]   ;;  %s931_s2 = inlined_call_operand.vmem [shape: f32[1,4], index: 2, kind: input, shape index: {}]   ;;  %s932_s3 = inlined_call_operand.vmem [shape: bf16[16,4], index: 3, kind: input, shape index: {}]   ;;  %s933_s4 = inlined_call_operand.vmem [shape: f32[2,16,256], index: 4, kind: input, shape index: {}]   ;;  %s934_s5 = inlined_call_operand.vmem [shape: f32[2,16,256], index: 5, kind: output, shape index: {}]  }
   0x1 LB: > { %s815_s19 = sadd.s32 4294967295, %s776_s18   ;;  %p628_p0 = scmp.ge.s32.totalorder %s776_s18, 1  ;;  %s776_s18 = sphi %s809_s18, %s15_s18  }
   0x2   : > { %p198_p1 = scmp.lt.s32.totalorder %s776_s18, 3 }
   0x4   : > { %p199_p2 = pnand %p628_p0, %p198_p1 }
   0x5   : > { %s629_s20 = sshll.u32 (!%p199_p2), %s815_s19, 5  ;;  %v828_v0 = vld [vmem:[%s930_s1] ss:$0 sm:$0xff] (!%p199_p2)  ;;  %vm503_vm0 = vcmask (!%p199_p2), 1041408   ;;  %vm499_vm1 = vcmask (!%p199_p2), 31744   ;;  %p237_p4 = scmp.lt.s32.totalorder (!%p199_p2), %s815_s19, 1 }
   0x6   : > { %202 = sbr.rel (%p199_p2) target bundleno = 383 (0x17f), region = 40  ;;  %p232_p3 = scmp.lt.s32.totalorder (!%p199_p2), %s629_s20, 63  ;;  %v837_v9 = vld [vmem:[%s931_s2] ss:$0 sm:$0xff] (!%p199_p2) }
   0xd   : > { %s936_s20 = smov (!%p232_p3, %s629_s20), 63  ;;  %s938_s19 = smov (!%p237_p4, %s815_s19), 1 }
   0xe   : > { %s630_s21 = sshll.u32 %s936_s20, 2  ;;  %s642_s6 = sshll.u32 %s938_s19, 5 }
   0xf   : > { %s823_s24 = scalar_lea.vmem %s929_s0, %s630_s21  ;;  %s241_s9 = scalar_lea.vmem %s933_s4, %s642_s6 }
  0x10   : > { %v645_v1 = vld [vmem:[%s823_s24] sm:$0xff]   ;;  %v708_v3 = vld [vmem:[%s823_s24 + $0x8] sm:$0xff]   ;;  %v709_v28 = vld [vmem:[%s823_s24 + $0x10] sm:$0xff]   ;;  %s246_s12 = scalar_lea.vmem %s934_s5, %s642_s6 }
  0x11   : > { %v715_v2 = vld [vmem:[%s823_s24 + $0x40] sm:$0xff]   ;;  %v646_v4 = vunpack.c.l.bf16 %v645_v1  ;;  %v647_v6 = vunpack.c.h.bf16 %v645_v1  ;;  %v716_v8 = vld [vmem:[%s823_s24 + $0x48] sm:$0xff]   ;;  %v650_v10 = vunpack.c.l.bf16 %v708_v3  ;;  %v651_v12 = vunpack.c.h.bf16 %v708_v3  ;;  %v717_v29 = vld [vmem:[%s823_s24 + $0x50] sm:$0xff]  }
  0x12   : > { %v678_v5 = vunpack.c.l.bf16 %v715_v2  ;;  %v679_v7 = vunpack.c.h.bf16 %v715_v2  ;;  %v682_v11 = vunpack.c.l.bf16 %v716_v8  ;;  %v683_v13 = vunpack.c.h.bf16 %v716_v8  ;;  %v710_v46 = vld [vmem:[%s823_s24 + $0x18] sm:$0xff]   ;;  %v711_v3 = vld [vmem:[%s823_s24 + $0x20] sm:$0xff]  }
  0x13   : > { %v319_v14 = vmul.f32 %v646_v4, %v828_v0  ;;  %v320_v16 = vmul.f32 %v647_v6, %v828_v0  ;;  %v321_v18 = vmul.f32 %v650_v10, %v828_v0  ;;  %v322_v20 = vmul.f32 %v651_v12, %v828_v0  ;;  %v718_v47 = vld [vmem:[%s823_s24 + $0x58] sm:$0xff]   ;;  %v719_v4 = vld [vmem:[%s823_s24 + $0x60] sm:$0xff]  }
  0x14   : > { %v335_v15 = vmul.f32 %v678_v5, %v828_v0  ;;  %v336_v17 = vmul.f32 %v679_v7, %v828_v0  ;;  %v337_v19 = vmul.f32 %v682_v11, %v828_v0  ;;  %v338_v27 = vmul.f32 %v683_v13, %v828_v0 }
  0x15   : > { %v358_v21 = vadd.f32 %v837_v9, %v319_v14  ;;  %v359_v23 = vadd.f32 %v837_v9, %v320_v16  ;;  %v360_v25 = vadd.f32 %v837_v9, %v321_v18  ;;  %v361_v35 = vadd.f32 %v837_v9, %v322_v20 }
  0x16   : > { %v374_v22 = vadd.f32 %v837_v9, %v335_v15  ;;  %v375_v24 = vadd.f32 %v837_v9, %v336_v17  ;;  %v376_v26 = vadd.f32 %v837_v9, %v337_v19  ;;  %v654_v36 = vunpack.c.l.bf16 %v709_v28 }
  0x17   : > { %v390_v30 = vmax.f32 %v358_v21, 0.0  ;;  %v391_v32 = vmax.f32 %v359_v23, 0.0  ;;  %v686_v37 = vunpack.c.l.bf16 %v717_v29  ;;  %v392_v39 = vmax.f32 %v360_v25, 0.0  ;;  %v720_v25 = vld [vmem:[%s823_s24 + $0x68] sm:$0xff]  }
  0x18   : > { %v406_v31 = vmax.f32 %v374_v22, 0.0  ;;  %v407_v33 = vmax.f32 %v375_v24, 0.0  ;;  %v408_v40 = vmax.f32 %v376_v26, 0.0  ;;  %v377_v41 = vadd.f32 %v837_v9, %v338_v27  ;;  %v712_v24 = vld [vmem:[%s823_s24 + $0x28] sm:$0xff]  }
  0x19   : > { %v323_v42 = vmul.f32 %v654_v36, %v828_v0  ;;  %v339_v43 = vmul.f32 %v686_v37, %v828_v0  ;;  %v655_v44 = vunpack.c.h.bf16 %v709_v28  ;;  %v687_v45 = vunpack.c.h.bf16 %v717_v29 }
  0x1a   : > { %v732_v34 = vpack.i.bf16 %v406_v31, %v390_v30  ;;  %v734_v38 = vpack.i.bf16 %v407_v33, %v391_v32  ;;  %v393_v48 = vmax.f32 %v361_v35, 0.0  ;;  %v736_v49 = vpack.i.bf16 %v408_v40, %v392_v39 }
  0x1b   : > { %v409_v50 = vmax.f32 %v377_v41, 0.0  ;;  %v658_v51 = vunpack.c.l.bf16 %v710_v46  ;;  %v690_v52 = vunpack.c.l.bf16 %v718_v47  ;;  %v362_v53 = vadd.f32 %v837_v9, %v323_v42 }
  0x1c   : > { %733 = vxpose.xlu0.b32.start [1/16] (narrow) %v732_v34, 8  ;;  %v378_v54 = vadd.f32 %v837_v9, %v339_v43  ;;  %v324_v55 = vmul.f32 %v655_v44, %v828_v0  ;;  %v340_v56 = vmul.f32 %v687_v45, %v828_v0  ;;  %v659_v57 = vunpack.c.h.bf16 %v710_v46  ;;  %v713_v44 = vld [vmem:[%s823_s24 + $0x30] sm:$0xff]  }
  0x1d   : > { %v738_v58 = vpack.i.bf16 %v409_v50, %v393_v48  ;;  %v325_v59 = vmul.f32 %v658_v51, %v828_v0  ;;  %v341_v60 = vmul.f32 %v690_v52, %v828_v0  ;;  %v691_v61 = vunpack.c.h.bf16 %v718_v47  ;;  %v721_v45 = vld [vmem:[%s823_s24 + $0x70] sm:$0xff]  }
  0x1e   : > { %v394_v62 = vmax.f32 %v362_v53, 0.0  ;;  %v410_v63 = vmax.f32 %v378_v54, 0.0  ;;  %v363_v1 = vadd.f32 %v837_v9, %v324_v55  ;;  %v379_v2 = vadd.f32 %v837_v9, %v340_v56 }
  0x1f   : > { %v326_v5 = vmul.f32 %v659_v57, %v828_v0  ;;  %v364_v6 = vadd.f32 %v837_v9, %v325_v59  ;;  %v380_v7 = vadd.f32 %v837_v9, %v341_v60  ;;  %v342_v8 = vmul.f32 %v691_v61, %v828_v0 }
  0x20   : > { %735 = vxpose.xlu0.b32.cont [2/16] (narrow) %v734_v38, 8  ;;  %v662_v10 = vunpack.c.l.bf16 %v711_v3  ;;  %v740_v11 = vpack.i.bf16 %v410_v63, %v394_v62  ;;  %v395_v12 = vmax.f32 %v363_v1, 0.0  ;;  %v411_v13 = vmax.f32 %v379_v2, 0.0  ;;  %v714_v2 = vld [vmem:[%s823_s24 + $0x38] sm:$0xff]  }
  0x21   : > { %v694_v14 = vunpack.c.l.bf16 %v719_v4  ;;  %v365_v15 = vadd.f32 %v837_v9, %v326_v5  ;;  %v396_v16 = vmax.f32 %v364_v6, 0.0  ;;  %v412_v17 = vmax.f32 %v380_v7, 0.0 }
  0x22   : > { %v381_v18 = vadd.f32 %v837_v9, %v342_v8  ;;  %v327_v19 = vmul.f32 %v662_v10, %v828_v0  ;;  %v742_v20 = vpack.i.bf16 %v411_v13, %v395_v12  ;;  %v663_v22 = vunpack.c.h.bf16 %v711_v3  ;;  %v722_v3 = vld [vmem:[%s823_s24 + $0x78] sm:$0xff]  }
  0x23   : > { %v343_v21 = vmul.f32 %v694_v14, %v828_v0  ;;  %v695_v23 = vunpack.c.h.bf16 %v719_v4  ;;  %v397_v26 = vmax.f32 %v365_v15, 0.0  ;;  %v666_v29 = vunpack.c.l.bf16 %v712_v24 }
  0x24   : > { %737 = vxpose.xlu0.b32.cont [3/16] (narrow) %v736_v49, 8  ;;  %v413_v27 = vmax.f32 %v381_v18, 0.0  ;;  %v366_v28 = vadd.f32 %v837_v9, %v327_v19  ;;  %v698_v30 = vunpack.c.l.bf16 %v720_v25  ;;  %v744_v31 = vpack.i.bf16 %v412_v17, %v396_v16 }
  0x25   : > { %v382_v32 = vadd.f32 %v837_v9, %v343_v21  ;;  %v328_v33 = vmul.f32 %v663_v22, %v828_v0  ;;  %v344_v34 = vmul.f32 %v695_v23, %v828_v0  ;;  %v667_v35 = vunpack.c.h.bf16 %v712_v24 }
  0x26   : > { %v699_v36 = vunpack.c.h.bf16 %v720_v25  ;;  %v746_v37 = vpack.i.bf16 %v413_v27, %v397_v26  ;;  %v398_v38 = vmax.f32 %v366_v28, 0.0  ;;  %v329_v39 = vmul.f32 %v666_v29, %v828_v0 }
  0x27   : > { %v345_v40 = vmul.f32 %v698_v30, %v828_v0  ;;  %v414_v41 = vmax.f32 %v382_v32, 0.0  ;;  %v367_v42 = vadd.f32 %v837_v9, %v328_v33  ;;  %v383_v43 = vadd.f32 %v837_v9, %v344_v34 }
  0x28   : > { %739 = vxpose.xlu0.b32.cont [4/16] (narrow) %v738_v58, 8  ;;  %v778_v46 = vmov 0   ;;  %v330_v47 = vmul.f32 %v667_v35, %v828_v0  ;;  %v346_v48 = vmul.f32 %v699_v36, %v828_v0  ;;  %v368_v49 = vadd.f32 %v837_v9, %v329_v39 }
  0x29   : > { %542 = vmatprep.mubr.bf16.mxu0 %v778_v46  ;;  %v384_v50 = vadd.f32 %v837_v9, %v345_v40  ;;  %v670_v51 = vunpack.c.l.bf16 %v713_v44  ;;  %v748_v52 = vpack.i.bf16 %v414_v41, %v398_v38  ;;  %v399_v53 = vmax.f32 %v367_v42, 0.0 }
  0x2a   : > { %v415_v54 = vmax.f32 %v383_v43, 0.0  ;;  %v702_v55 = vunpack.c.l.bf16 %v721_v45  ;;  %v369_v56 = vadd.f32 %v837_v9, %v330_v47  ;;  %v385_v57 = vadd.f32 %v837_v9, %v346_v48  ;;  %v492_v47 = vld [vmem:[%s241_s9 + $0x10] sm:$0xff] }
  0x2b   : > { %v400_v58 = vmax.f32 %v368_v49, 0.0  ;;  %v416_v59 = vmax.f32 %v384_v50, 0.0  ;;  %v331_v60 = vmul.f32 %v670_v51, %v828_v0  ;;  %v671_v63 = vunpack.c.h.bf16 %v713_v44  ;;  %v490_v44 = vld [vmem:[%s241_s9] sm:$0xff]  ;;  %v493_v50 = vld [vmem:[%s241_s9 + $0x18] sm:$0xff] }
  0x2c   : > { %741 = vxpose.xlu0.b32.cont [5/16] (narrow) %v740_v11, 8  ;;  %v750_v61 = vpack.i.bf16 %v415_v54, %v399_v53  ;;  %v347_v62 = vmul.f32 %v702_v55, %v828_v0  ;;  %v703_v1 = vunpack.c.h.bf16 %v721_v45  ;;  %v401_v4 = vmax.f32 %v369_v56, 0.0  ;;  %v491_v45 = vld [vmem:[%s241_s9 + $0x8] sm:$0xff] }
  0x2d   : > { %v417_v5 = vmax.f32 %v385_v57, 0.0  ;;  %v370_v6 = vadd.f32 %v837_v9, %v331_v60  ;;  %v674_v7 = vunpack.c.l.bf16 %v714_v2  ;;  %v706_v8 = vunpack.c.l.bf16 %v722_v3 }
  0x2e   : > { %v752_v10 = vpack.i.bf16 %v416_v59, %v400_v58  ;;  %v386_v11 = vadd.f32 %v837_v9, %v347_v62  ;;  %v332_v12 = vmul.f32 %v671_v63, %v828_v0  ;;  %v348_v13 = vmul.f32 %v703_v1, %v828_v0 }
  0x2f   : > { %v754_v14 = vpack.i.bf16 %v417_v5, %v401_v4  ;;  %v402_v15 = vmax.f32 %v370_v6, 0.0  ;;  %v333_v16 = vmul.f32 %v674_v7, %v828_v0  ;;  %v349_v17 = vmul.f32 %v706_v8, %v828_v0 }
  0x30   : > { %743 = vxpose.xlu0.b32.cont [6/16] (narrow) %v742_v20, 8  ;;  %v675_v18 = vunpack.c.h.bf16 %v714_v2  ;;  %v418_v19 = vmax.f32 %v386_v11, 0.0  ;;  %v371_v20 = vadd.f32 %v837_v9, %v332_v12  ;;  %v387_v21 = vadd.f32 %v837_v9, %v348_v13 }
  0x31   : > { %v707_v22 = vunpack.c.h.bf16 %v722_v3  ;;  %v372_v23 = vadd.f32 %v837_v9, %v333_v16  ;;  %v388_v24 = vadd.f32 %v837_v9, %v349_v17 }
  0x32   : > { %v334_v25 = vmul.f32 %v675_v18, %v828_v0  ;;  %v756_v26 = vpack.i.bf16 %v418_v19, %v402_v15  ;;  %v403_v27 = vmax.f32 %v371_v20, 0.0  ;;  %v419_v28 = vmax.f32 %v387_v21, 0.0 }
  0x33   : > { %v350_v29 = vmul.f32 %v707_v22, %v828_v0  ;;  %v404_v32 = vmax.f32 %v372_v23, 0.0  ;;  %v420_v33 = vmax.f32 %v388_v24, 0.0 }
  0x34   : > { %745 = vxpose.xlu0.b32.cont [7/16] (narrow) %v744_v31, 8  ;;  %v373_v30 = vadd.f32 %v837_v9, %v334_v25  ;;  %v758_v31 = vpack.i.bf16 %v419_v28, %v403_v27 }
  0x35   : > { %v389_v34 = vadd.f32 %v837_v9, %v350_v29  ;;  %v760_v35 = vpack.i.bf16 %v420_v33, %v404_v32  ;;  %v769_v9 = vld [vmem:[%s932_s3] sm:$0xff]  }
  0x36   : > { %v405_v36 = vmax.f32 %v373_v30, 0.0 }
  0x38   : > { %747 = vxpose.xlu0.b32.cont [8/16] (narrow) %v746_v37, 8  ;;  %v421_v37 = vmax.f32 %v389_v34, 0.0 }
  0x3a   : > { %v762_v38 = vpack.i.bf16 %v421_v37, %v405_v36 }
  0x3c   : > { %749 = vxpose.xlu0.b32.cont [9/16] (narrow) %v748_v52, 8 }
  0x40   : > { %751 = vxpose.xlu0.b32.cont [10/16] (narrow) %v750_v61, 8 }
  0x44   : > { %753 = vxpose.xlu0.b32.cont [11/16] (narrow) %v752_v10, 8 }
  0x48   : > { %755 = vxpose.xlu0.b32.cont [12/16] (narrow) %v754_v14, 8 }
  0x4c   : > { %757 = vxpose.xlu0.b32.cont [13/16] (narrow) %v756_v26, 8 }
  0x50   : > { %759 = vxpose.xlu0.b32.cont [14/16] (narrow) %v758_v31, 8 }
  0x54   : > { %761 = vxpose.xlu0.b32.cont [15/16] (narrow) %v760_v35, 8 }
  0x58   : > { %763 = vxpose.xlu0.b32.end [16/16] (narrow) %v762_v38, 8 }
  0x9c   : > { %v764_v39 = vpop.trf.xlu0 }
  0x9d   : > { %v768_v40 = vunpack.i.h.bf16 %v764_v39  ;;  %v765_v0 = vunpack.i.l.bf16 %v764_v39 }
  0x9f   : > { %v487_v41 = vpack.c.bf16 %v768_v40, %v768_v40  ;;  %v486_v42 = vpack.c.bf16 %v765_v0, %v765_v0 }
  0xa1   : > { %638 = vmatprep.subr.msk.bf16.mxu0 %vm503_vm0, %v487_v41  ;;  %v505_v43 = vsel %vm503_vm0, %v486_v42, 0 }
  0xa2   : > { %511 = vmatpush1.bf16.msra.mxu0 %v505_v43 }
  0xa5   : > { %639 = vmatmul.mubr.msk.bf16.vlgmr.msra.gmra.mrb[0].mxu0 %vm499_vm1, %v769_v9 }
 0x178   : > { %v544_v46 = vpop.f32.mrb[0].mxu0 }
 0x179   : > { %v545_v48 = vadd.f32 %v544_v46, %v490_v44  ;;  %v546_v49 = vpop.f32.mrb[1].mxu0 }
 0x17a   : > { %v547_v51 = vadd.f32 %v546_v49, %v491_v45  ;;  %v548_v52 = vpop.f32.mrb[2].mxu0 }
 0x17b   : > { %553 = vst [vmem:[%s246_s12] sm:$0xff] %v545_v48  ;;  %v549_v53 = vadd.f32 %v548_v52, %v492_v47  ;;  %v550_v54 = vpop.f32.mrb[3].mxu0 }
 0x17c   : > { %554 = vst [vmem:[%s246_s12 + $0x8] sm:$0xff] %v547_v51  ;;  %v551_v55 = vadd.f32 %v550_v54, %v493_v50 }
 0x17d   : > { %555 = vst [vmem:[%s246_s12 + $0x10] sm:$0xff] %v549_v53 }
 0x17e   : > { %556 = vst [vmem:[%s246_s12 + $0x18] sm:$0xff] %v551_v55 }
 0x17f PF: > { %s15_s18 = sadd.s32 1, %s776_s18  }
 0x180   : > { %p12_p5 = scmp.ge.s32.totalorder %s15_s18, 4  }
 0x182   :  { %14 = sbr.rel (!%p12_p5) target bundleno = 1 (0x1), region = 73 }

// kernel: bottleneck_forward.6
= control target key start
LH: loop header
LB: loop body
LE: loop exit
PB: predicated region body
PF: predicated region fallthrough
CT: control target
= control target key end

     0   :  { %s5398_s21 = smov 0   ;;  %s6661_s0 = inlined_call_operand.vmem [shape: bf16[512,4], index: 0, kind: input, shape index: {}]   ;;  %s6662_s1 = inlined_call_operand.vmem [shape: f32[1,4], index: 1, kind: input, shape index: {}]   ;;  %s6663_s2 = inlined_call_operand.vmem [shape: f32[1,4], index: 2, kind: input, shape index: {}]   ;;  %s6664_s3 = inlined_call_operand.vmem [shape: bf16[9,4,4], index: 3, kind: input, shape index: {}]   ;;  %s6665_s4 = inlined_call_operand.vmem [shape: bf16[512,4], index: 4, kind: output, shape index: {0}]   ;;  %s6666_s5 = inlined_call_operand.vmem [shape: f32[2,1,4], index: 5, kind: output, shape index: {1}]   ;;  %s6667_s6 = inlined_call_operand.vmem [shape: f32[2,1,4], index: 6, kind: output, shape index: {2}]  }
   0x1 LB: > { %s5404_s22 = sadd.s32 4294967295, %s5360_s21   ;;  %p4313_p0 = scmp.ge.s32.totalorder %s5360_s21, 1  ;;  %s5360_s21 = sphi %s5398_s21, %s17_s21  }
   0x2   : > { %p218_p1 = scmp.lt.s32.totalorder %s5360_s21, 3 }
   0x4   : > { %p219_p2 = pnand %p4313_p0, %p218_p1 }
   0x6   : > { %222 = sbr.rel (%p219_p2) target bundleno = 559 (0x22f), region = 36 }
   0xd   : > { %v4320_v0 = vld [vmem:[%s6664_s3 + $0x2] sm:$0x3]  ;;  %vm6668_vm0 = vcmask 1041408   ;;  %v4387_v1 = vld [vmem:[%s6664_s3 + $0x8] sm:$0x3]  ;;  %vm6673_vm1 = vcmask 31744  }
   0xe   : > { %5334 = vmatprep.subr.msk.bf16.mxu1 %vm6668_vm0, %v4320_v0  ;;  %5338 = vmatprep.subr.msk.bf16.mxu0 %vm6668_vm0, %v4387_v1  ;;  %v1212_v2 = vsel %vm6668_vm0, %v4320_v0, 0  ;;  %v5418_v3 = vsel %vm6668_vm0, %v4387_v1, 0  ;;  %s4314_s27 = sshll.u32 %s5404_s22, 5  ;;  %v5362_v4 = vmov 0.0   ;;  %v1111_v5 = vld [vmem:[%s6664_s3] sm:$0x3] }
   0xf   : > { %6704 = vst [vmem:[#allocation3_spill] sm:$0xff] %v5418_v3  ;;  %4771 = vmatpush3.bf16.msra.mxu1 %v1212_v2  ;;  %4907 = vmatpush3.bf16.msra.mxu0 %v5418_v3  ;;  %449 = vst.msk [vmem:[#allocation2 + $0x8] sm:$0xff] %vm6673_vm1, %v5362_v4  ;;  %p255_p3 = scmp.lt.s32.totalorder %s4314_s27, 63  ;;  %v4404_v6 = vld [vmem:[%s6664_s3 + $0xa] sm:$0x3]  ;;  %v5453_v9 = vsel %vm6668_vm0, %v1111_v5, 0 }
  0x10   : > { %450 = vst.msk [vmem:[#allocation2 + $0x10] sm:$0xff] %vm6673_vm1, %v5362_v4  ;;  %448 = vst.msk [vmem:[#allocation2] sm:$0xff] %vm6673_vm1, %v5362_v4  ;;  %5335 = vmatprep.subr.msk.bf16.mxu1 %vm6668_vm0, %v1111_v5  ;;  %5340 = vmatprep.subr.msk.bf16.mxu0 %vm6668_vm0, %v4404_v6  ;;  %v5449_v7 = vld [vmem:[%s6662_s1] ss:$0 sm:$0xff]  ;;  %v5457_v11 = vsel %vm6668_vm0, %v4404_v6, 0  ;;  %p266_p4 = scmp.lt.s32.totalorder %s5404_s22, 1 }
  0x11   : > { %451 = vst.msk [vmem:[#allocation2 + $0x118] sm:$0xff] %vm6673_vm1, %v5362_v4  ;;  %452 = vst.msk [vmem:[#allocation2 + $0x120] sm:$0xff] %vm6673_vm1, %v5362_v4  ;;  %s7008_s27 = smov (!%p255_p3, %s4314_s27), 63  ;;  %v5464_v21 = vld [vmem:[%s6663_s2] ss:$0 sm:$0xff] }
  0x12   : > { %453 = vst.msk [vmem:[#allocation2 + $0x128] sm:$0xff] %vm6673_vm1, %v5362_v4  ;;  %s4315_s8 = sshll.u32 %s7008_s27, 2  ;;  %s7010_s22 = smov (!%p266_p4, %s5404_s22), 1 }
  0x13   : > { %s5444_s11 = scalar_lea.vmem %s6661_s0, %s4315_s8  ;;  %s6512_s10 = scalar_lea.vmem %s6665_s4, %s4315_s8 }
  0x14   : > { %v4539_v8 = vld [vmem:[%s5444_s11] sm:$0xff]   ;;  %v4602_v10 = vld [vmem:[%s5444_s11 + $0x8] sm:$0xff]   ;;  %v4603_v12 = vld [vmem:[%s5444_s11 + $0x10] sm:$0xff]   ;;  %s271_s14 = scalar_lea.vmem %s6667_s6, %s7010_s22 }
  0x15   : > { %v4540_v15 = vunpack.c.l.bf16 %v4539_v8  ;;  %v4541_v16 = vunpack.c.h.bf16 %v4539_v8  ;;  %v4544_v17 = vunpack.c.l.bf16 %v4602_v10  ;;  %v4545_v18 = vunpack.c.h.bf16 %v4602_v10  ;;  %v4604_v19 = vld [vmem:[%s5444_s11 + $0x18] sm:$0xff]   ;;  %v4605_v41 = vld [vmem:[%s5444_s11 + $0x20] sm:$0xff]   ;;  %v4606_v42 = vld [vmem:[%s5444_s11 + $0x28] sm:$0xff]  }
  0x16   : > { %v1112_v13 = vld [vmem:[#allocation2 + $0x8] sm:$0xff]  ;;  %v4548_v22 = vunpack.c.l.bf16 %v4603_v12  ;;  %v4549_v23 = vunpack.c.h.bf16 %v4603_v12  ;;  %v4552_v24 = vunpack.c.l.bf16 %v4604_v19  ;;  %v4553_v31 = vunpack.c.h.bf16 %v4604_v19  ;;  %v4607_v47 = vld [vmem:[%s5444_s11 + $0x30] sm:$0xff]   ;;  %v4608_v48 = vld [vmem:[%s5444_s11 + $0x38] sm:$0xff]  }
  0x17   : > { %v1113_v14 = vld [vmem:[#allocation2 + $0x10] sm:$0xff]  ;;  %v344_v25 = vmul.f32 %v4540_v15, %v5449_v7  ;;  %v345_v26 = vmul.f32 %v4541_v16, %v5449_v7  ;;  %v346_v27 = vmul.f32 %v4544_v17, %v5449_v7  ;;  %v347_v28 = vmul.f32 %v4545_v18, %v5449_v7  ;;  %v4609_v17 = vld [vmem:[%s5444_s11 + $0x40] sm:$0xff]   ;;  %v4610_v18 = vld [vmem:[%s5444_s11 + $0x48] sm:$0xff]  }
  0x18   : > { %v1144_v20 = vpack.c.bf16 %v1113_v14, %v1112_v13  ;;  %v348_v29 = vmul.f32 %v4548_v22, %v5449_v7  ;;  %v349_v30 = vmul.f32 %v4549_v23, %v5449_v7  ;;  %v350_v32 = vmul.f32 %v4552_v24, %v5449_v7 }
  0x19   : > { %v383_v33 = vadd.f32 %v5464_v21, %v344_v25  ;;  %v384_v34 = vadd.f32 %v5464_v21, %v345_v26  ;;  %v385_v35 = vadd.f32 %v5464_v21, %v346_v27  ;;  %v386_v36 = vadd.f32 %v5464_v21, %v347_v28 }
  0x1a   : > { %4772 = vmatprep.mubr.msk.bf16.mxu1 %vm6673_vm1, %v1144_v20  ;;  %v387_v37 = vadd.f32 %v5464_v21, %v348_v29  ;;  %v388_v38 = vadd.f32 %v5464_v21, %v349_v30  ;;  %v351_v39 = vmul.f32 %v4553_v31, %v5449_v7  ;;  %v389_v40 = vadd.f32 %v5464_v21, %v350_v32 }
  0x1b   : > { %v415_v43 = vmax.f32 %v383_v33, 0.0  ;;  %v416_v44 = vmax.f32 %v384_v34, 0.0  ;;  %v417_v45 = vmax.f32 %v385_v35, 0.0  ;;  %v418_v46 = vmax.f32 %v386_v36, 0.0 }
  0x1c   : > { %v419_v49 = vmax.f32 %v387_v37, 0.0  ;;  %v420_v50 = vmax.f32 %v388_v38, 0.0  ;;  %v390_v51 = vadd.f32 %v5464_v21, %v351_v39  ;;  %v421_v52 = vmax.f32 %v389_v40, 0.0 }
  0x1d   : > { %454 = vst.msk [vmem:[#allocation2 + $0x18] sm:$0xff] %vm6673_vm1, %v415_v43  ;;  %455 = vst.msk [vmem:[#allocation2 + $0x20] sm:$0xff] %vm6673_vm1, %v416_v44  ;;  %v4556_v53 = vunpack.c.l.bf16 %v4605_v41  ;;  %v4557_v54 = vunpack.c.h.bf16 %v4605_v41  ;;  %v4560_v55 = vunpack.c.l.bf16 %v4606_v42  ;;  %v4561_v56 = vunpack.c.h.bf16 %v4606_v42  ;;  %v4611_v42 = vld [vmem:[%s5444_s11 + $0x50] sm:$0xff]  }
  0x1e   : > { %456 = vst.msk [vmem:[#allocation2 + $0x28] sm:$0xff] %vm6673_vm1, %v417_v45  ;;  %457 = vst.msk [vmem:[#allocation2 + $0x30] sm:$0xff] %vm6673_vm1, %v418_v46  ;;  %v422_v57 = vmax.f32 %v390_v51, 0.0  ;;  %v4564_v58 = vunpack.c.l.bf16 %v4607_v47  ;;  %v4565_v59 = vunpack.c.h.bf16 %v4607_v47  ;;  %v4568_v60 = vunpack.c.l.bf16 %v4608_v48  ;;  %v5528_v46 = vld [vmem:[%s6664_s3 + $0xc] sm:$0x3] }
  0x1f   : > { %458 = vst.msk [vmem:[#allocation2 + $0x38] sm:$0xff] %vm6673_vm1, %v419_v49  ;;  %459 = vst.msk [vmem:[#allocation2 + $0x40] sm:$0xff] %vm6673_vm1, %v420_v50  ;;  %v352_v61 = vmul.f32 %v4556_v53, %v5449_v7  ;;  %v353_v62 = vmul.f32 %v4557_v54, %v5449_v7  ;;  %v354_v63 = vmul.f32 %v4560_v55, %v5449_v7  ;;  %v4569_v4 = vunpack.c.h.bf16 %v4608_v48  ;;  %v5538_v49 = vld [vmem:[%s6664_s3 + $0x4] sm:$0x3] }
  0x20   : > { %460 = vst.msk [vmem:[#allocation2 + $0x48] sm:$0xff] %vm6673_vm1, %v421_v52  ;;  %v355_v0 = vmul.f32 %v4561_v56, %v5449_v7  ;;  %461 = vst.msk [vmem:[#allocation2 + $0x50] sm:$0xff] %vm6673_vm1, %v422_v57  ;;  %v356_v1 = vmul.f32 %v4564_v58, %v5449_v7  ;;  %v357_v2 = vmul.f32 %v4565_v59, %v5449_v7  ;;  %v4572_v35 = vunpack.c.l.bf16 %v4609_v17  ;;  %v4612_v56 = vld [vmem:[%s5444_s11 + $0x58] sm:$0xff]  }
  0x21   : > { %v358_v5 = vmul.f32 %v4568_v60, %v5449_v7  ;;  %v391_v6 = vadd.f32 %v5464_v21, %v352_v61  ;;  %v392_v8 = vadd.f32 %v5464_v21, %v353_v62  ;;  %v393_v10 = vadd.f32 %v5464_v21, %v354_v63 }
  0x22   : > { %v394_v12 = vadd.f32 %v5464_v21, %v355_v0  ;;  %v395_v13 = vadd.f32 %v5464_v21, %v356_v1  ;;  %v396_v14 = vadd.f32 %v5464_v21, %v357_v2  ;;  %v359_v15 = vmul.f32 %v4569_v4, %v5449_v7  ;;  %v4613_v4 = vld [vmem:[%s5444_s11 + $0x60] sm:$0xff]  }
  0x23   : > { %v397_v16 = vadd.f32 %v5464_v21, %v358_v5  ;;  %v423_v19 = vmax.f32 %v391_v6, 0.0  ;;  %v424_v20 = vmax.f32 %v392_v8, 0.0  ;;  %v425_v22 = vmax.f32 %v393_v10, 0.0 }
  0x24   : > { %v426_v23 = vmax.f32 %v394_v12, 0.0  ;;  %v1114_v24 = vld [vmem:[#allocation2 + $0x18] sm:$0xff]  ;;  %v1115_v25 = vld [vmem:[#allocation2 + $0x20] sm:$0xff]  ;;  %v427_v27 = vmax.f32 %v395_v13, 0.0  ;;  %v428_v28 = vmax.f32 %v396_v14, 0.0  ;;  %v398_v29 = vadd.f32 %v5464_v21, %v359_v15 }
  0x25   : > { %v2305_v26 = vld [vmem:[#allocation2 + $0x28] sm:$0xff]  ;;  %v429_v30 = vmax.f32 %v397_v16, 0.0  ;;  %v1145_v31 = vpack.c.bf16 %v1115_v25, %v1114_v24  ;;  %v2306_v32 = vld [vmem:[#allocation2 + $0x30] sm:$0xff]  ;;  %462 = vst.msk [vmem:[#allocation2 + $0x58] sm:$0xff] %vm6673_vm1, %v423_v19  ;;  %463 = vst.msk [vmem:[#allocation2 + $0x60] sm:$0xff] %vm6673_vm1, %v424_v20  ;;  %v4573_v36 = vunpack.c.h.bf16 %v4609_v17  ;;  %v4576_v37 = vunpack.c.l.bf16 %v4610_v18 }
  0x26   : > { %v1118_v33 = vld [vmem:[#allocation2 + $0x38] sm:$0xff]  ;;  %v1119_v34 = vld [vmem:[#allocation2 + $0x40] sm:$0xff]  ;;  %464 = vst.msk [vmem:[#allocation2 + $0x68] sm:$0xff] %vm6673_vm1, %v425_v22  ;;  %465 = vst.msk [vmem:[#allocation2 + $0x70] sm:$0xff] %vm6673_vm1, %v426_v23  ;;  %v2336_v38 = vpack.c.bf16 %v2306_v32, %v2305_v26  ;;  %v430_v40 = vmax.f32 %v398_v29, 0.0  ;;  %v4577_v41 = vunpack.c.h.bf16 %v4610_v18  ;;  %v360_v43 = vmul.f32 %v4572_v35, %v5449_v7 }
  0x27   : > { %v1147_v39 = vpack.c.bf16 %v1119_v34, %v1118_v33  ;;  %466 = vst.msk [vmem:[#allocation2 + $0x78] sm:$0xff] %vm6673_vm1, %v427_v27  ;;  %467 = vst.msk [vmem:[#allocation2 + $0x80] sm:$0xff] %vm6673_vm1, %v428_v28  ;;  %4773 = vmatmul.mubr.msk.bf16.vlgmr.msra.gmra.mrb[0].mxu1 %vm6673_vm1, %v1145_v31  ;;  %4908 = vmatprep.mubr.msk.bf16.mxu0 %vm6673_vm1, %v1145_v31  ;;  %v361_v44 = vmul.f32 %v4573_v36, %v5449_v7  ;;  %v486_v45 = vlaneseq  ;;  %v2309_v50 = vld [vmem:[#allocation2 + $0x48] sm:$0xff]  ;;  %v2310_v51 = vld [vmem:[#allocation2 + $0x50] sm:$0xff]  ;;  %v4580_v53 = vunpack.c.l.bf16 %v4611_v42 }
  0x28   : > { %468 = vst.msk [vmem:[#allocation2 + $0x88] sm:$0xff] %vm6673_vm1, %v429_v30  ;;  %v362_v47 = vmul.f32 %v4576_v37, %v5449_v7  ;;  %4805 = vmatpush3.bf16.msra.mxu1 %v5453_v9  ;;  %4909 = vmatmul.mubr.msk.bf16.vlgmr.msra.gmra.mrb[0].mxu0 %vm6673_vm1, %v2336_v38  ;;  %469 = vst.msk [vmem:[#allocation2 + $0x90] sm:$0xff] %vm6673_vm1, %v430_v40  ;;  %v363_v48 = vmul.f32 %v4577_v41, %v5449_v7  ;;  %v4584_v8 = vunpack.c.l.bf16 %v4612_v56  ;;  %v4614_v17 = vld [vmem:[%s5444_s11 + $0x68] sm:$0xff]   ;;  %v4615_v34 = vld [vmem:[%s5444_s11 + $0x70] sm:$0xff]  }
  0x29   : > { %4941 = vmatpush3.bf16.msra.mxu0 %v5457_v11  ;;  %4776 = vmatprep.mubr.msk.bf16.mxu1 %vm6673_vm1, %v2336_v38  ;;  %v399_v9 = vadd.f32 %v5464_v21, %v360_v43  ;;  %v400_v52 = vadd.f32 %v5464_v21, %v361_v44  ;;  %v4581_v11 = vunpack.c.h.bf16 %v4611_v42  ;;  %v5550_v59 = vshrl.u32 %v486_v45, 7 }
  0x2a   : > { %4912 = vmatprep.mubr.msk.bf16.mxu0 %vm6673_vm1, %v1147_v39  ;;  %5341 = vmatprep.subr.msk.bf16.mxu0 %vm6668_vm0, %v5528_v46  ;;  %v401_v54 = vadd.f32 %v5464_v21, %v362_v47  ;;  %v402_v55 = vadd.f32 %v5464_v21, %v363_v48  ;;  %v364_v60 = vmul.f32 %v4580_v53, %v5449_v7  ;;  %v4585_v12 = vunpack.c.h.bf16 %v4612_v56  ;;  %v5591_v48 = vld [vmem:[#allocation2 + $0x21] sm:$0xff] }
  0x2b   : > { %v431_v57 = vmax.f32 %v399_v9, 0.0  ;;  %v432_v58 = vmax.f32 %v400_v52, 0.0  ;;  %5336 = vmatprep.subr.msk.bf16.mxu1 %vm6668_vm0, %v5538_v49  ;;  %v2338_v61 = vpack.c.bf16 %v2310_v51, %v2309_v50  ;;  %v365_v2 = vmul.f32 %v4581_v11, %v5449_v7 }
  0x2c   : > { %v1122_v62 = vld [vmem:[#allocation2 + $0x58] sm:$0xff]  ;;  %v1123_v63 = vld [vmem:[#allocation2 + $0x60] sm:$0xff]  ;;  %v433_v0 = vmax.f32 %v401_v54, 0.0  ;;  %v434_v1 = vmax.f32 %v402_v55, 0.0  ;;  %v403_v6 = vadd.f32 %v5464_v21, %v364_v60  ;;  %v488_v13 = vadd.s32 8, %v5550_v59 }
  0x2d   : > { %v1149_v5 = vpack.c.bf16 %v1123_v63, %v1122_v62  ;;  %470 = vst.msk [vmem:[#allocation2 + $0x98] sm:$0xff] %vm6673_vm1, %v431_v57  ;;  %471 = vst.msk [vmem:[#allocation2 + $0xa0] sm:$0xff] %vm6673_vm1, %v432_v58  ;;  %v404_v10 = vadd.f32 %v5464_v21, %v365_v2  ;;  %v366_v15 = vmul.f32 %v4584_v8, %v5449_v7  ;;  %v4588_v16 = vunpack.c.l.bf16 %v4613_v4  ;;  %v2313_v20 = vld [vmem:[#allocation2 + $0x68] sm:$0xff]  ;;  %v2314_v22 = vld [vmem:[#allocation2 + $0x70] sm:$0xff] }
  0x2e   : > { %472 = vst.msk [vmem:[#allocation2 + $0xa8] sm:$0xff] %vm6673_vm1, %v433_v0  ;;  %473 = vst.msk [vmem:[#allocation2 + $0xb0] sm:$0xff] %vm6673_vm1, %v434_v1  ;;  %v435_v14 = vmax.f32 %v403_v6, 0.0  ;;  %v367_v19 = vmul.f32 %v4585_v12, %v5449_v7  ;;  %v4589_v24 = vunpack.c.h.bf16 %v4613_v4  ;;  %v1126_v26 = vld [vmem:[#allocation2 + $0x78] sm:$0xff]  ;;  %v1127_v27 = vld [vmem:[#allocation2 + $0x80] sm:$0xff]  ;;  %v4592_v29 = vunpack.c.l.bf16 %v4614_v17 }
  0x2f   : > { %4777 = vmatmul.mubr.msk.bf16.gmra.mrb[4].mxu1 %vm6673_vm1, %v1147_v39  ;;  %v436_v18 = vmax.f32 %v404_v10, 0.0  ;;  %v405_v23 = vadd.f32 %v5464_v21, %v366_v15  ;;  %v368_v25 = vmul.f32 %v4588_v16, %v5449_v7  ;;  %v530_v30 = vand.u32 15, %v488_v13  ;;  %v2317_v55 = vld [vmem:[#allocation2 + $0x88] sm:$0xff]  ;;  %v2318_v11 = vld [vmem:[#allocation2 + $0x90] sm:$0xff]  ;;  %v5602_v57 = vld [vmem:[#allocation2 + $0x19] sm:$0xff] }
  0x30   : > { %4913 = vmatmul.mubr.msk.bf16.gmra.mrb[4].mxu0 %vm6673_vm1, %v2338_v61  ;;  %4780 = vmatprep.mubr.msk.bf16.mxu1 %vm6673_vm1, %v2338_v61  ;;  %474 = vst.msk [vmem:[#allocation2 + $0xb8] sm:$0xff] %vm6673_vm1, %v435_v14  ;;  %v406_v28 = vadd.f32 %v5464_v21, %v367_v19  ;;  %v369_v32 = vmul.f32 %v4589_v24, %v5449_v7  ;;  %v4593_v37 = vunpack.c.h.bf16 %v4614_v17  ;;  %v490_v42 = vadd.s32 24, %v5550_v59  ;;  %v5616_v8 = vld [vmem:[#allocation2 + $0x31] sm:$0xff]  ;;  %v5625_v13 = vld [vmem:[#allocation2 + $0x41] sm:$0xff]  ;;  %v5632_v17 = vld [vmem:[#allocation2 + $0x29] sm:$0xff] }
  0x31   : > { %4916 = vmatprep.mubr.msk.bf16.mxu0 %vm6673_vm1, %v1149_v5  ;;  %475 = vst.msk [vmem:[#allocation2 + $0xc0] sm:$0xff] %vm6673_vm1, %v436_v18  ;;  %v437_v31 = vmax.f32 %v405_v23, 0.0  ;;  %v407_v33 = vadd.f32 %v5464_v21, %v368_v25  ;;  %v2340_v35 = vpack.c.bf16 %v2314_v22, %v2313_v20  ;;  %v370_v38 = vmul.f32 %v4592_v29, %v5449_v7  ;;  %v5637_v22 = vld [vmem:[#allocation2 + $0x39] sm:$0xff] }
  0x32   : > { %v438_v36 = vmax.f32 %v406_v28, 0.0  ;;  %v1151_v39 = vpack.c.bf16 %v1127_v27, %v1126_v26  ;;  %v408_v40 = vadd.f32 %v5464_v21, %v369_v32  ;;  %v371_v43 = vmul.f32 %v4593_v37, %v5449_v7  ;;  %v5650_v32 = vld [vmem:[#allocation2 + $0x51] sm:$0xff] }
  0x33   : > { %476 = vst.msk [vmem:[#allocation2 + $0xc8] sm:$0xff] %vm6673_vm1, %v437_v31  ;;  %v439_v41 = vmax.f32 %v407_v33, 0.0  ;;  %v409_v44 = vadd.f32 %v5464_v21, %v370_v38  ;;  %v4596_v45 = vunpack.c.l.bf16 %v4615_v34  ;;  %vm5587_vm2 = vcmp.lt.s32.totalorder %v530_v30, 15 }
  0x34   : > { %477 = vst.msk [vmem:[#allocation2 + $0xd0] sm:$0xff] %vm6673_vm1, %v438_v36  ;;  %v6705_v47 = vmov 0  ;;  %v492_v50 = vadd.s32 40, %v5550_v59  ;;  %v440_v51 = vmax.f32 %v408_v40, 0.0  ;;  %v4597_v9 = vunpack.c.h.bf16 %v4615_v34  ;;  %v1130_v15 = vld [vmem:[#allocation2 + $0x98] sm:$0xff]  ;;  %v1131_v16 = vld [vmem:[#allocation2 + $0xa0] sm:$0xff] }
  0x35   : > { %v6706_v47 = vsel %vm5587_vm2, 4294967295, %v6705_v47  ;;  %478 = vst.msk [vmem:[#allocation2 + $0xd8] sm:$0xff] %vm6673_vm1, %v439_v41  ;;  %v410_v52 = vadd.f32 %v5464_v21, %v371_v43  ;;  %v441_v53 = vmax.f32 %v409_v44, 0.0  ;;  %v372_v54 = vmul.f32 %v4596_v45, %v5449_v7  ;;  %v1132_v19 = vld [vmem:[#allocation2 + $0xa8] sm:$0xff]  ;;  %v1133_v20 = vld [vmem:[#allocation2 + $0xb0] sm:$0xff]  ;;  %v4616_v34 = vld [vmem:[%s5444_s11 + $0x78] sm:$0xff]   ;;  %s268_s11 = scalar_lea.vmem %s6666_s5, %s7010_s22 }
  0x36   : > { %479 = vst.msk [vmem:[#allocation2 + $0xe0] sm:$0xff] %vm6673_vm1, %v440_v51  ;;  %v373_v56 = vmul.f32 %v4597_v9, %v5449_v7  ;;  %v2630_v58 = vsel %vm5587_vm2, %v5591_v48, 0.0  ;;  %v544_v60 = vand.u32 15, %v490_v42  ;;  %v558_v63 = vand.u32 15, %v492_v50  ;;  %v5659_v36 = vld [vmem:[#allocation2 + $0x61] sm:$0xff]  ;;  %v5670_v40 = vld [vmem:[#allocation2 + $0x49] sm:$0xff] }
  0x37   : > { %4781 = vmatmul.mubr.msk.bf16.gmra.mrb[8].mxu1 %vm6673_vm1, %v1149_v5  ;;  %v442_v61 = vmax.f32 %v410_v52, 0.0  ;;  %480 = vst.msk [vmem:[#allocation2 + $0xe8] sm:$0xff] %vm6673_vm1, %v441_v53  ;;  %v411_v62 = vadd.f32 %v5464_v21, %v372_v54  ;;  %v2342_v1 = vpack.c.bf16 %v2318_v11, %v2317_v55  ;;  %v2661_v4 = vpack.c.bf16 %v2630_v58, %v5602_v57  ;;  %v1134_v38 = vld [vmem:[#allocation2 + $0xb8] sm:$0xff] }
  0x38   : > { %4917 = vmatmul.mubr.msk.bf16.gmra.mrb[8].mxu0 %vm6673_vm1, %v2340_v35  ;;  %4784 = vmatprep.mubr.msk.bf16.mxu1 %vm6673_vm1, %v2340_v35  ;;  %v412_v0 = vadd.f32 %v5464_v21, %v373_v56  ;;  %vm5612_vm3 = vcmp.lt.s32.totalorder %v544_v60, 15  ;;  %v6707_v6 = vmov 0  ;;  %v494_v10 = vadd.s32 56, %v5550_v59  ;;  %v5675_v45 = vld [vmem:[#allocation2 + $0x59] sm:$0xff]  ;;  %v5690_v60 = vld [vmem:[#allocation2 + $0x71] sm:$0xff] }
  0x39   : > { %4920 = vmatprep.mubr.msk.bf16.mxu0 %vm6673_vm1, %v1151_v39  ;;  %481 = vst.msk [vmem:[#allocation2 + $0xf0] sm:$0xff] %vm6673_vm1, %v442_v61  ;;  %v443_v2 = vmax.f32 %v411_v62, 0.0  ;;  %v6708_v6 = vsel %vm5612_vm3, 4294967295, %v6707_v6  ;;  %vm5621_vm4 = vcmp.lt.s32.totalorder %v558_v63, 15  ;;  %v6710_v12 = vmov 0  ;;  %v5697_v63 = vld [vmem:[#allocation2 + $0x81] sm:$0xff] }
  0x3a   : > { %v444_v5 = vmax.f32 %v412_v0, 0.0  ;;  %6709 = vst [vmem:[#allocation4_spill] sm:$0xff] %v6708_v6  ;;  %v6711_v12 = vsel %vm5621_vm4, 4294967295, %v6710_v12  ;;  %v496_v14 = vadd.s32 72, %v5550_v59  ;;  %v2632_v18 = vsel %vm5612_vm3, %v5616_v8, 0.0  ;;  %v1136_v42 = vld [vmem:[#allocation2 + $0xc8] sm:$0xff] }
  0x3b   : > { %482 = vst.msk [vmem:[#allocation2 + $0xf8] sm:$0xff] %vm6673_vm1, %v443_v2  ;;  %6712 = vst [vmem:[#allocation5_spill] sm:$0xff] %v6711_v12  ;;  %v2634_v23 = vsel %vm5621_vm4, %v5625_v13, 0.0  ;;  %v572_v24 = vand.u32 15, %v494_v10  ;;  %v1153_v25 = vpack.c.bf16 %v1131_v16, %v1130_v15  ;;  %v2662_v27 = vpack.c.bf16 %v2632_v18, %v5632_v17  ;;  %v1137_v43 = vld [vmem:[#allocation2 + $0xd0] sm:$0xff] }
  0x3c   : > { %483 = vst.msk [vmem:[#allocation2 + $0x100] sm:$0xff] %vm6673_vm1, %v444_v5  ;;  %v586_v26 = vand.u32 15, %v496_v14  ;;  %v1154_v28 = vpack.c.bf16 %v1133_v20, %v1132_v19  ;;  %v2663_v29 = vpack.c.bf16 %v2634_v23, %v5637_v22  ;;  %v3054_v30 = vsel %vm6668_vm0, %v5528_v46, 0  ;;  %v5665_v46 = vld [vmem:[%s6664_s3 + $0xe] sm:$0x3]  ;;  %v1138_v2 = vld [vmem:[#allocation2 + $0xd8] sm:$0xff] }
  0x3d   : > { %vm5646_vm5 = vcmp.lt.s32.totalorder %v572_v24, 15  ;;  %v6713_v31 = vmov 0  ;;  %v498_v33 = vadd.s32 88, %v5550_v59  ;;  %v6716_v35 = vmov 0  ;;  %v5703_v5 = vld [vmem:[#allocation2 + $0x69] sm:$0xff]  ;;  %v5711_v23 = vld [vmem:[#allocation2 + $0x79] sm:$0xff] }
  0x3e   : > { %v6714_v31 = vsel %vm5646_vm5, 4294967295, %v6713_v31  ;;  %vm5655_vm6 = vcmp.lt.s32.totalorder %v586_v26, 15  ;;  %v500_v37 = vadd.s32 104, %v5550_v59  ;;  %v2636_v41 = vsel %vm5646_vm5, %v5650_v32, 0.0  ;;  %v1140_v15 = vld [vmem:[#allocation2 + $0xe8] sm:$0xff] }
  0x3f   : > { %4785 = vmatmul.mubr.msk.bf16.gmra.mrb[12].mxu1 %vm6673_vm1, %v1151_v39  ;;  %6715 = vst [vmem:[#allocation6_spill] sm:$0xff] %v6714_v31  ;;  %v6717_v35 = vsel %vm5655_vm6, 4294967295, %v6716_v35  ;;  %v1135_v39 = vld [vmem:[#allocation2 + $0xc0] sm:$0xff]  ;;  %v4600_v44 = vunpack.c.l.bf16 %v4616_v34  ;;  %v2638_v50 = vsel %vm5655_vm6, %v5659_v36, 0.0  ;;  %v600_v51 = vand.u32 15, %v498_v33 }
  0x40   : > { %4921 = vmatmul.mubr.msk.bf16.gmra.mrb[12].mxu0 %vm6673_vm1, %v2342_v1  ;;  %4788 = vmatprep.mubr.msk.bf16.mxu1 %vm6673_vm1, %v2342_v1  ;;  %6718 = vst [vmem:[#allocation7_spill] sm:$0xff] %v6717_v35  ;;  %v1155_v9 = vpack.c.bf16 %v1135_v39, %v1134_v38  ;;  %v614_v52 = vand.u32 15, %v500_v37  ;;  %v2664_v53 = vpack.c.bf16 %v2636_v41, %v5670_v40  ;;  %v502_v11 = vadd.s32 120, %v5550_v59  ;;  %v1141_v16 = vld [vmem:[#allocation2 + $0xf0] sm:$0xff] }
  0x41   : > { %4942 = vmatprep.mubr.msk.bf16.mxu0 %vm6673_vm1, %v2661_v4  ;;  %v1156_v54 = vpack.c.bf16 %v1137_v43, %v1136_v42  ;;  %v2665_v55 = vpack.c.bf16 %v2638_v50, %v5675_v45  ;;  %v374_v56 = vmul.f32 %v4600_v44, %v5449_v7  ;;  %vm5686_vm7 = vcmp.lt.s32.totalorder %v600_v51, 15  ;;  %v1139_v4 = vld [vmem:[#allocation2 + $0xe0] sm:$0xff] }
  0x42   : > { %v6719_v58 = vmov 0  ;;  %v4601_v61 = vunpack.c.h.bf16 %v4616_v34  ;;  %vm5693_vm8 = vcmp.lt.s32.totalorder %v614_v52, 15  ;;  %v6722_v62 = vmov 0  ;;  %v967_v43 = vld [vmem:[#allocation2 + $0x7] sm:$0xff]  ;;  %v1142_v52 = vld [vmem:[#allocation2 + $0xf8] sm:$0xff] }
  0x43   : > { %v6720_v58 = vsel %vm5686_vm7, 4294967295, %v6719_v58  ;;  %v6723_v62 = vsel %vm5693_vm8, 4294967295, %v6722_v62  ;;  %v504_v0 = vadd.s32 136, %v5550_v59  ;;  %v413_v1 = vadd.f32 %v5464_v21, %v374_v56  ;;  %v5746_v51 = vld [vmem:[#allocation2 + $0xa1] sm:$0xff]  ;;  %v968_v56 = vld [vmem:[#allocation2 + $0xf] sm:$0xff] }
  0x44   : > { %6721 = vst [vmem:[#allocation8_spill] sm:$0xff] %v6720_v58  ;;  %6724 = vst [vmem:[#allocation9_spill] sm:$0xff] %v6723_v62  ;;  %v375_v10 = vmul.f32 %v4601_v61, %v5449_v7  ;;  %v2640_v14 = vsel %vm5686_vm7, %v5690_v60, 0.0  ;;  %v628_v18 = vand.u32 15, %v502_v11  ;;  %v489_v19 = vadd.s32 16, %v5550_v59 }
  0x45   : > { %v445_v20 = vmax.f32 %v413_v1, 0.0  ;;  %v2642_v24 = vsel %vm5693_vm8, %v5697_v63, 0.0  ;;  %v523_v7 = vand.u32 15, %v5550_v59  ;;  %v5718_v26 = vpack.c.bf16 %v1139_v4, %v1138_v2  ;;  %v5763_v1 = vld [vmem:[#allocation2 + $0x17] sm:$0xff] }
  0x46   : > { %v491_v33 = vadd.s32 32, %v5550_v59  ;;  %v2667_v37 = vpack.c.bf16 %v2642_v24, %v5711_v23  ;;  %vm5727_vm9 = vcmp.lt.s32.totalorder %v628_v18, 15  ;;  %v6727_v38 = vmov 0 }
  0x47   : > { %4789 = vmatmul.mubr.msk.bf16.gmra.mrb[16].mxu1 %vm6673_vm1, %v1153_v25  ;;  %v414_v25 = vadd.f32 %v5464_v21, %v375_v10  ;;  %6725 = vst [vmem:[#allocation10_spill] sm:$0xff] %v5718_v26  ;;  %484 = vst.msk [vmem:[#allocation2 + $0x108] sm:$0xff] %vm6673_vm1, %v445_v20  ;;  %v6728_v38 = vsel %vm5727_vm9, 4294967295, %v6727_v38  ;;  %v5731_v21 = vld [vmem:[#allocation2 + $0x91] sm:$0xff]  ;;  %v537_v39 = vand.u32 15, %v489_v19  ;;  %v508_v41 = vadd.s32 168, %v5550_v59 }
  0x48   : > { %4943 = vmatmul.mubr.msk.bf16.vlgmr.msra.gmra.mrb[0].mxu0 %vm6673_vm1, %v2662_v27  ;;  %4792 = vmatprep.mubr.msk.bf16.mxu1 %vm6673_vm1, %v1154_v28  ;;  %v642_v27 = vand.u32 15, %v504_v0  ;;  %v506_v28 = vadd.s32 152, %v5550_v59  ;;  %6729 = vst [vmem:[#allocation12_spill] sm:$0xff] %v6728_v38  ;;  %vm5734_vm10 = vcmp.ge.s32.totalorder %v523_v7, 1  ;;  %v493_v44 = vadd.s32 48, %v5550_v59  ;;  %v5766_v10 = vld [vmem:[#allocation2 + $0x99] sm:$0xff] }
  0x49   : > { %4975 = vmatpush3.bf16.msra.mxu0 %v3054_v30  ;;  %4946 = vmatprep.mubr.msk.bf16.mxu0 %vm6673_vm1, %v2663_v29  ;;  %v2666_v29 = vpack.c.bf16 %v2640_v14, %v5703_v5  ;;  %v5723_v30 = vpack.c.bf16 %v1141_v16, %v1140_v15  ;;  %v446_v34 = vmax.f32 %v414_v25, 0.0  ;;  %v6732_v50 = vmov 0  ;;  %v5778_v20 = vld [vmem:[#allocation2 + $0xb1] sm:$0xff] }
  0x4a   : > { %5342 = vmatprep.subr.msk.bf16.mxu0 %vm6668_vm0, %v5665_v46  ;;  %vm5742_vm11 = vcmp.lt.s32.totalorder %v642_v27, 15  ;;  %v551_v11 = vand.u32 15, %v491_v33  ;;  %v1063_v61 = vsel %vm5734_vm10, %v967_v43, 0.0  ;;  %vm5759_vm12 = vcmp.ge.s32.totalorder %v537_v39, 1  ;;  %v5787_v27 = vld [vmem:[#allocation2 + $0x27] sm:$0xff]  ;;  %v6050_v38 = vld [vmem:[#allocation2 + $0x77] sm:$0xff] }
  0x4b   : > { %6726 = vst [vmem:[#allocation11_spill] sm:$0xff] %v5723_v30  ;;  %485 = vst.msk [vmem:[#allocation2 + $0x110] sm:$0xff] %vm6673_vm1, %v446_v34  ;;  %v6733_v50 = vsel %vm5742_vm11, 4294967295, %v6732_v50  ;;  %v670_v2 = vand.u32 15, %v508_v41  ;;  %v510_v4 = vadd.s32 184, %v5550_v59  ;;  %v2646_v14 = vsel %vm5742_vm11, %v5746_v51, 0.0 }
  0x4c   : > { %6734 = vst [vmem:[#allocation13_spill] sm:$0xff] %v6733_v50  ;;  %v565_v15 = vand.u32 15, %v493_v44  ;;  %v6738_v19 = vmov 0  ;;  %v1095_v24 = vpack.c.bf16 %v968_v56, %v1063_v61  ;;  %v1065_v7 = vsel %vm5759_vm12, %v5763_v1, 0.0  ;;  %v5800_v43 = vld [vmem:[#allocation2 + $0xa9] sm:$0xff] }
  0x4d   : > { %vm5783_vm14 = vcmp.ge.s32.totalorder %v551_v11, 1  ;;  %v2669_v33 = vpack.c.bf16 %v2646_v14, %v5766_v10  ;;  %vm5793_vm15 = vcmp.lt.s32.totalorder %v670_v2, 15  ;;  %v6743_v34 = vmov 0  ;;  %v5826_v2 = vld [vmem:[#allocation2 + $0xb9] sm:$0xff] }
  0x4e   : > { %v6744_v34 = vsel %vm5793_vm15, 4294967295, %v6743_v34  ;;  %v684_v39 = vand.u32 15, %v510_v4  ;;  %v512_v41 = vadd.s32 200, %v5550_v59  ;;  %vm5805_vm0 = vcmp.ge.s32.totalorder %v565_v15, 1 }
  0x4f   : > { %4793 = vmatmul.mubr.msk.bf16.gmra.mrb[20].mxu1 %vm6673_vm1, %v1155_v9  ;;  %v656_v9 = vand.u32 15, %v506_v28  ;;  %v495_v28 = vadd.s32 64, %v5550_v59  ;;  %6745 = vst [vmem:[#allocation16_spill] sm:$0xff] %v6744_v34  ;;  %vm6748_vm2 = vcmask 1041408   ;;  %v1067_v11 = vsel %vm5783_vm14, %v5787_v27, 0.0 }
  0x50   : > { %4947 = vmatmul.mubr.msk.bf16.gmra.mrb[4].mxu0 %vm6673_vm1, %v2664_v53  ;;  %4796 = vmatprep.mubr.msk.bf16.mxu1 %vm6673_vm1, %v1156_v54  ;;  %v1143_v53 = vld [vmem:[#allocation2 + $0x100] sm:$0xff]  ;;  %v5751_v54 = vld [vmem:[#allocation2 + $0x89] sm:$0xff]  ;;  %v1686_v56 = vsel %vm5612_vm3, %v5591_v48, 0.0  ;;  %v517_v12 = vadd.s32 240, %v5550_v59 }
  0x51   : > { %4950 = vmatprep.mubr.msk.bf16.mxu0 %vm6673_vm1, %v2665_v55  ;;  %v2644_v55 = vsel %vm5727_vm9, %v5731_v21, 0.0  ;;  %v5771_v16 = vpack.c.bf16 %v1143_v53, %v1142_v52  ;;  %vm5774_vm13 = vcmp.lt.s32.totalorder %v656_v9, 15  ;;  %v5809_v52 = vld [vmem:[#allocation2 + $0x37] sm:$0xff]  ;;  %v1782_v53 = vsel %vm6748_vm2, %v5538_v49, 0 }
  0x52   : > { %v2668_v18 = vpack.c.bf16 %v2644_v55, %v5751_v54  ;;  %v6739_v19 = vsel %vm5774_vm13, 4294967295, %v6738_v19  ;;  %v2648_v44 = vsel %vm5774_vm13, %v5778_v20, 0.0  ;;  %v5815_v55 = vld [vmem:[#allocation2 + $0x2f] sm:$0xff]  ;;  %v579_v4 = vand.u32 15, %v495_v28 }
  0x53   : > { %6737 = vst [vmem:[#allocation14_spill] sm:$0xff] %v5771_v16  ;;  %6740 = vst [vmem:[#allocation15_spill] sm:$0xff] %v6739_v19  ;;  %v5832_v14 = vpack.c.bf16 %v1686_v56, %v5602_v57  ;;  %v2670_v48 = vpack.c.bf16 %v2648_v44, %v5800_v43  ;;  %v1069_v15 = vsel %vm5805_vm0, %v5809_v52, 0.0  ;;  %vm5839_vm2 = vcmp.lt.s32.totalorder %v684_v39, 15 }
  0x54   : > { %v1097_v28 = vpack.c.bf16 %v5815_v55, %v1067_v11  ;;  %v497_v57 = vadd.s32 80, %v5550_v59  ;;  %v514_v56 = vadd.s32 216, %v5550_v59  ;;  %v499_v39 = vadd.s32 96, %v5550_v59  ;;  %v5859_v11 = vld [vmem:[#allocation2 + $0x3f] sm:$0xff] }
  0x55   : > { %v505_v19 = vadd.s32 144, %v5550_v59 }
  0x56   : > { %v593_v35 = vand.u32 15, %v497_v57 }
  0x57   : > { %4797 = vmatmul.mubr.msk.bf16.gmra.mrb[24].mxu1 %vm6673_vm1, %v5718_v26  ;;  %v1098_v26 = vpack.c.bf16 %v5859_v11, %v1069_v15  ;;  %v5914_v15 = vld [vmem:[#allocation2 + $0xd9] sm:$0xff] }
  0x58   : > { %4951 = vmatmul.mubr.msk.bf16.gmra.mrb[8].mxu0 %vm6673_vm1, %v2666_v29  ;;  %4800 = vmatprep.mubr.msk.bf16.mxu1 %vm6673_vm1, %v5723_v30  ;;  %v5790_v29 = vld [vmem:[#allocation2 + $0x1f] sm:$0xff] }
  0x59   : > { %4954 = vmatprep.mubr.msk.bf16.mxu0 %vm6673_vm1, %v2667_v37  ;;  %v5797_v37 = vld [vmem:[#allocation2 + $0xc1] sm:$0xff]  ;;  %v1096_v61 = vpack.c.bf16 %v5790_v29, %v1065_v7  ;;  %v698_v7 = vand.u32 15, %v512_v41  ;;  %v1690_v41 = vsel %vm5646_vm5, %v5625_v13, 0.0  ;;  %v6754_v13 = vmov 0 }
  0x5a   : > { %v2650_v49 = vsel %vm5793_vm15, %v5797_v37, 0.0 }
  0x5b   : > { %v2671_v44 = vpack.c.bf16 %v2650_v49, %v5826_v2  ;;  %v5874_v49 = vld [vmem:[#allocation2 + $0x47] sm:$0xff]  ;;  %vm5876_vm5 = vcmp.lt.s32.totalorder %v698_v7, 15  ;;  %v1696_v7 = vsel %vm5693_vm8, %v5690_v60, 0.0  ;;  %v5909_v60 = vld [vmem:[#allocation2 + $0x4f] sm:$0xff] }
  0x5c   : > { %v6755_v13 = vsel %vm5876_vm5, 4294967295, %v6754_v13 }
  0x5d   : > { %6756 = vst [vmem:[#allocation18_spill] sm:$0xff] %v6755_v13  ;;  %v6015_v13 = vld [vmem:[#allocation2 + $0x6f] sm:$0xff] }
  0x5f   : > { %4801 = vmatmul.mubr.msk.bf16.gmra.mrb[28].mxu1 %vm6673_vm1, %v5771_v16 }
  0x60   : > { %4955 = vmatmul.mubr.msk.bf16.gmra.mrb[12].mxu0 %vm6673_vm1, %v2668_v18  ;;  %4806 = vmatprep.mubr.msk.bf16.mxu1 %vm6673_vm1, %v1095_v24  ;;  %v6749_v18 = vmov 0  ;;  %v5843_v24 = vld [vmem:[#allocation2 + $0xd1] sm:$0xff] }
  0x61   : > { %4958 = vmatprep.mubr.msk.bf16.mxu0 %vm6673_vm1, %v2669_v33  ;;  %v6750_v18 = vsel %vm5839_vm2, 4294967295, %v6749_v18  ;;  %v1688_v33 = vsel %vm5621_vm4, %v5616_v8, 0.0  ;;  %v2652_v16 = vsel %vm5839_vm2, %v5843_v24, 0.0  ;;  %vm5864_vm1 = vcmp.ge.s32.totalorder %v579_v4, 1 }
  0x62   : > { %6751 = vst [vmem:[#allocation17_spill] sm:$0xff] %v6750_v18  ;;  %v5854_v6 = vpack.c.bf16 %v1688_v33, %v5632_v17  ;;  %v5869_v8 = vpack.c.bf16 %v1690_v41, %v5637_v22  ;;  %v1692_v17 = vsel %vm5655_vm6, %v5650_v32, 0.0  ;;  %v5880_v33 = vld [vmem:[#allocation2 + $0xe1] sm:$0xff]  ;;  %v516_v4 = vadd.s32 232, %v5550_v59  ;;  %v2619_v41 = vld [vmem:[#allocation2 + $0xc9] sm:$0xff] }
  0x63   : > { %v5884_v31 = vpack.c.bf16 %v1692_v17, %v5670_v40  ;;  %v1694_v22 = vsel %vm5686_vm7, %v5659_v36, 0.0  ;;  %v712_v32 = vand.u32 15, %v514_v56  ;;  %vm6757_vm6 = vcmask 31744   ;;  %v5900_v17 = vld [vmem:[%s6664_s3 + $0x6] sm:$0x3] }
  0x64   : > { %v5890_v30 = vpack.c.bf16 %v1694_v22, %v5675_v45  ;;  %v607_v40 = vand.u32 15, %v499_v39  ;;  %v5903_v36 = vpack.c.bf16 %v1696_v7, %v5703_v5  ;;  %v1698_v45 = vsel %vm5727_vm9, %v5697_v63, 0.0  ;;  %vm6758_vm7 = vmmov %vm6757_vm6  ;;  %v3573_v22 = vld [vmem:[#allocation2 + $0x119] sm:$0xff] }
  0x65   : > { %v2654_v5 = vsel %vm5876_vm5, %v5880_v33, 0.0  ;;  %v5920_v57 = vpack.c.bf16 %v1698_v45, %v5711_v23  ;;  %v1700_v63 = vsel %vm5742_vm11, %v5731_v21, 0.0  ;;  %v1702_v39 = vsel %vm5774_vm13, %v5746_v51, 0.0  ;;  %v2624_v51 = vld [vmem:[#allocation2 + $0xf1] sm:$0xff] }
  0x66   : > { %v5928_v56 = vpack.c.bf16 %v1700_v63, %v5751_v54  ;;  %vm5933_vm9 = vcmp.ge.s32.totalorder %v593_v35, 1  ;;  %vm5937_vm8 = vcmp.lt.s32.totalorder %v712_v32, 15  ;;  %v501_v21 = vadd.s32 112, %v5550_v59  ;;  %v998_v32 = vld [vmem:[#allocation2 + $0xff] sm:$0xff] }
  0x67   : > { %4807 = vmatmul.mubr.msk.bf16.vlgmr.msra.gmra.mrb[0].mxu1 %vm6757_vm6, %v1096_v61  ;;  %v1071_v61 = vsel %vm5864_vm1, %v5874_v49, 0.0  ;;  %v5945_v54 = vpack.c.bf16 %v1702_v39, %v5766_v10  ;;  %v2673_v35 = vpack.c.bf16 %v2654_v5, %v5914_v15  ;;  %v5961_v10 = vld [vmem:[#allocation2 + $0x67] sm:$0xff]  ;;  %v2656_v63 = vsel %vm5937_vm8, %v2624_v51, 0.0 }
  0x68   : > { %4839 = vmatpush3.bf16.msra.mxu1 %v1782_v53  ;;  %4959 = vmatmul.mubr.msk.bf16.gmra.mrb[16].mxu0 %vm6758_vm7, %v2670_v48  ;;  %vm6759_vm7 = vmmov %vm6757_vm6  ;;  %v2672_v53 = vpack.c.bf16 %v2652_v16, %v2619_v41  ;;  %v726_v48 = vand.u32 15, %v516_v4  ;;  %v1099_v16 = vpack.c.bf16 %v5909_v60, %v1071_v61  ;;  %v1706_v4 = vsel %vm5839_vm2, %v5797_v37, 0.0  ;;  %v5991_v39 = vld [vmem:[#allocation2 + $0x101] sm:$0xff] }
  0x69   : > { %4810 = vmatprep.mubr.msk.bf16.mxu1 %vm6757_vm6, %v1097_v28  ;;  %4962 = vmatprep.mubr.msk.bf16.mxu0 %vm6759_vm7, %v2671_v44  ;;  %vm6764_vm6 = vcmask 1041408   ;;  %v5948_v28 = vld [vmem:[#allocation2 + $0x57] sm:$0xff]  ;;  %v1704_v44 = vsel %vm5793_vm15, %v5778_v20, 0.0  ;;  %vm5957_vm7 = vcmp.ge.s32.totalorder %v607_v40, 1  ;;  %v5967_v45 = vpack.c.bf16 %v1706_v4, %v5826_v2  ;;  %v2623_v2 = vld [vmem:[#allocation2 + $0xe9] sm:$0xff] }
  0x6a   : > { %5337 = vmatprep.subr.msk.bf16.mxu1 %vm6764_vm6, %v5900_v17  ;;  %v5964_v7 = vpack.c.bf16 %v1704_v44, %v5800_v43  ;;  %v1708_v20 = vsel %vm5876_vm5, %v5843_v24, 0.0  ;;  %vm5972_vm6 = vcmp.lt.s32.totalorder %v726_v48, 15  ;;  %v6767_v61 = vmov 0 }
  0x6b   : > { %v6768_v61 = vsel %vm5972_vm6, 4294967295, %v6767_v61  ;;  %v518_v37 = vadd.s32 248, %v5550_v59  ;;  %v503_v40 = vadd.s32 128, %v5550_v59  ;;  %v5978_v5 = vpack.c.bf16 %v1708_v20, %v2619_v41 }
  0x6c   : > { %6769 = vst [vmem:[#allocation19_spill] sm:$0xff] %v6768_v61  ;;  %v1073_v43 = vsel %vm5933_vm9, %v5948_v28, 0.0  ;;  %v1712_v24 = vsel %vm5972_vm6, %v2624_v51, 0.0  ;;  %vm6770_vm5 = vcmask 31744   ;;  %v1075_v48 = vsel %vm5957_vm7, %v5961_v10, 0.0 }
  0x6d   : > { %v5993_v41 = vpack.c.bf16 %v1712_v24, %v2623_v2  ;;  %v2009_v44 = vsel %vm5734_vm10, %v5763_v1, 0.0  ;;  %v2011_v4 = vsel %vm5759_vm12, %v5787_v27, 0.0  ;;  %vm6771_vm2 = vmmov %vm6770_vm5  ;;  %v621_v51 = vand.u32 15, %v501_v21  ;;  %v6023_v21 = vld [vmem:[#allocation2 + $0xf9] sm:$0xff] }
  0x6e   : > { %vm6772_vm15 = vmmov %vm6771_vm2  ;;  %v6006_v20 = vpack.c.bf16 %v5790_v29, %v2009_v44  ;;  %v6009_v24 = vpack.c.bf16 %v5815_v55, %v2011_v4  ;;  %v2013_v1 = vsel %vm5783_vm14, %v5809_v52, 0.0  ;;  %v635_v18 = vand.u32 15, %v503_v40 }
  0x6f   : > { %4811 = vmatmul.mubr.msk.bf16.gmra.mrb[4].mxu1 %vm6770_vm5, %v1098_v26  ;;  %v6003_v26 = vld [vmem:[#allocation2 + $0x5f] sm:$0xff]  ;;  %vm6774_vm5 = vmmov %vm6771_vm2  ;;  %v2015_v29 = vsel %vm5805_vm0, %v5874_v49, 0.0  ;;  %v2658_v44 = vsel %vm5972_vm6, %v5991_v39, 0.0  ;;  %v2674_v61 = vpack.c.bf16 %v2656_v63, %v2623_v2  ;;  %v6063_v63 = vld [vmem:[#allocation2 + $0x87] sm:$0xff]  ;;  %vm6786_vm6 = vcmask 31744  }
  0x70   : > { %4963 = vmatmul.mubr.msk.bf16.gmra.mrb[20].mxu0 %vm6771_vm2, %v2672_v53  ;;  %4814 = vmatprep.mubr.msk.bf16.mxu1 %vm6772_vm15, %v1099_v16  ;;  %6773 = vst [vmem:[#allocation20_spill] sm:$0xff] %v6009_v24  ;;  %v740_v53 = vand.u32 15, %v518_v37  ;;  %v6018_v16 = vpack.c.bf16 %v5859_v11, %v2013_v1  ;;  %v6029_v4 = vpack.c.bf16 %v5909_v60, %v2015_v29  ;;  %v2019_v37 = vsel %vm5933_vm9, %v5961_v10, 0.0  ;;  %vm6787_vm13 = vmmov %vm6786_vm6 }
  0x71   : > { %4966 = vmatprep.mubr.msk.bf16.mxu0 %vm6774_vm5, %v2673_v35  ;;  %v2017_v35 = vsel %vm5864_vm1, %v5948_v28, 0.0  ;;  %v1100_v40 = vpack.c.bf16 %v6003_v26, %v1073_v43  ;;  %v6042_v34 = vpack.c.bf16 %v6015_v13, %v2019_v37  ;;  %v1101_v29 = vpack.c.bf16 %v6015_v13, %v1075_v48  ;;  %vm6788_vm11 = vmmov %vm6786_vm6 }
  0x72   : > { %6775 = vst [vmem:[#allocation21_spill] sm:$0xff] %v6018_v16  ;;  %6776 = vst [vmem:[#allocation22_spill] sm:$0xff] %v6029_v4  ;;  %v6039_v1 = vpack.c.bf16 %v6003_v26, %v2017_v35  ;;  %vm6046_vm15 = vcmp.ge.s32.totalorder %v621_v51, 1  ;;  %v2675_v62 = vpack.c.bf16 %v2658_v44, %v6023_v21  ;;  %vm6053_vm2 = vcmp.lt.s32.totalorder %v740_v53, 15  ;;  %v6057_v35 = vld [vmem:[#allocation2 + $0x111] sm:$0xff]  ;;  %v6069_v51 = vld [vmem:[#allocation2 + $0x7f] sm:$0xff] }
  0x73   : > { %6778 = vst [vmem:[#allocation24_spill] sm:$0xff] %v6042_v34  ;;  %6783 = vst [vmem:[#allocation25_spill] sm:$0xff] %v6057_v35  ;;  %vm6059_vm5 = vcmp.ge.s32.totalorder %v635_v18, 1  ;;  %v507_v48 = vadd.s32 160, %v5550_v59  ;;  %v1077_v53 = vsel %vm6046_vm15, %v6050_v38, 0.0  ;;  %v6074_v18 = vld [vmem:[#allocation2 + $0x8f] sm:$0xff] }
  0x74   : > { %6777 = vst [vmem:[#allocation23_spill] sm:$0xff] %v6039_v1  ;;  %v649_v44 = vand.u32 15, %v505_v19  ;;  %v2021_v37 = vsel %vm5957_vm7, %v6050_v38, 0.0  ;;  %v1079_v19 = vsel %vm6059_vm5, %v6063_v63, 0.0  ;;  %v1102_v4 = vpack.c.bf16 %v6069_v51, %v1077_v53  ;;  %v6121_v53 = vld [vmem:[#allocation2 + $0x9f] sm:$0xff] }
  0x75   : > { %v6092_v58 = vpack.c.bf16 %v6069_v51, %v2021_v37  ;;  %v663_v1 = vand.u32 15, %v507_v48  ;;  %v6107_v37 = vld [vmem:[#allocation2 + $0x97] sm:$0xff]  ;;  %v511_v48 = vadd.s32 192, %v5550_v59 }
  0x77   : > { %4815 = vmatmul.mubr.msk.bf16.gmra.mrb[8].mxu1 %vm6786_vm6, %v1100_v40  ;;  %v2023_v40 = vsel %vm6046_vm15, %v6063_v63, 0.0  ;;  %6791 = vst [vmem:[#allocation27_spill] sm:$0xff] %v6092_v58 }
  0x78   : > { %4967 = vmatmul.mubr.msk.bf16.gmra.mrb[24].mxu0 %vm6787_vm13, %v2674_v61  ;;  %4818 = vmatprep.mubr.msk.bf16.mxu1 %vm6788_vm11, %v1101_v29  ;;  %vm6789_vm13 = vmmov %vm6786_vm6  ;;  %v6083_v61 = vld [vmem:[#allocation2 + $0x109] sm:$0xff]  ;;  %v2660_v29 = vsel %vm6053_vm2, %v6057_v35, 0.0  ;;  %v6095_v34 = vpack.c.bf16 %v6074_v18, %v2023_v40  ;;  %v1103_v35 = vpack.c.bf16 %v6074_v18, %v1079_v19  ;;  %vm6103_vm11 = vcmp.ge.s32.totalorder %v649_v44, 1 }
  0x79   : > { %4970 = vmatprep.mubr.msk.bf16.mxu0 %vm6789_vm13, %v2675_v62  ;;  %6790 = vst [vmem:[#allocation26_spill] sm:$0xff] %v6083_v61  ;;  %v2955_v62 = vsel %vm5734_vm10, %v5787_v27, 0.0  ;;  %v2676_v16 = vpack.c.bf16 %v2660_v29, %v6083_v61  ;;  %vm6111_vm6 = vcmp.ge.s32.totalorder %v663_v1, 1  ;;  %v6115_v27 = vld [vmem:[#allocation2 + $0xa7] sm:$0xff]  ;;  %vm6797_vm10 = vmmov %vm6789_vm13  ;;  %v2957_v1 = vsel %vm5759_vm12, %v5809_v52, 0.0  ;;  %v6129_v44 = vld [vmem:[#allocation2 + $0xaf] sm:$0xff] }
  0x7a   : > { %6792 = vst [vmem:[#allocation28_spill] sm:$0xff] %v6095_v34  ;;  %v2987_v40 = vpack.c.bf16 %v5815_v55, %v2955_v62  ;;  %v509_v34 = vadd.s32 176, %v5550_v59  ;;  %vm6798_vm13 = vmmov %vm6797_vm10  ;;  %v1081_v55 = vsel %vm6103_vm11, %v6107_v37, 0.0  ;;  %v2959_v19 = vsel %vm5783_vm14, %v5874_v49, 0.0 }
  0x7b   : > { %vm6799_vm4 = vmmov %vm6797_vm10  ;;  %v691_v62 = vand.u32 15, %v511_v48  ;;  %v1104_v61 = vpack.c.bf16 %v6121_v53, %v1081_v55  ;;  %v515_v48 = vadd.s32 224, %v5550_v59  ;;  %v6174_v55 = vld [vmem:[%s6664_s3 + $0x10] sm:$0x3] }
  0x7c   : > { %v677_v29 = vand.u32 15, %v509_v34  ;;  %v6157_v34 = vld [vmem:[#allocation2 + $0xb7] sm:$0xff]  ;;  %vm6807_vm3 = vmmov %vm6799_vm4 }
  0x7d   : > { %vm6163_vm14 = vcmp.ge.s32.totalorder %v691_v62, 1  ;;  %v2963_v62 = vsel %vm5864_vm1, %v5961_v10, 0.0  ;;  %v2973_v50 = vsel %vm6103_vm11, %v6157_v34, 0.0  ;;  %v3253_v10 = vld [vmem:[#allocation2 + $0x48] sm:$0xff] }
  0x7e   : > { %vm6153_vm12 = vcmp.ge.s32.totalorder %v677_v29, 1 }
  0x7f   : > { %4819 = vmatmul.mubr.msk.bf16.gmra.mrb[12].mxu1 %vm6797_vm10, %v1102_v4  ;;  %v2025_v4 = vsel %vm6059_vm5, %v6107_v37, 0.0  ;;  %vm6803_vm10 = vcmask 1041408  }
  0x80   : > { %4971 = vmatmul.mubr.msk.bf16.gmra.mrb[28].mxu0 %vm6798_vm13, %v2676_v16  ;;  %4822 = vmatprep.mubr.msk.bf16.mxu1 %vm6799_vm4, %v1103_v35  ;;  %v2027_v16 = vsel %vm6103_vm11, %v6115_v27, 0.0  ;;  %v1083_v35 = vsel %vm6111_vm6, %v6115_v27, 0.0  ;;  %v6142_v0 = vpack.c.bf16 %v6121_v53, %v2025_v4  ;;  %v2989_v4 = vpack.c.bf16 %v5909_v60, %v2959_v19  ;;  %vm6806_vm13 = vmmov %vm6799_vm4 }
  0x81   : > { %4976 = vmatprep.mubr.msk.bf16.mxu0 %vm6799_vm4, %v2987_v40  ;;  %v6145_v52 = vpack.c.bf16 %v6129_v44, %v2027_v16  ;;  %v2988_v40 = vpack.c.bf16 %v5859_v11, %v2957_v1  ;;  %v1105_v58 = vpack.c.bf16 %v6129_v44, %v1083_v35  ;;  %v513_v16 = vadd.s32 208, %v5550_v59  ;;  %v6167_v11 = vld [vmem:[#allocation2 + $0xc7] sm:$0xff] }
  0x82   : > { %v3348_v25 = vsel %vm6803_vm10, %v5665_v46, 0  ;;  %v6178_v46 = vld [vmem:[#allocation2 + $0xbf] sm:$0xff]  ;;  %v1085_v60 = vsel %vm6153_vm12, %v6157_v34, 0.0  ;;  %v2961_v1 = vsel %vm5805_vm0, %v5948_v28, 0.0  ;;  %v2029_v35 = vsel %vm6111_vm6, %v6157_v34, 0.0  ;;  %vm6810_vm0 = vmmov %vm6803_vm10 }
  0x83   : > { %6800 = vst [vmem:[#allocation29_spill] sm:$0xff] %v6145_v52  ;;  %v1087_v29 = vsel %vm6163_vm14, %v6167_v11, 0.0  ;;  %v705_v19 = vand.u32 15, %v513_v16  ;;  %v6199_v9 = vpack.c.bf16 %v6178_v46, %v2029_v35  ;;  %v2965_v59 = vsel %vm5933_vm9, %v6050_v38, 0.0 }
  0x84   : > { %v2967_v38 = vsel %vm5957_vm7, %v6063_v63, 0.0  ;;  %v2975_v2 = vsel %vm6111_vm6, %v6167_v11, 0.0 }
  0x85   : > { %6808 = vst [vmem:[#allocation30_spill] sm:$0xff] %v6199_v9  ;;  %vm6212_vm10 = vcmp.ge.s32.totalorder %v705_v19, 1  ;;  %v2993_v52 = vpack.c.bf16 %v6074_v18, %v2967_v38  ;;  %v2969_v18 = vsel %vm6046_vm15, %v6107_v37, 0.0  ;;  %v2996_v37 = vpack.c.bf16 %v6178_v46, %v2973_v50  ;;  %v3269_v50 = vld [vmem:[#allocation2 + $0xc8] sm:$0xff] }
  0x87   : > { %4823 = vmatmul.mubr.msk.bf16.gmra.mrb[16].mxu1 %vm6806_vm13, %v1104_v61  ;;  %v6186_v61 = vld [vmem:[#allocation2 + $0xcf] sm:$0xff]  ;;  %vm6815_vm13 = vmmov %vm6807_vm3 }
  0x88   : > { %4977 = vmatmul.mubr.msk.bf16.vlgmr.msra.gmra.mrb[0].mxu0 %vm6799_vm4, %v2988_v40  ;;  %4826 = vmatprep.mubr.msk.bf16.mxu1 %vm6807_vm3, %v1105_v58  ;;  %v2031_v58 = vsel %vm6153_vm12, %v6167_v11, 0.0  ;;  %v719_v40 = vand.u32 15, %v515_v48  ;;  %v1107_v16 = vpack.c.bf16 %v6186_v61, %v1087_v29  ;;  %v6224_v48 = vld [vmem:[#allocation2 + $0xe7] sm:$0xff]  ;;  %vm6816_vm4 = vmmov %vm6807_vm3  ;;  %v2953_v11 = vld [vmem:[#allocation2 + $0x117] sm:$0xff] }
  0x89   : > { %5009 = vmatpush3.bf16.msra.mxu0 %v3348_v25  ;;  %4980 = vmatprep.mubr.msk.bf16.mxu0 %vm6807_vm3, %v2989_v4  ;;  %v6202_v28 = vpack.c.bf16 %v6186_v61, %v2031_v58  ;;  %v1106_v4 = vpack.c.bf16 %v6178_v46, %v1085_v60  ;;  %v2990_v25 = vpack.c.bf16 %v6003_v26, %v2961_v1  ;;  %v6216_v58 = vld [vmem:[#allocation2 + $0xd7] sm:$0xff]  ;;  %v994_v26 = vld [vmem:[#allocation2 + $0xdf] sm:$0xff]  ;;  %v2035_v29 = vsel %vm6212_vm10, %v6224_v48, 0.0  ;;  %v3249_v46 = vld [vmem:[#allocation2 + $0x28] sm:$0xff] }
  0x8a   : > { %5343 = vmatprep.subr.msk.bf16.mxu0 %vm6810_vm0, %v6174_v55  ;;  %vm6220_vm1 = vcmp.ge.s32.totalorder %v719_v40, 1  ;;  %v1089_v60 = vsel %vm6212_vm10, %v6216_v58, 0.0  ;;  %v2033_v1 = vsel %vm6163_vm14, %v6216_v58, 0.0  ;;  %vm6817_vm0 = vmmov %vm6807_vm3  ;;  %v2977_v3 = vsel %vm6153_vm12, %v6216_v58, 0.0 }
  0x8b   : > { %6809 = vst [vmem:[#allocation31_spill] sm:$0xff] %v6202_v28  ;;  %v2991_v28 = vpack.c.bf16 %v6015_v13, %v2963_v62  ;;  %v996_v13 = vld [vmem:[#allocation2 + $0xef] sm:$0xff]  ;;  %v1091_v19 = vsel %vm6220_vm1, %v6224_v48, 0.0  ;;  %v733_v62 = vand.u32 15, %v517_v12  ;;  %v6245_v40 = vpack.c.bf16 %v994_v26, %v2033_v1  ;;  %v2951_v1 = vld [vmem:[#allocation2 + $0x107] sm:$0xff]  ;;  %vm6824_vm7 = vmmov %vm6817_vm0 }
  0x8c   : > { %v6247_v23 = vpack.c.bf16 %v996_v13, %v2035_v29  ;;  %v1588_v12 = vld [vmem:[#allocation2 + $0x11] sm:$0xff]  ;;  %v1587_v29 = vld [vmem:[#allocation2 + $0x9] sm:$0xff]  ;;  %v2998_v42 = vpack.c.bf16 %v994_v26, %v2977_v3  ;;  %v2983_v24 = vsel %vm6220_vm1, %v2951_v1, 0.0 }
  0x8d   : > { %vm6253_vm9 = vcmp.ge.s32.totalorder %v733_v62, 1  ;;  %v6864_v3 = vld [vmem:[#allocation3_spill] sm:$0xff] }
  0x8e   : > { %6818 = vst [vmem:[#allocation32_spill] sm:$0xff] %v6247_v23 }
  0x8f   : > { %4827 = vmatmul.mubr.msk.bf16.gmra.mrb[20].mxu1 %vm6815_vm13, %v1106_v4  ;;  %v1108_v4 = vpack.c.bf16 %v994_v26, %v1089_v60  ;;  %vm6821_vm13 = vmmov %vm6817_vm0 }
  0x90   : > { %4981 = vmatmul.mubr.msk.bf16.gmra.mrb[4].mxu0 %vm6816_vm4, %v2990_v25  ;;  %4830 = vmatprep.mubr.msk.bf16.mxu1 %vm6807_vm3, %v1107_v16  ;;  %v2992_v25 = vpack.c.bf16 %v6069_v51, %v2965_v59  ;;  %v1109_v16 = vpack.c.bf16 %v996_v13, %v1091_v19  ;;  %vm6822_vm4 = vmmov %vm6817_vm0  ;;  %v2952_v51 = vld [vmem:[#allocation2 + $0x10f] sm:$0xff]  ;;  %v2039_v59 = vsel %vm6253_vm9, %v2951_v1, 0.0 }
  0x91   : > { %4984 = vmatprep.mubr.msk.bf16.mxu0 %vm6817_vm0, %v2991_v28  ;;  %v997_v28 = vld [vmem:[#allocation2 + $0xf7] sm:$0xff]  ;;  %vm6823_vm3 = vmmov %vm6817_vm0  ;;  %vm6825_vm0 = vnez %v6706_v47  ;;  %v6275_v38 = vpack.c.bf16 %v2952_v51, %v2039_v59  ;;  %v3001_v49 = vpack.c.bf16 %v2952_v51, %v2983_v24  ;;  %v3547_v47 = vld [vmem:[#allocation2 + $0x49] sm:$0xff] }
  0x92   : > { %v1093_v63 = vsel %vm6253_vm9, %v997_v28, 0.0  ;;  %v2037_v60 = vsel %vm6220_vm1, %v997_v28, 0.0  ;;  %v1684_v19 = vsel %vm6825_vm0, %v1588_v12, 0.0  ;;  %vm6827_vm15 = vmmov %vm6823_vm3  ;;  %v3278_v24 = vld [vmem:[#allocation2 + $0x110] sm:$0xff] }
  0x93   : > { %v6273_v62 = vpack.c.bf16 %v998_v32, %v2037_v60  ;;  %vm6833_vm11 = vmmov %vm6823_vm3 }
  0x94   : > { %vm6837_vm12 = vmmov %vm6823_vm3 }
  0x95   : > { %vm6843_vm1 = vmmov %vm6823_vm3 }
  0x97   : > { %4831 = vmatmul.mubr.msk.bf16.gmra.mrb[24].mxu1 %vm6821_vm13, %v1108_v4  ;;  %v2971_v4 = vsel %vm6059_vm5, %v6115_v27, 0.0  ;;  %vm6826_vm13 = vmmov %vm6823_vm3  ;;  %vm6829_vm5 = vcmask 1041408  }
  0x98   : > { %4985 = vmatmul.mubr.msk.bf16.gmra.mrb[8].mxu0 %vm6822_vm4, %v2992_v25  ;;  %4834 = vmatprep.mubr.msk.bf16.mxu1 %vm6823_vm3, %v1109_v16  ;;  %v1110_v25 = vpack.c.bf16 %v998_v32, %v1093_v63  ;;  %v2994_v16 = vpack.c.bf16 %v6121_v53, %v2969_v18  ;;  %v2995_v23 = vpack.c.bf16 %v6129_v44, %v2971_v4  ;;  %vm6828_vm4 = vmmov %vm6823_vm3  ;;  %v2108_v27 = vsel %vm6829_vm5, %v5900_v17, 0  ;;  %v3262_v63 = vld [vmem:[#allocation2 + $0x90] sm:$0xff]  ;;  %v3264_v18 = vld [vmem:[#allocation2 + $0xa0] sm:$0xff] }
  0x99   : > { %4988 = vmatprep.mubr.msk.bf16.mxu0 %vm6824_vm7, %v2993_v52  ;;  %v1715_v52 = vpack.c.bf16 %v1684_v19, %v1587_v29  ;;  %v2997_v53 = vpack.c.bf16 %v6186_v61, %v2975_v2  ;;  %vm6830_vm7 = vmmov %vm6823_vm3  ;;  %v2979_v17 = vsel %vm6163_vm14, %v6224_v48, 0.0  ;;  %v3250_v61 = vld [vmem:[#allocation2 + $0x30] sm:$0xff]  ;;  %v3265_v29 = vld [vmem:[#allocation2 + $0xa8] sm:$0xff] }
  0x9a   : > { %vm6834_vm6 = vmmov %vm6829_vm5  ;;  %v2999_v44 = vpack.c.bf16 %v996_v13, %v2979_v17  ;;  %v3281_v58 = vpack.c.bf16 %v3250_v61, %v3249_v46  ;;  %v3254_v48 = vld [vmem:[#allocation2 + $0x50] sm:$0xff]  ;;  %v6869_v17 = vld [vmem:[#allocation22_spill] sm:$0xff] }
  0x9b   : > { %vm6836_vm5 = vmmov %vm6823_vm3  ;;  %v3283_v26 = vpack.c.bf16 %v3254_v48, %v3253_v10  ;;  %v3266_v19 = vld [vmem:[#allocation2 + $0xb0] sm:$0xff]  ;;  %v3279_v46 = vld [vmem:[#allocation2 + $0x118] sm:$0xff] }
  0x9c   : > { %vm6838_vm14 = vmmov %vm6823_vm3  ;;  %v3270_v2 = vld [vmem:[#allocation2 + $0xd0] sm:$0xff]  ;;  %v3280_v61 = vld [vmem:[#allocation2 + $0x120] sm:$0xff] }
  0x9d   : > { %v3546_v10 = vld [vmem:[#allocation2 + $0x41] sm:$0xff]  ;;  %v6883_v48 = vld [vmem:[#allocation28_spill] sm:$0xff] }
  0x9f   : > { %4835 = vmatmul.mubr.msk.bf16.gmra.mrb[28].mxu1 %vm6826_vm13, %v1110_v25  ;;  %vm6831_vm13 = vmmov %vm6823_vm3 }
  0xa0   : > { %4989 = vmatmul.mubr.msk.bf16.gmra.mrb[12].mxu0 %vm6827_vm15, %v2994_v16  ;;  %4840 = vmatprep.mubr.msk.bf16.mxu1 %vm6828_vm4, %v1715_v52  ;;  %vm6832_vm15 = vmmov %vm6823_vm3  ;;  %v6365_v16 = vpack.c.bf16 %v3266_v19, %v3265_v29  ;;  %v3268_v52 = vld [vmem:[#allocation2 + $0xc0] sm:$0xff]  ;;  %v6901_v29 = vld [vmem:[#allocation31_spill] sm:$0xff] }
  0xa1   : > { %4992 = vmatprep.mubr.msk.bf16.mxu0 %vm6823_vm3, %v2995_v23  ;;  %vm6835_vm4 = vmmov %vm6823_vm3  ;;  %v3257_v23 = vld [vmem:[#allocation2 + $0x68] sm:$0xff]  ;;  %v3556_v19 = vld [vmem:[#allocation2 + $0x91] sm:$0xff] }
  0xa7   : > { %4841 = vmatmul.mubr.msk.bf16.vlgmr.msra.gmra.mrb[0].mxu1 %vm6830_vm7, %v5832_v14  ;;  %v5353_v14 = vld [vmem:[%s6664_s3 + $0x8] sm:$0x3]  ;;  %vm6839_vm7 = vmmov %vm6823_vm3 }
  0xa8   : > { %4873 = vmatpush3.bf16.msra.mxu1 %v2108_v27  ;;  %4993 = vmatmul.mubr.msk.bf16.gmra.mrb[16].mxu0 %vm6831_vm13, %v2996_v37  ;;  %vm6840_vm13 = vmmov %vm6823_vm3  ;;  %v6376_v27 = vpack.c.bf16 %v3270_v2, %v3269_v50  ;;  %v3555_v50 = vld [vmem:[#allocation2 + $0x89] sm:$0xff]  ;;  %v6908_v2 = vld [vmem:[#allocation9_spill] sm:$0xff] }
  0xa9   : > { %4844 = vmatprep.mubr.msk.bf16.mxu1 %vm6832_vm15, %v5854_v6  ;;  %4996 = vmatprep.mubr.msk.bf16.mxu0 %vm6833_vm11, %v2997_v53  ;;  %v2981_v6 = vsel %vm6212_vm10, %v997_v28, 0.0  ;;  %vm6841_vm15 = vmmov %vm6823_vm3  ;;  %v3258_v28 = vld [vmem:[#allocation2 + $0x70] sm:$0xff]  ;;  %v6862_v53 = vld [vmem:[#allocation20_spill] sm:$0xff] }
  0xaa   : > { %5339 = vmatprep.subr.msk.bf16.mxu1 %vm6834_vm6, %v5353_v14  ;;  %v3000_v34 = vpack.c.bf16 %v998_v32, %v2981_v6  ;;  %vm6842_vm10 = vmmov %vm6823_vm3  ;;  %v3285_v1 = vpack.c.bf16 %v3258_v28, %v3257_v23  ;;  %v3261_v32 = vld [vmem:[#allocation2 + $0x88] sm:$0xff] }
  0xab   : > { %vm6844_vm11 = vmmov %vm6843_vm1  ;;  %v3287_v59 = vpack.c.bf16 %v3262_v63, %v3261_v32  ;;  %v6871_v14 = vld [vmem:[#allocation10_spill] sm:$0xff] }
  0xac   : > { %vm6845_vm6 = vmmov %vm6843_vm1  ;;  %v3277_v6 = vld [vmem:[#allocation2 + $0x108] sm:$0xff] }
  0xad   : > { %v6897_v32 = vld [vmem:[#allocation6_spill] sm:$0xff] }
  0xaf   : > { %4845 = vmatmul.mubr.msk.bf16.gmra.mrb[4].mxu1 %vm6835_vm4, %v5869_v8  ;;  %v2985_v8 = vsel %vm6253_vm9, %v2953_v11, 0.0  ;;  %vm6846_vm9 = vcmask 1041408   ;;  %vm6847_vm4 = vmmov %vm6843_vm1  ;;  %v3544_v11 = vld [vmem:[#allocation2 + $0x31] sm:$0xff] }
  0xb0   : > { %4997 = vmatmul.mubr.msk.bf16.gmra.mrb[20].mxu0 %vm6823_vm3, %v2998_v42  ;;  %4848 = vmatprep.mubr.msk.bf16.mxu1 %vm6836_vm5, %v5884_v31  ;;  %v2954_v31 = vld [vmem:[#allocation2 + $0x11f] sm:$0xff]  ;;  %v3674_v13 = vsel %vm6846_vm9, %v6174_v55, 0  ;;  %vm6848_vm3 = vmmov %vm6843_vm1  ;;  %v6873_v42 = vld [vmem:[#allocation23_spill] sm:$0xff] }
  0xb1   : > { %5000 = vmatprep.mubr.msk.bf16.mxu0 %vm6837_vm12, %v2999_v44  ;;  %v3002_v35 = vpack.c.bf16 %v2954_v31, %v2985_v8  ;;  %vm6849_vm5 = vmmov %vm6843_vm1  ;;  %v3260_v55 = vld [vmem:[#allocation2 + $0x80] sm:$0xff]  ;;  %v6874_v44 = vld [vmem:[#allocation11_spill] sm:$0xff] }
  0xb2   : > { %vm6850_vm12 = vmmov %vm6843_vm1  ;;  %v6878_v31 = vld [vmem:[#allocation14_spill] sm:$0xff]  ;;  %v6880_v8 = vld [vmem:[#allocation27_spill] sm:$0xff] }
  0xb3   : > { %vm6858_vm9 = vmmov %vm6843_vm1 }
  0xb7   : > { %4849 = vmatmul.mubr.msk.bf16.gmra.mrb[8].mxu1 %vm6838_vm14, %v5890_v30  ;;  %v3251_v30 = vld [vmem:[#allocation2 + $0x38] sm:$0xff]  ;;  %vm6851_vm14 = vmmov %vm6843_vm1 }
  0xb8   : > { %5001 = vmatmul.mubr.msk.bf16.gmra.mrb[24].mxu0 %vm6839_vm7, %v3000_v34  ;;  %4852 = vmatprep.mubr.msk.bf16.mxu1 %vm6840_vm13, %v5903_v36  ;;  %v3252_v36 = vld [vmem:[#allocation2 + $0x40] sm:$0xff]  ;;  %vm6852_vm7 = vmmov %vm6843_vm1  ;;  %v6395_v34 = vpack.c.bf16 %v3278_v24, %v3277_v6  ;;  %v3559_v24 = vld [vmem:[#allocation2 + $0xa9] sm:$0xff] }
  0xb9   : > { %5004 = vmatprep.mubr.msk.bf16.mxu0 %vm6841_vm15, %v3001_v49  ;;  %v3282_v9 = vpack.c.bf16 %v3252_v36, %v3251_v30  ;;  %vm6853_vm13 = vmmov %vm6843_vm1  ;;  %v6876_v49 = vld [vmem:[#allocation24_spill] sm:$0xff]  ;;  %v3296_v30 = vpack.c.bf16 %v3280_v61, %v3279_v46  ;;  %v3562_v46 = vld [vmem:[#allocation2 + $0xc1] sm:$0xff] }
  0xba   : > { %vm6854_vm15 = vmmov %vm6843_vm1  ;;  %v3564_v61 = vld [vmem:[#allocation2 + $0xd1] sm:$0xff] }
  0xbf   : > { %4853 = vmatmul.mubr.msk.bf16.gmra.mrb[12].mxu1 %vm6842_vm10, %v5920_v57  ;;  %v3255_v57 = vld [vmem:[#allocation2 + $0x58] sm:$0xff]  ;;  %vm6855_vm10 = vmmov %vm6843_vm1 }
  0xc0   : > { %5005 = vmatmul.mubr.msk.bf16.gmra.mrb[28].mxu0 %vm6843_vm1, %v3002_v35  ;;  %4856 = vmatprep.mubr.msk.bf16.mxu1 %vm6844_vm11, %v5928_v56  ;;  %v3256_v56 = vld [vmem:[#allocation2 + $0x60] sm:$0xff]  ;;  %vm6856_vm11 = vmmov %vm6843_vm1  ;;  %v3543_v35 = vld [vmem:[#allocation2 + $0x29] sm:$0xff] }
  0xc1   : > { %5010 = vmatprep.mubr.msk.bf16.mxu0 %vm6845_vm6, %v3281_v58  ;;  %v3284_v12 = vpack.c.bf16 %v3256_v56, %v3255_v57  ;;  %vm6857_vm6 = vmmov %vm6843_vm1  ;;  %v3576_v58 = vsel %vm6825_vm0, %v3544_v11, 0.0  ;;  %v6890_v56 = vld [vmem:[#allocation5_spill] sm:$0xff] }
  0xc2   : > { %v3607_v36 = vpack.c.bf16 %v3576_v58, %v3543_v35  ;;  %vm6891_vm0 = vnez %v6890_v56  ;;  %v6923_v35 = vld [vmem:[#allocation15_spill] sm:$0xff]  ;;  %v6932_v56 = vld [vmem:[#allocation18_spill] sm:$0xff] }
  0xc7   : > { %4857 = vmatmul.mubr.msk.bf16.gmra.mrb[16].mxu1 %vm6847_vm4, %v5945_v54  ;;  %v1710_v54 = vsel %vm5937_vm8, %v5880_v33, 0.0  ;;  %vm6859_vm4 = vmmov %vm6843_vm1 }
  0xc8   : > { %5011 = vmatmul.mubr.msk.bf16.vlgmr.msra.gmra.mrb[0].mxu0 %vm6848_vm3, %v3282_v9  ;;  %4860 = vmatprep.mubr.msk.bf16.mxu1 %vm6849_vm5, %v5964_v7  ;;  %v3259_v7 = vld [vmem:[#allocation2 + $0x78] sm:$0xff]  ;;  %v1728_v51 = vpack.c.bf16 %v1710_v54, %v5914_v15  ;;  %vm6860_vm3 = vmmov %vm6843_vm1  ;;  %v6892_v54 = vld [vmem:[#allocation29_spill] sm:$0xff] }
  0xc9   : > { %5043 = vmatpush3.bf16.msra.mxu0 %v3674_v13  ;;  %5014 = vmatprep.mubr.msk.bf16.mxu0 %vm6850_vm12, %v3283_v26  ;;  %v3286_v60 = vpack.c.bf16 %v3260_v55, %v3259_v7  ;;  %vm6861_vm5 = vmmov %vm6843_vm1  ;;  %v3548_v9 = vld [vmem:[#allocation2 + $0x51] sm:$0xff]  ;;  %v3545_v26 = vld [vmem:[#allocation2 + $0x39] sm:$0xff] }
  0xca   : > { %vm6863_vm12 = vmmov %vm6843_vm1  ;;  %v6888_v13 = vld [vmem:[#allocation4_spill] sm:$0xff]  ;;  %v3580_v23 = vsel %vm6891_vm0, %v3548_v9, 0.0 }
  0xcb   : > { %v3552_v7 = vld [vmem:[#allocation2 + $0x71] sm:$0xff]  ;;  %v3549_v55 = vld [vmem:[#allocation2 + $0x59] sm:$0xff]  ;;  %vm6912_vm0 = vmmov %vm6843_vm1 }
  0xcf   : > { %4861 = vmatmul.mubr.msk.bf16.gmra.mrb[20].mxu1 %vm6851_vm14, %v5967_v45  ;;  %v1714_v45 = vsel %vm6053_vm2, %v5991_v39, 0.0  ;;  %vm6865_vm14 = vmmov %vm6843_vm1 }
  0xd0   : > { %5015 = vmatmul.mubr.msk.bf16.gmra.mrb[4].mxu0 %vm6852_vm7, %v3284_v12  ;;  %4864 = vmatprep.mubr.msk.bf16.mxu1 %vm6853_vm13, %v5978_v5  ;;  %v3263_v5 = vld [vmem:[#allocation2 + $0x98] sm:$0xff]  ;;  %v1730_v4 = vpack.c.bf16 %v1714_v45, %v6023_v21  ;;  %vm6867_vm7 = vmmov %vm6843_vm1  ;;  %v3609_v12 = vpack.c.bf16 %v3580_v23, %v3547_v47  ;;  %v3567_v47 = vld [vmem:[#allocation2 + $0xe9] sm:$0xff] }
  0xd1   : > { %5018 = vmatprep.mubr.msk.bf16.mxu0 %vm6854_vm15, %v3285_v1  ;;  %v6363_v25 = vpack.c.bf16 %v3264_v18, %v3263_v5  ;;  %vm6868_vm13 = vmmov %vm6843_vm1  ;;  %v3550_v1 = vld [vmem:[#allocation2 + $0x61] sm:$0xff] }
  0xd2   : > { %vm6870_vm15 = vmmov %vm6843_vm1  ;;  %v3554_v18 = vld [vmem:[#allocation2 + $0x81] sm:$0xff] }
  0xd7   : > { %4865 = vmatmul.mubr.msk.bf16.gmra.mrb[24].mxu1 %vm6855_vm10, %v1728_v51  ;;  %vm6872_vm10 = vmmov %vm6843_vm1  ;;  %v3551_v51 = vld [vmem:[#allocation2 + $0x69] sm:$0xff] }
  0xd8   : > { %5019 = vmatmul.mubr.msk.bf16.gmra.mrb[8].mxu0 %vm6843_vm1, %v3286_v60  ;;  %4868 = vmatprep.mubr.msk.bf16.mxu1 %vm6856_vm11, %v5993_v41  ;;  %v3267_v41 = vld [vmem:[#allocation2 + $0xb8] sm:$0xff]  ;;  %vm6875_vm11 = vmmov %vm6843_vm1  ;;  %v6899_v60 = vld [vmem:[#allocation7_spill] sm:$0xff] }
  0xd9   : > { %5022 = vmatprep.mubr.msk.bf16.mxu0 %vm6857_vm6, %v3287_v59  ;;  %v6374_v37 = vpack.c.bf16 %v3268_v52, %v3267_v41  ;;  %vm6877_vm6 = vmmov %vm6843_vm1  ;;  %v6906_v41 = vld [vmem:[#allocation8_spill] sm:$0xff] }
  0xdf   : > { %4869 = vmatmul.mubr.msk.bf16.gmra.mrb[28].mxu1 %vm6858_vm9, %v1730_v4  ;;  %vm6879_vm9 = vmmov %vm6843_vm1  ;;  %v3553_v4 = vld [vmem:[#allocation2 + $0x79] sm:$0xff] }
  0xe0   : > { %5023 = vmatmul.mubr.msk.bf16.gmra.mrb[12].mxu0 %vm6859_vm4, %v6363_v25  ;;  %4874 = vmatprep.mubr.msk.bf16.mxu1 %vm6860_vm3, %v6006_v20  ;;  %v6866_v20 = vld [vmem:[#allocation21_spill] sm:$0xff]  ;;  %vm6881_vm4 = vmmov %vm6843_vm1 }
  0xe1   : > { %5026 = vmatprep.mubr.msk.bf16.mxu0 %vm6861_vm5, %v6365_v16  ;;  %vm6882_vm3 = vmmov %vm6843_vm1 }
  0xe2   : > { %vm6884_vm5 = vmmov %vm6843_vm1 }
  0xe7   : > { %4875 = vmatmul.mubr.msk.bf16.vlgmr.msra.gmra.mrb[0].mxu1 %vm6863_vm12, %v6862_v53  ;;  %vm6885_vm12 = vmmov %vm6843_vm1 }
  0xe8   : > { %5077 = vmatpush3.bf16.msra.mxu1 %v6864_v3  ;;  %5027 = vmatmul.mubr.msk.bf16.gmra.mrb[16].mxu0 %vm6865_vm14, %v6374_v37  ;;  %vm6886_vm14 = vmmov %vm6843_vm1 }
  0xe9   : > { %4878 = vmatprep.mubr.msk.bf16.mxu1 %vm6867_vm7, %v6866_v20  ;;  %5030 = vmatprep.mubr.msk.bf16.mxu0 %vm6868_vm13, %v6376_v27  ;;  %vm6887_vm7 = vmmov %vm6843_vm1  ;;  %vm6889_vm13 = vnez %v6888_v13  ;;  %v2327_v13 = vld [vmem:[#allocation2 + $0xd8] sm:$0xff] }
  0xea   : > { %v3578_v57 = vsel %vm6889_vm13, %v3546_v10, 0.0  ;;  %vm6911_vm13 = vmmov %vm6843_vm1 }
  0xeb   : > { %v3608_v28 = vpack.c.bf16 %v3578_v57, %v3545_v26  ;;  %v2328_v57 = vld [vmem:[#allocation2 + $0xe0] sm:$0xff] }
  0xef   : > { %4879 = vmatmul.mubr.msk.bf16.gmra.mrb[4].mxu1 %vm6870_vm15, %v6869_v17  ;;  %vm6893_vm15 = vmmov %vm6843_vm1  ;;  %v3558_v17 = vld [vmem:[#allocation2 + $0xa1] sm:$0xff] }
  0xf0   : > { %5031 = vmatmul.mubr.msk.bf16.gmra.mrb[20].mxu0 %vm6872_vm10, %v6871_v14  ;;  %4882 = vmatprep.mubr.msk.bf16.mxu1 %vm6843_vm1, %v6873_v42  ;;  %vm6894_vm10 = vmmov %vm6843_vm1  ;;  %v6910_v14 = vld [vmem:[#allocation32_spill] sm:$0xff] }
  0xf1   : > { %5034 = vmatprep.mubr.msk.bf16.mxu0 %vm6875_vm11, %v6874_v44  ;;  %vm6896_vm11 = vmmov %vm6843_vm1  ;;  %v3560_v42 = vld [vmem:[#allocation2 + $0xb1] sm:$0xff] }
  0xf2   : > { %v6915_v44 = vld [vmem:[#allocation12_spill] sm:$0xff] }
  0xf7   : > { %4883 = vmatmul.mubr.msk.bf16.gmra.mrb[8].mxu1 %vm6877_vm6, %v6876_v49  ;;  %vm6898_vm6 = vnez %v6897_v32  ;;  %v6917_v49 = vld [vmem:[#allocation13_spill] sm:$0xff] }
  0xf8   : > { %5035 = vmatmul.mubr.msk.bf16.gmra.mrb[24].mxu0 %vm6879_vm9, %v6878_v31  ;;  %4886 = vmatprep.mubr.msk.bf16.mxu1 %vm6881_vm4, %v6880_v8  ;;  %v3582_v63 = vsel %vm6898_vm6, %v3550_v1, 0.0  ;;  %vm6900_vm9 = vnez %v6899_v60  ;;  %vm6902_vm4 = vmmov %vm6843_vm1  ;;  %v2330_v1 = vld [vmem:[#allocation2 + $0xf0] sm:$0xff] }
  0xf9   : > { %5038 = vmatprep.mubr.msk.bf16.mxu0 %vm6882_vm3, %v6395_v34  ;;  %v3584_v59 = vsel %vm6900_vm9, %v3552_v7, 0.0  ;;  %v3610_v45 = vpack.c.bf16 %v3582_v63, %v3549_v55  ;;  %vm6903_vm3 = vmmov %vm6843_vm1  ;;  %v2332_v7 = vld [vmem:[#allocation2 + $0x100] sm:$0xff] }
  0xfa   : > { %v3611_v5 = vpack.c.bf16 %v3584_v59, %v3551_v51  ;;  %vm6919_vm6 = vmmov %vm6912_vm0  ;;  %v6941_v51 = vld [vmem:[#allocation26_spill] sm:$0xff] }
  0xfb   : > { %vm6920_vm9 = vmmov %vm6912_vm0  ;;  %v3574_v59 = vld [vmem:[#allocation2 + $0x121] sm:$0xff] }
  0xff   : > { %4887 = vmatmul.mubr.msk.bf16.gmra.mrb[12].mxu1 %vm6884_vm5, %v6883_v48  ;;  %vm6904_vm5 = vmmov %vm6843_vm1 }
 0x100   : > { %5039 = vmatmul.mubr.msk.bf16.gmra.mrb[28].mxu0 %vm6885_vm12, %v3296_v30  ;;  %4890 = vmatprep.mubr.msk.bf16.mxu1 %vm6886_vm14, %v6142_v0  ;;  %v6895_v0 = vld [vmem:[#allocation30_spill] sm:$0xff]  ;;  %vm6905_vm12 = vmmov %vm6843_vm1  ;;  %vm6907_vm14 = vnez %v6906_v41 }
 0x101   : > { %5044 = vmatprep.mubr.msk.bf16.mxu0 %vm6887_vm7, %v3607_v36  ;;  %v3586_v52 = vsel %vm6907_vm14, %v3554_v18, 0.0  ;;  %vm6909_vm7 = vnez %v6908_v2  ;;  %v3563_v30 = vld [vmem:[#allocation2 + $0xc9] sm:$0xff]  ;;  %v6925_v36 = vld [vmem:[#allocation16_spill] sm:$0xff]  ;;  %vm6927_vm14 = vmmov %vm6912_vm0 }
 0x102   : > { %v3588_v53 = vsel %vm6909_vm7, %v3556_v19, 0.0  ;;  %v3612_v3 = vpack.c.bf16 %v3586_v52, %v3553_v4  ;;  %vm6928_vm7 = vmmov %vm6912_vm0 }
 0x103   : > { %v3613_v20 = vpack.c.bf16 %v3588_v53, %v3555_v50 }
 0x107   : > { %4891 = vmatmul.mubr.msk.bf16.gmra.mrb[16].mxu1 %vm6893_vm15, %v6892_v54  ;;  %vm6913_vm15 = vmmov %vm6912_vm0  ;;  %v2331_v54 = vld [vmem:[#allocation2 + $0xf8] sm:$0xff] }
 0x108   : > { %5045 = vmatmul.mubr.msk.bf16.vlgmr.msra.gmra.mrb[0].mxu0 %vm6894_vm10, %v3608_v28  ;;  %4894 = vmatprep.mubr.msk.bf16.mxu1 %vm6843_vm1, %v6895_v0  ;;  %vm6914_vm10 = vmmov %vm6912_vm0  ;;  %vm6916_vm1 = vnez %v6915_v44  ;;  %v2347_v28 = vpack.c.bf16 %v2328_v57, %v2327_v13  ;;  %v6939_v0 = vld [vmem:[#allocation19_spill] sm:$0xff]  ;;  %v2349_v63 = vpack.c.bf16 %v2332_v7, %v2331_v54 }
 0x109   : > { %5048 = vmatprep.mubr.msk.bf16.mxu0 %vm6896_vm11, %v3609_v12  ;;  %v3590_v6 = vsel %vm6916_vm1, %v3558_v17, 0.0  ;;  %vm6918_vm11 = vnez %v6917_v49  ;;  %vm6934_vm1 = vmmov %vm6912_vm0 }
 0x10a   : > { %v3592_v11 = vsel %vm6918_vm11, %v3560_v42, 0.0  ;;  %vm6935_vm11 = vmmov %vm6912_vm0 }
 0x10b   : > { %v3615_v8 = vpack.c.bf16 %v3592_v11, %v3559_v24 }
 0x10f   : > { %4895 = vmatmul.mubr.msk.bf16.gmra.mrb[20].mxu1 %vm6902_vm4, %v6901_v29  ;;  %vm6921_vm4 = vmmov %vm6912_vm0 }
 0x110   : > { %5049 = vmatmul.mubr.msk.bf16.gmra.mrb[4].mxu0 %vm6903_vm3, %v3610_v45  ;;  %4898 = vmatprep.mubr.msk.bf16.mxu1 %vm6904_vm5, %v6245_v40  ;;  %v3557_v40 = vld [vmem:[#allocation2 + $0x99] sm:$0xff]  ;;  %vm6922_vm3 = vmmov %vm6912_vm0  ;;  %vm6924_vm5 = vnez %v6923_v35 }
 0x111   : > { %5052 = vmatprep.mubr.msk.bf16.mxu0 %vm6905_vm12, %v3611_v5  ;;  %v3614_v31 = vpack.c.bf16 %v3590_v6, %v3557_v40  ;;  %v3594_v58 = vsel %vm6924_vm5, %v3562_v46, 0.0  ;;  %vm6926_vm12 = vnez %v6925_v36  ;;  %vm6943_vm5 = vmmov %vm6912_vm0 }
 0x112   : > { %v3596_v10 = vsel %vm6926_vm12, %v3564_v61, 0.0  ;;  %vm6944_vm12 = vmmov %vm6912_vm0 }
 0x113   : > { %v3617_v9 = vpack.c.bf16 %v3596_v10, %v3563_v30 }
 0x117   : > { %4899 = vmatmul.mubr.msk.bf16.gmra.mrb[24].mxu1 %vm6911_vm13, %v6910_v14  ;;  %vm6929_vm13 = vmmov %vm6912_vm0 }
 0x118   : > { %5053 = vmatmul.mubr.msk.bf16.gmra.mrb[8].mxu0 %vm6912_vm0, %v3612_v3  ;;  %4902 = vmatprep.mubr.msk.bf16.mxu1 %vm6913_vm15, %v6273_v62  ;;  %v3561_v62 = vld [vmem:[#allocation2 + $0xb9] sm:$0xff] }
 0x119   : > { %5056 = vmatprep.mubr.msk.bf16.mxu0 %vm6914_vm10, %v3613_v20  ;;  %v3616_v48 = vpack.c.bf16 %v3594_v58, %v3561_v62  ;;  %vm6933_vm10 = vnez %v6932_v56 }
 0x11f   : > { %4903 = vmatmul.mubr.msk.bf16.gmra.mrb[28].mxu1 %vm6919_vm6, %v6275_v38  ;;  %v3568_v38 = vld [vmem:[#allocation2 + $0xf1] sm:$0xff]  ;;  %vm6936_vm6 = vmmov %vm6912_vm0 }
 0x120   : > { %5057 = vmatmul.mubr.msk.bf16.gmra.mrb[12].mxu0 %vm6920_vm9, %v3614_v31  ;;  %4924 = vmatprep.mubr.msk.bf16.mxu1 %vm6921_vm4, %v6363_v25  ;;  %v6930_v25 = vld [vmem:[#allocation17_spill] sm:$0xff]  ;;  %v3600_v23 = vsel %vm6933_vm10, %v3568_v38, 0.0  ;;  %vm6937_vm9 = vmmov %vm6912_vm0  ;;  %vm6940_vm4 = vnez %v6939_v0 }
 0x121   : > { %5060 = vmatprep.mubr.msk.bf16.mxu0 %vm6922_vm3, %v3615_v8  ;;  %vm6931_vm15 = vnez %v6930_v25  ;;  %v3619_v12 = vpack.c.bf16 %v3600_v23, %v3567_v47  ;;  %vm6942_vm3 = vmmov %vm6912_vm0 }
 0x122   : > { %v3598_v26 = vsel %vm6931_vm15, %v5880_v33, 0.0  ;;  %v3602_v33 = vsel %vm5937_vm8, %v5991_v39, 0.0  ;;  %vm6945_vm8 = vmmov %vm6912_vm0  ;;  %v3606_v39 = vsel %vm6053_vm2, %v3574_v59, 0.0  ;;  %vm4170_vm2 = vcmask 27648  }
 0x123   : > { %v3622_v45 = vpack.c.bf16 %v3606_v39, %v3573_v22  ;;  %vm6949_vm15 = vmmov %vm6912_vm0 }
 0x124   : > { %vm6950_vm10 = vmmov %vm6912_vm0 }
 0x127   : > { %4925 = vmatmul.mubr.msk.bf16.vlgmr.msra.gmra.mrb[16].mxu1 %vm6927_vm14, %v6365_v16  ;;  %v3618_v16 = vpack.c.bf16 %v3598_v26, %v5914_v15  ;;  %v6938_v15 = vld [vmem:[#allocation25_spill] sm:$0xff]  ;;  %vm6946_vm14 = vmmov %vm6912_vm0 }
 0x128   : > { %5061 = vmatmul.mubr.msk.bf16.gmra.mrb[16].mxu0 %vm6928_vm7, %v3616_v48  ;;  %4928 = vmatprep.mubr.msk.bf16.mxu1 %vm6929_vm13, %v6374_v37  ;;  %v2329_v37 = vld [vmem:[#allocation2 + $0xe8] sm:$0xff]  ;;  %v3604_v55 = vsel %vm6940_vm4, %v6938_v15, 0.0  ;;  %vm6947_vm7 = vmmov %vm6912_vm0 }
 0x129   : > { %5064 = vmatprep.mubr.msk.bf16.mxu0 %vm6912_vm0, %v3617_v9  ;;  %v2348_v32 = vpack.c.bf16 %v2330_v1, %v2329_v37  ;;  %v3621_v60 = vpack.c.bf16 %v3604_v55, %v6941_v51  ;;  %vm6948_vm13 = vmmov %vm6912_vm0 }
 0x12a   : > { %vm6955_vm4 = vmmov %vm6912_vm0 }
 0x12f   : > { %4929 = vmatmul.mubr.msk.bf16.gmra.mrb[20].mxu1 %vm6934_vm1, %v6376_v27  ;;  %v3620_v27 = vpack.c.bf16 %v3602_v33, %v6023_v21  ;;  %vm6951_vm1 = vmmov %vm6912_vm0 }
 0x130   : > { %5065 = vmatmul.mubr.msk.bf16.gmra.mrb[20].mxu0 %vm6935_vm11, %v3618_v16  ;;  %4932 = vmatprep.mubr.msk.bf16.mxu1 %vm6936_vm6, %v2347_v28  ;;  %vm6952_vm11 = vmmov %vm6912_vm0 }
 0x131   : > { %5068 = vmatprep.mubr.msk.bf16.mxu0 %vm6937_vm9, %v3619_v12  ;;  %vm6953_vm6 = vmmov %vm6912_vm0 }
 0x132   : > { %vm6954_vm9 = vmmov %vm6912_vm0 }
 0x137   : > { %4933 = vmatmul.mubr.msk.bf16.gmra.mrb[24].mxu1 %vm6942_vm3, %v2348_v32  ;;  %vm6956_vm3 = vmmov %vm6912_vm0 }
 0x138   : > { %5069 = vmatmul.mubr.msk.bf16.gmra.mrb[24].mxu0 %vm6943_vm5, %v3620_v27  ;;  %4936 = vmatprep.mubr.msk.bf16.mxu1 %vm6944_vm12, %v2349_v63  ;;  %vm6957_vm5 = vmmov %vm6912_vm0 }
 0x139   : > { %5072 = vmatprep.mubr.msk.bf16.mxu0 %vm6945_vm8, %v3621_v60  ;;  %vm6958_vm12 = vmmov %vm6912_vm0 }
 0x13a   : > { %vm6959_vm8 = vmmov %vm6912_vm0 }
 0x13f   : > { %4937 = vmatmul.mubr.msk.bf16.gmra.mrb[28].mxu1 %vm6946_vm14, %v6395_v34  ;;  %vm6960_vm14 = vmmov %vm6912_vm0 }
 0x140   : > { %5073 = vmatmul.mubr.msk.bf16.gmra.mrb[28].mxu0 %vm6947_vm7, %v3622_v45  ;;  %vm6961_vm7 = vmmov %vm6912_vm0 }
 0x1ba   : > { %v4876_v21 = vpop.f32.mrb[0].mxu1 }
 0x1bb   : > { %v2144_v5 = vpop.f32.mrb[1].mxu1 }
 0x1bc   : > { %v4877_v18 = vpop.f32.mrb[2].mxu1 }
 0x1bd   : > { %v2147_v29 = vpop.f32.mrb[3].mxu1 }
 0x1c2   : > { %v4880_v19 = vpop.f32.mrb[4].mxu1 }
 0x1c3   : > { %v2160_v4 = vpop.f32.mrb[5].mxu1 }
 0x1c4   : > { %v4881_v41 = vpop.f32.mrb[6].mxu1 }
 0x1c5   : > { %v2163_v52 = vpop.f32.mrb[7].mxu1 }
 0x1ca   : > { %v6491_v50 = vpop.f32.mrb[8].mxu1 }
 0x1cb   : > { %v6493_v2 = vpop.f32.mrb[9].mxu1 }
 0x1cc   : > { %v6495_v43 = vpop.f32.mrb[10].mxu1 }
 0x1cd   : > { %v6497_v53 = vpop.f32.mrb[11].mxu1 }
 0x1d2   : > { %v6499_v34 = vpop.f32.mrb[12].mxu1 }
 0x1d3   : > { %v6501_v3 = vpop.f32.mrb[13].mxu1 }
 0x1d4   : > { %v6503_v20 = vpop.f32.mrb[14].mxu1 }
 0x1d5   : > { %v6505_v17 = vpop.f32.mrb[15].mxu1 }
 0x1db   : > { %v5046_v14 = vpop.f32.mrb[0].mxu0 }
 0x1dc   : > { %v5078_v42 = vadd.f32 %v5046_v14, %v4876_v21  ;;  %v3710_v40 = vpop.f32.mrb[1].mxu0 }
 0x1dd   : > { %v5079_v44 = vadd.f32 %v3710_v40, %v2144_v5  ;;  %v5047_v6 = vpop.f32.mrb[2].mxu0 }
 0x1de   : > { %v4508_v24 = vpack.c.bf16 %v5078_v42, %v5078_v42  ;;  %v5080_v49 = vadd.f32 %v5047_v6, %v4877_v18  ;;  %v3713_v11 = vpop.f32.mrb[3].mxu0  ;;  %v3942_v61 = vmul.f32 %v5078_v42, %v5078_v42  ;;  %v3872_v9 = vsel %vm6949_vm15, %v5078_v42, 0.0  ;;  %vm6963_vm15 = vmmov %vm6912_vm0 }
 0x1df   : > { %v3940_v31 = vmul.f32 %v5079_v44, %v5079_v44  ;;  %v4506_v8 = vpack.c.bf16 %v5079_v44, %v5079_v44  ;;  %v5081_v46 = vadd.f32 %v3713_v11, %v2147_v29  ;;  %v3869_v35 = vsel %vm6948_vm13, %v5079_v44, 0.0  ;;  %vm6962_vm13 = vmmov %vm6912_vm0 }
 0x1e0   : > { %4173 = vst.msk [vmem:[%s6512_s10 + $0x8] sm:$0xf] %vm4170_vm2, %v4508_v24  ;;  %v4509_v62 = vpack.c.bf16 %v5080_v49, %v5080_v49  ;;  %v3943_v10 = vmul.f32 %v5080_v49, %v5080_v49  ;;  %v3975_v23 = vsel %vm6952_vm11, %v3942_v61, 0.0  ;;  %v3874_v12 = vsel %vm6953_vm6, %v5080_v49, 0.0  ;;  %vm6966_vm11 = vmmov %vm6912_vm0 }
 0x1e1   : > { %4171 = vst.msk [vmem:[%s6512_s10] sm:$0xf] %vm4170_vm2, %v4506_v8  ;;  %v3870_v58 = vsel %vm6912_vm0, %v5081_v46, 0.0  ;;  %v3941_v30 = vmul.f32 %v5081_v46, %v5081_v46  ;;  %v4507_v36 = vpack.c.bf16 %v5081_v46, %v5081_v46  ;;  %v3972_v38 = vsel %vm6950_vm10, %v3940_v31, 0.0  ;;  %vm6964_vm10 = vmmov %vm6912_vm0 }
 0x1e2   : > { %4174 = vst.msk [vmem:[%s6512_s10 + $0xc] sm:$0xf] %vm4170_vm2, %v4509_v62  ;;  %v3871_v48 = vadd.f32 %v3870_v58, %v3869_v35  ;;  %v3977_v37 = vsel %vm6954_vm9, %v3943_v10, 0.0  ;;  %vm6967_vm6 = vmmov %vm6912_vm0 }
 0x1e3   : > { %v3973_v25 = vsel %vm6951_vm1, %v3941_v30, 0.0  ;;  %4172 = vst.msk [vmem:[%s6512_s10 + $0x4] sm:$0xf] %vm4170_vm2, %v4507_v36  ;;  %v5050_v26 = vpop.f32.mrb[4].mxu0  ;;  %vm6965_vm1 = vmmov %vm6912_vm0 }
 0x1e4   : > { %v3873_v13 = vadd.f32 %v3872_v9, %v3871_v48  ;;  %v3974_v57 = vadd.f32 %v3973_v25, %v3972_v38  ;;  %v5082_v47 = vadd.f32 %v5050_v26, %v4880_v19  ;;  %v3726_v56 = vpop.f32.mrb[5].mxu0  ;;  %vm6968_vm9 = vmmov %vm6912_vm0 }
 0x1e5   : > { %v5083_v16 = vadd.f32 %v3726_v56, %v2160_v4  ;;  %v5051_v28 = vpop.f32.mrb[6].mxu0 }
 0x1e6   : > { %v3976_v1 = vadd.f32 %v3975_v23, %v3974_v57  ;;  %v4512_v33 = vpack.c.bf16 %v5082_v47, %v5082_v47  ;;  %v3729_v54 = vpop.f32.mrb[7].mxu0  ;;  %v3875_v7 = vadd.f32 %v3874_v12, %v3873_v13  ;;  %v5084_v27 = vadd.f32 %v5051_v28, %v4881_v41 }
 0x1e7   : > { %v3876_v15 = vsel %vm6955_vm4, %v5083_v16, 0.0  ;;  %v3944_v0 = vmul.f32 %v5083_v16, %v5083_v16  ;;  %v4510_v55 = vpack.c.bf16 %v5083_v16, %v5083_v16  ;;  %v5085_v63 = vadd.f32 %v3729_v54, %v2163_v52  ;;  %vm6969_vm4 = vmmov %vm6912_vm0 }
 0x1e8   : > { %4177 = vst.msk [vmem:[%s6512_s10 + $0x18] sm:$0xf] %vm4170_vm2, %v4512_v33  ;;  %v3978_v32 = vadd.f32 %v3977_v37, %v3976_v1  ;;  %v3877_v51 = vadd.f32 %v3876_v15, %v3875_v7  ;;  %v3946_v59 = vmul.f32 %v5082_v47, %v5082_v47  ;;  %v4513_v39 = vpack.c.bf16 %v5084_v27, %v5084_v27 }
 0x1e9   : > { %v3979_v60 = vsel %vm6956_vm3, %v3944_v0, 0.0  ;;  %4175 = vst.msk [vmem:[%s6512_s10 + $0x10] sm:$0xf] %vm4170_vm2, %v4510_v55  ;;  %v3878_v45 = vsel %vm6957_vm5, %v5085_v63, 0.0  ;;  %v3945_v21 = vmul.f32 %v5085_v63, %v5085_v63  ;;  %v4511_v5 = vpack.c.bf16 %v5085_v63, %v5085_v63  ;;  %vm6970_vm3 = vmmov %vm6912_vm0 }
 0x1ea   : > { %v3980_v22 = vadd.f32 %v3979_v60, %v3978_v32  ;;  %4178 = vst.msk [vmem:[%s6512_s10 + $0x1c] sm:$0xf] %vm4170_vm2, %v4513_v39  ;;  %v3879_v29 = vadd.f32 %v3878_v45, %v3877_v51  ;;  %v3880_v41 = vsel %vm6958_vm12, %v5082_v47, 0.0  ;;  %v3947_v52 = vmul.f32 %v5084_v27, %v5084_v27  ;;  %vm6971_vm5 = vmmov %vm6912_vm0 }
 0x1eb   : > { %v5054_v18 = vpop.f32.mrb[8].mxu0  ;;  %v3981_v14 = vsel %vm6959_vm8, %v3945_v21, 0.0  ;;  %4176 = vst.msk [vmem:[%s6512_s10 + $0x14] sm:$0xf] %vm4170_vm2, %v4511_v5  ;;  %v3983_v44 = vsel %vm6960_vm14, %v3946_v59, 0.0  ;;  %v3882_v6 = vsel %vm6961_vm7, %v5084_v27, 0.0  ;;  %vm6972_vm12 = vmmov %vm6912_vm0 }
 0x1ec   : > { %v5086_v19 = vadd.f32 %v5054_v18, %v6491_v50  ;;  %v3742_v4 = vpop.f32.mrb[9].mxu0  ;;  %v3881_v24 = vadd.f32 %v3880_v41, %v3879_v29  ;;  %v3982_v49 = vadd.f32 %v3981_v14, %v3980_v22  ;;  %vm6973_vm8 = vmmov %vm6912_vm0 }
 0x1ed   : > { %v5087_v42 = vadd.f32 %v3742_v4, %v6493_v2  ;;  %v5055_v40 = vpop.f32.mrb[10].mxu0  ;;  %v3985_v2 = vsel %vm6912_vm0, %v3947_v52, 0.0  ;;  %vm6974_vm14 = vmmov %vm6912_vm0 }
 0x1ee   : > { %v3745_v50 = vpop.f32.mrb[11].mxu0  ;;  %v4516_v11 = vpack.c.bf16 %v5086_v19, %v5086_v19  ;;  %v3984_v61 = vadd.f32 %v3983_v44, %v3982_v49  ;;  %v3883_v62 = vadd.f32 %v3882_v6, %v3881_v24  ;;  %v5088_v35 = vadd.f32 %v5055_v40, %v6495_v43  ;;  %vm6975_vm7 = vmmov %vm6912_vm0 }
 0x1ef   : > { %v3884_v31 = vsel %vm6962_vm13, %v5087_v42, 0.0  ;;  %v3948_v8 = vmul.f32 %v5087_v42, %v5087_v42  ;;  %v4514_v46 = vpack.c.bf16 %v5087_v42, %v5087_v42  ;;  %v5089_v30 = vadd.f32 %v3745_v50, %v6497_v53  ;;  %vm6976_vm13 = vmmov %vm6912_vm0 }
 0x1f0   : > { %4181 = vst.msk [vmem:[%s6512_s10 + $0x28] sm:$0xf] %vm4170_vm2, %v4516_v11  ;;  %v3950_v36 = vmul.f32 %v5086_v19, %v5086_v19  ;;  %v3885_v10 = vadd.f32 %v3884_v31, %v3883_v62  ;;  %v3986_v48 = vadd.f32 %v3985_v2, %v3984_v61  ;;  %v4517_v9 = vpack.c.bf16 %v5088_v35, %v5088_v35 }
 0x1f1   : > { %v3987_v58 = vsel %vm6963_vm15, %v3948_v8, 0.0  ;;  %4179 = vst.msk [vmem:[%s6512_s10 + $0x20] sm:$0xf] %vm4170_vm2, %v4514_v46  ;;  %v3886_v38 = vsel %vm6964_vm10, %v5089_v30, 0.0  ;;  %v3949_v25 = vmul.f32 %v5089_v30, %v5089_v30  ;;  %v4515_v43 = vpack.c.bf16 %v5089_v30, %v5089_v30  ;;  %vm6977_vm15 = vmmov %vm6912_vm0 }
 0x1f2   : > { %v3988_v13 = vadd.f32 %v3987_v58, %v3986_v48  ;;  %v3887_v57 = vadd.f32 %v3886_v38, %v3885_v10  ;;  %v3888_v23 = vsel %vm6965_vm1, %v5086_v19, 0.0  ;;  %v3951_v16 = vmul.f32 %v5088_v35, %v5088_v35  ;;  %4182 = vst.msk [vmem:[%s6512_s10 + $0x2c] sm:$0xf] %vm4170_vm2, %v4517_v9  ;;  %vm6978_vm10 = vmmov %vm6912_vm0 }
 0x1f3   : > { %v5058_v26 = vpop.f32.mrb[12].mxu0  ;;  %v3989_v53 = vsel %vm6966_vm11, %v3949_v25, 0.0  ;;  %4180 = vst.msk [vmem:[%s6512_s10 + $0x24] sm:$0xf] %vm4170_vm2, %v4515_v43  ;;  %v3991_v37 = vsel %vm6967_vm6, %v3950_v36, 0.0  ;;  %v3890_v1 = vsel %vm6968_vm9, %v5088_v35, 0.0  ;;  %vm6979_vm1 = vmmov %vm6912_vm0 }
 0x1f4   : > { %v5090_v47 = vadd.f32 %v5058_v26, %v6499_v34  ;;  %v3758_v56 = vpop.f32.mrb[13].mxu0  ;;  %v3889_v34 = vadd.f32 %v3888_v23, %v3887_v57  ;;  %v3990_v33 = vadd.f32 %v3989_v53, %v3988_v13  ;;  %vm6980_vm11 = vmmov %vm6912_vm0 }
 0x1f5   : > { %v5091_v28 = vadd.f32 %v3758_v56, %v6501_v3  ;;  %v5059_v12 = vpop.f32.mrb[14].mxu0  ;;  %v3993_v3 = vsel %vm6970_vm3, %v3951_v16, 0.0  ;;  %vm6981_vm6 = vmmov %vm6912_vm0 }
 0x1f6   : > { %v3761_v54 = vpop.f32.mrb[15].mxu0  ;;  %v4520_v7 = vpack.c.bf16 %v5090_v47, %v5090_v47  ;;  %v3992_v32 = vadd.f32 %v3991_v37, %v3990_v33  ;;  %v3891_v27 = vadd.f32 %v3890_v1, %v3889_v34  ;;  %v5092_v63 = vadd.f32 %v5059_v12, %v6503_v20  ;;  %vm6982_vm9 = vmmov %vm6912_vm0 }
 0x1f7   : > { %v3892_v15 = vsel %vm6969_vm4, %v5091_v28, 0.0  ;;  %v3952_v0 = vmul.f32 %v5091_v28, %v5091_v28  ;;  %v4518_v55 = vpack.c.bf16 %v5091_v28, %v5091_v28  ;;  %v5093_v60 = vadd.f32 %v3761_v54, %v6505_v17  ;;  %vm6983_vm4 = vmmov %vm6912_vm0 }
 0x1f8   : > { %4185 = vst.msk [vmem:[%s6512_s10 + $0x38] sm:$0xf] %vm4170_vm2, %v4520_v7  ;;  %v3954_v59 = vmul.f32 %v5090_v47, %v5090_v47  ;;  %v3893_v22 = vadd.f32 %v3892_v15, %v3891_v27  ;;  %v3994_v39 = vadd.f32 %v3993_v3, %v3992_v32  ;;  %v4521_v21 = vpack.c.bf16 %v5092_v63, %v5092_v63  ;;  %vm6984_vm3 = vmmov %vm6912_vm0 }
 0x1f9   : > { %v3995_v51 = vsel %vm6971_vm5, %v3952_v0, 0.0  ;;  %4183 = vst.msk [vmem:[%s6512_s10 + $0x30] sm:$0xf] %vm4170_vm2, %v4518_v55  ;;  %v3894_v5 = vsel %vm6972_vm12, %v5093_v60, 0.0  ;;  %v3953_v20 = vmul.f32 %v5093_v60, %v5093_v60  ;;  %v4519_v18 = vpack.c.bf16 %v5093_v60, %v5093_v60  ;;  %vm6985_vm5 = vmmov %vm6912_vm0 }
 0x1fa   : > { %v4926_v45 = vpop.f32.mrb[16].mxu1  ;;  %v3996_v4 = vadd.f32 %v3995_v51, %v3994_v39  ;;  %v3895_v41 = vadd.f32 %v3894_v5, %v3893_v22  ;;  %v3896_v17 = vsel %vm6973_vm8, %v5090_v47, 0.0  ;;  %v3955_v40 = vmul.f32 %v5092_v63, %v5092_v63  ;;  %4186 = vst.msk [vmem:[%s6512_s10 + $0x3c] sm:$0xf] %vm4170_vm2, %v4521_v21  ;;  %vm6986_vm12 = vmmov %vm6912_vm0 }
 0x1fb   : > { %v2502_v29 = vpop.f32.mrb[17].mxu1  ;;  %v5062_v19 = vpop.f32.mrb[16].mxu0  ;;  %v3997_v44 = vsel %vm6974_vm14, %v3953_v20, 0.0  ;;  %4184 = vst.msk [vmem:[%s6512_s10 + $0x34] sm:$0xf] %vm4170_vm2, %v4519_v18  ;;  %v3999_v50 = vsel %vm6975_vm7, %v3954_v59, 0.0  ;;  %vm6987_vm8 = vmmov %vm6912_vm0 }
 0x1fc   : > { %v5094_v52 = vadd.f32 %v5062_v19, %v4926_v45  ;;  %v4927_v14 = vpop.f32.mrb[18].mxu1  ;;  %v3774_v42 = vpop.f32.mrb[17].mxu0  ;;  %v3898_v11 = vsel %vm6976_vm13, %v5092_v63, 0.0  ;;  %v3897_v31 = vadd.f32 %v3896_v17, %v3895_v41  ;;  %v3998_v8 = vadd.f32 %v3997_v44, %v3996_v4  ;;  %vm6988_vm14 = vmmov %vm6912_vm0 }
 0x1fd   : > { %v5095_v6 = vadd.f32 %v3774_v42, %v2502_v29  ;;  %v2505_v24 = vpop.f32.mrb[19].mxu1  ;;  %v5063_v49 = vpop.f32.mrb[18].mxu0  ;;  %v4001_v10 = vsel %vm6977_vm15, %v3955_v40, 0.0  ;;  %vm6989_vm7 = vmmov %vm6912_vm0 }
 0x1fe   : > { %v3777_v46 = vpop.f32.mrb[19].mxu0  ;;  %v4524_v61 = vpack.c.bf16 %v5094_v52, %v5094_v52  ;;  %v4000_v58 = vadd.f32 %v3999_v50, %v3998_v8  ;;  %v3899_v30 = vadd.f32 %v3898_v11, %v3897_v31  ;;  %v5096_v36 = vadd.f32 %v5063_v49, %v4927_v14  ;;  %vm6990_vm13 = vmmov %vm6912_vm0 }
 0x1ff   : > { %v3900_v62 = vsel %vm6912_vm0, %v5095_v6, 0.0  ;;  %v3956_v35 = vmul.f32 %v5095_v6, %v5095_v6  ;;  %v4522_v2 = vpack.c.bf16 %v5095_v6, %v5095_v6  ;;  %v5097_v9 = vadd.f32 %v3777_v46, %v2505_v24  ;;  %vm6991_vm15 = vmmov %vm6912_vm0 }
 0x200   : > { %4189 = vst.msk [vmem:[%s6512_s10 + $0x48] sm:$0xf] %vm4170_vm2, %v4524_v61  ;;  %v3958_v38 = vmul.f32 %v5094_v52, %v5094_v52  ;;  %v3901_v25 = vadd.f32 %v3900_v62, %v3899_v30  ;;  %v4002_v43 = vadd.f32 %v4001_v10, %v4000_v58  ;;  %v4525_v13 = vpack.c.bf16 %v5096_v36, %v5096_v36 }
 0x201   : > { %v4003_v48 = vsel %vm6978_vm10, %v3956_v35, 0.0  ;;  %4187 = vst.msk [vmem:[%s6512_s10 + $0x40] sm:$0xf] %vm4170_vm2, %v4522_v2  ;;  %v3902_v57 = vsel %vm6979_vm1, %v5097_v9, 0.0  ;;  %v3957_v47 = vmul.f32 %v5097_v9, %v5097_v9  ;;  %v4523_v56 = vpack.c.bf16 %v5097_v9, %v5097_v9  ;;  %vm6992_vm10 = vmmov %vm6912_vm0 }
 0x202   : > { %v4930_v26 = vpop.f32.mrb[20].mxu1  ;;  %v4004_v53 = vadd.f32 %v4003_v48, %v4002_v43  ;;  %v3903_v28 = vadd.f32 %v3902_v57, %v3901_v25  ;;  %v3904_v34 = vsel %vm6980_vm11, %v5094_v52, 0.0  ;;  %v3959_v33 = vmul.f32 %v5096_v36, %v5096_v36  ;;  %4190 = vst.msk [vmem:[%s6512_s10 + $0x4c] sm:$0xf] %vm4170_vm2, %v4525_v13  ;;  %vm6993_vm1 = vmmov %vm6912_vm0 }
 0x203   : > { %v2518_v23 = vpop.f32.mrb[21].mxu1  ;;  %v5066_v16 = vpop.f32.mrb[20].mxu0  ;;  %v4005_v54 = vsel %vm6981_vm6, %v3957_v47, 0.0  ;;  %4188 = vst.msk [vmem:[%s6512_s10 + $0x44] sm:$0xf] %vm4170_vm2, %v4523_v56  ;;  %v4007_v55 = vsel %vm6982_vm9, %v3958_v38, 0.0  ;;  %vm6994_vm11 = vmmov %vm6912_vm0 }
 0x204   : > { %v5098_v12 = vadd.f32 %v5066_v16, %v4930_v26  ;;  %v4931_v37 = vpop.f32.mrb[22].mxu1  ;;  %v3790_v1 = vpop.f32.mrb[21].mxu0  ;;  %v3906_v32 = vsel %vm6983_vm4, %v5096_v36, 0.0  ;;  %v3905_v27 = vadd.f32 %v3904_v34, %v3903_v28  ;;  %v4006_v63 = vadd.f32 %v4005_v54, %v4004_v53  ;;  %vm6995_vm6 = vmmov %vm6912_vm0 }
 0x205   : > { %v5099_v7 = vadd.f32 %v3790_v1, %v2518_v23  ;;  %v2521_v15 = vpop.f32.mrb[23].mxu1  ;;  %v5067_v0 = vpop.f32.mrb[22].mxu0  ;;  %v4009_v5 = vsel %vm6985_vm5, %v3959_v33, 0.0  ;;  %vm6996_vm9 = vmmov %vm6912_vm0 }
 0x206   : > { %v3793_v3 = vpop.f32.mrb[23].mxu0  ;;  %v4528_v51 = vpack.c.bf16 %v5098_v12, %v5098_v12  ;;  %v4008_v39 = vadd.f32 %v4007_v55, %v4006_v63  ;;  %v3907_v45 = vadd.f32 %v3906_v32, %v3905_v27  ;;  %v5100_v21 = vadd.f32 %v5067_v0, %v4931_v37  ;;  %vm6997_vm4 = vmmov %vm6912_vm0 }
 0x207   : > { %v3908_v60 = vsel %vm6984_vm3, %v5099_v7, 0.0  ;;  %v3960_v59 = vmul.f32 %v5099_v7, %v5099_v7  ;;  %v4526_v22 = vpack.c.bf16 %v5099_v7, %v5099_v7  ;;  %v5101_v18 = vadd.f32 %v3793_v3, %v2521_v15  ;;  %vm6998_vm3 = vmmov %vm6912_vm0 }
 0x208   : > { %4193 = vst.msk [vmem:[%s6512_s10 + $0x58] sm:$0xf] %vm4170_vm2, %v4528_v51  ;;  %v3962_v29 = vmul.f32 %v5098_v12, %v5098_v12  ;;  %v3909_v19 = vadd.f32 %v3908_v60, %v3907_v45  ;;  %v4010_v4 = vadd.f32 %v4009_v5, %v4008_v39  ;;  %v4529_v52 = vpack.c.bf16 %v5100_v21, %v5100_v21  ;;  %vm6999_vm5 = vmmov %vm6912_vm0 }
 0x209   : > { %v4011_v20 = vsel %vm6986_vm12, %v3960_v59, 0.0  ;;  %4191 = vst.msk [vmem:[%s6512_s10 + $0x50] sm:$0xf] %vm4170_vm2, %v4526_v22  ;;  %v3910_v14 = vsel %vm6987_vm8, %v5101_v18, 0.0  ;;  %v3961_v42 = vmul.f32 %v5101_v18, %v5101_v18  ;;  %v4527_v17 = vpack.c.bf16 %v5101_v18, %v5101_v18  ;;  %vm7000_vm12 = vmmov %vm6912_vm0 }
 0x20a   : > { %v4934_v41 = vpop.f32.mrb[24].mxu1  ;;  %v4012_v6 = vadd.f32 %v4011_v20, %v4010_v4  ;;  %v3911_v24 = vadd.f32 %v3910_v14, %v3909_v19  ;;  %v3912_v31 = vsel %vm6988_vm14, %v5098_v12, 0.0  ;;  %v3963_v8 = vmul.f32 %v5100_v21, %v5100_v21  ;;  %4194 = vst.msk [vmem:[%s6512_s10 + $0x5c] sm:$0xf] %vm4170_vm2, %v4529_v52  ;;  %vm7001_vm8 = vmmov %vm6912_vm0 }
 0x20b   : > { %v2534_v40 = vpop.f32.mrb[25].mxu1  ;;  %v5070_v44 = vpop.f32.mrb[24].mxu0  ;;  %v4013_v46 = vsel %vm6989_vm7, %v3961_v42, 0.0  ;;  %4192 = vst.msk [vmem:[%s6512_s10 + $0x54] sm:$0xf] %vm4170_vm2, %v4527_v17  ;;  %v4015_v2 = vsel %vm6990_vm13, %v3962_v29, 0.0  ;;  %vm7002_vm14 = vmmov %vm6912_vm0 }
 0x20c   : > { %v5102_v49 = vadd.f32 %v5070_v44, %v4934_v41  ;;  %v4935_v50 = vpop.f32.mrb[26].mxu1  ;;  %v3806_v11 = vpop.f32.mrb[25].mxu0  ;;  %v3914_v58 = vsel %vm6912_vm0, %v5100_v21, 0.0  ;;  %v3913_v30 = vadd.f32 %v3912_v31, %v3911_v24  ;;  %v4014_v36 = vadd.f32 %v4013_v46, %v4012_v6  ;;  %vm7003_vm7 = vmmov %vm6912_vm0 }
 0x20d   : > { %v5103_v61 = vadd.f32 %v3806_v11, %v2534_v40  ;;  %v2537_v62 = vpop.f32.mrb[27].mxu1  ;;  %v5071_v35 = vpop.f32.mrb[26].mxu0  ;;  %v4017_v57 = vsel %vm6992_vm10, %v3963_v8, 0.0  ;;  %vm7004_vm13 = vmmov %vm6912_vm0 }
 0x20e   : > { %v3809_v10 = vpop.f32.mrb[27].mxu0  ;;  %v4532_v48 = vpack.c.bf16 %v5102_v49, %v5102_v49  ;;  %v4016_v43 = vadd.f32 %v4015_v2, %v4014_v36  ;;  %v3915_v26 = vadd.f32 %v3914_v58, %v3913_v30  ;;  %v5104_v13 = vadd.f32 %v5071_v35, %v4935_v50  ;;  %vm7006_vm10 = vmmov %vm6912_vm0 }
 0x20f   : > { %v3916_v9 = vsel %vm6991_vm15, %v5103_v61, 0.0  ;;  %v3964_v38 = vmul.f32 %v5103_v61, %v5103_v61  ;;  %v4530_v25 = vpack.c.bf16 %v5103_v61, %v5103_v61  ;;  %v5105_v56 = vadd.f32 %v3809_v10, %v2537_v62  ;;  %vm7005_vm15 = vmmov %vm6912_vm0 }
 0x210   : > { %4197 = vst.msk [vmem:[%s6512_s10 + $0x68] sm:$0xf] %vm4170_vm2, %v4532_v48  ;;  %v3966_v23 = vmul.f32 %v5102_v49, %v5102_v49  ;;  %v3917_v16 = vadd.f32 %v3916_v9, %v3915_v26  ;;  %v4018_v53 = vadd.f32 %v4017_v57, %v4016_v43  ;;  %v4533_v12 = vpack.c.bf16 %v5104_v13, %v5104_v13 }
 0x211   : > { %v4019_v47 = vsel %vm6993_vm1, %v3964_v38, 0.0  ;;  %4195 = vst.msk [vmem:[%s6512_s10 + $0x60] sm:$0xf] %vm4170_vm2, %v4530_v25  ;;  %v3918_v37 = vsel %vm6994_vm11, %v5105_v56, 0.0  ;;  %v3965_v1 = vmul.f32 %v5105_v56, %v5105_v56  ;;  %v4531_v34 = vpack.c.bf16 %v5105_v56, %v5105_v56 }
 0x212   : > { %v4938_v28 = vpop.f32.mrb[28].mxu1  ;;  %v4020_v7 = vadd.f32 %v4019_v47, %v4018_v53  ;;  %v3919_v15 = vadd.f32 %v3918_v37, %v3917_v16  ;;  %v3920_v27 = vsel %vm6995_vm6, %v5102_v49, 0.0  ;;  %v3967_v63 = vmul.f32 %v5104_v13, %v5104_v13  ;;  %4198 = vst.msk [vmem:[%s6512_s10 + $0x6c] sm:$0xf] %vm4170_vm2, %v4533_v12 }
 0x213   : > { %v2550_v33 = vpop.f32.mrb[29].mxu1  ;;  %v5074_v54 = vpop.f32.mrb[28].mxu0  ;;  %v4021_v3 = vsel %vm6996_vm9, %v3965_v1, 0.0  ;;  %4196 = vst.msk [vmem:[%s6512_s10 + $0x64] sm:$0xf] %vm4170_vm2, %v4531_v34  ;;  %v4023_v22 = vsel %vm6997_vm4, %v3966_v23, 0.0 }
 0x214   : > { %v5106_v0 = vadd.f32 %v5074_v54, %v4938_v28  ;;  %v4939_v55 = vpop.f32.mrb[30].mxu1  ;;  %v3822_v32 = vpop.f32.mrb[29].mxu0  ;;  %v3922_v39 = vsel %vm6998_vm3, %v5104_v13, 0.0  ;;  %v3921_v45 = vadd.f32 %v3920_v27, %v3919_v15  ;;  %v4022_v21 = vadd.f32 %v4021_v3, %v4020_v7 }
 0x215   : > { %v5107_v51 = vadd.f32 %v3822_v32, %v2550_v33  ;;  %v2553_v60 = vpop.f32.mrb[31].mxu1  ;;  %v5075_v59 = vpop.f32.mrb[30].mxu0  ;;  %v4025_v14 = vsel %vm7000_vm12, %v3967_v63, 0.0 }
 0x216   : > { %v3825_v5 = vpop.f32.mrb[31].mxu0  ;;  %v4536_v20 = vpack.c.bf16 %v5106_v0, %v5106_v0  ;;  %v4024_v4 = vadd.f32 %v4023_v22, %v4022_v21  ;;  %v3923_v41 = vadd.f32 %v3922_v39, %v3921_v45  ;;  %v5108_v52 = vadd.f32 %v5075_v59, %v4939_v55 }
 0x217   : > { %v3924_v18 = vsel %vm6999_vm5, %v5107_v51, 0.0  ;;  %v3968_v29 = vmul.f32 %v5107_v51, %v5107_v51  ;;  %v4534_v19 = vpack.c.bf16 %v5107_v51, %v5107_v51  ;;  %v5109_v17 = vadd.f32 %v3825_v5, %v2553_v60 }
 0x218   : > { %4201 = vst.msk [vmem:[%s6512_s10 + $0x78] sm:$0xf] %vm4170_vm2, %v4536_v20  ;;  %v3970_v40 = vmul.f32 %v5106_v0, %v5106_v0  ;;  %v3925_v44 = vadd.f32 %v3924_v18, %v3923_v41  ;;  %v4026_v6 = vadd.f32 %v4025_v14, %v4024_v4  ;;  %v4537_v24 = vpack.c.bf16 %v5108_v52, %v5108_v52 }
 0x219   : > { %v4027_v42 = vsel %vm7001_vm8, %v3968_v29, 0.0  ;;  %4199 = vst.msk [vmem:[%s6512_s10 + $0x70] sm:$0xf] %vm4170_vm2, %v4534_v19  ;;  %v3926_v49 = vsel %vm7002_vm14, %v5109_v17, 0.0  ;;  %v3969_v50 = vmul.f32 %v5109_v17, %v5109_v17  ;;  %v4535_v11 = vpack.c.bf16 %v5109_v17, %v5109_v17 }
 0x21a   : > { %v4028_v31 = vadd.f32 %v4027_v42, %v4026_v6  ;;  %v3927_v8 = vadd.f32 %v3926_v49, %v3925_v44  ;;  %v3928_v46 = vsel %vm7003_vm7, %v5106_v0, 0.0  ;;  %v3971_v61 = vmul.f32 %v5108_v52, %v5108_v52  ;;  %4202 = vst.msk [vmem:[%s6512_s10 + $0x7c] sm:$0xf] %vm4170_vm2, %v4537_v24 }
 0x21b   : > { %v4029_v62 = vsel %vm7004_vm13, %v3969_v50, 0.0  ;;  %4200 = vst.msk [vmem:[%s6512_s10 + $0x74] sm:$0xf] %vm4170_vm2, %v4535_v11  ;;  %v4031_v58 = vsel %vm6912_vm0, %v3970_v40, 0.0  ;;  %v3930_v30 = vsel %vm7005_vm15, %v5108_v52, 0.0  ;;  %vm3938_vm2 = vcmask 24576  }
 0x21c   : > { %v3929_v35 = vadd.f32 %v3928_v46, %v3927_v8  ;;  %v4030_v2 = vadd.f32 %v4029_v62, %v4028_v31  ;;  %v4033_v48 = vsel %vm7006_vm10, %v3971_v61, 0.0 }
 0x21e   : > { %v3931_v36 = vadd.f32 %v3930_v30, %v3929_v35  ;;  %v4032_v10 = vadd.f32 %v4031_v58, %v4030_v2 }
 0x220   : > { %v3932_v9 = vrot.slane %v3931_v36, 4  ;;  %v4034_v38 = vadd.f32 %v4033_v48, %v4032_v10 }
 0x222   : > { %v3933_v25 = vadd.f32 %v3932_v9, %v3931_v36  ;;  %v4035_v43 = vrot.slane %v4034_v38, 4 }
 0x224   : > { %v3934_v26 = vrot.slane %v3933_v25, 2  ;;  %v4036_v13 = vadd.f32 %v4035_v43, %v4034_v38 }
 0x226   : > { %v3935_v57 = vadd.f32 %v3934_v26, %v3933_v25  ;;  %v4037_v47 = vrot.slane %v4036_v13, 2 }
 0x228   : > { %v3936_v56 = vrot.slane %v3935_v57, 1  ;;  %v4038_v23 = vadd.f32 %v4037_v47, %v4036_v13 }
 0x22a   : > { %v3937_v16 = vadd.f32 %v3936_v56, %v3935_v57  ;;  %v4039_v53 = vrot.slane %v4038_v23, 1 }
 0x22c   : > { %3939 = vst.msk [vmem:[%s268_s11] sm:$0x1] %vm3938_vm2, %v3937_v16  ;;  %v4040_v28 = vadd.f32 %v4039_v53, %v4038_v23 }
 0x22e   : > { %4041 = vst.msk [vmem:[%s271_s14] sm:$0x1] %vm3938_vm2, %v4040_v28 }
 0x22f PF: > { %s17_s21 = sadd.s32 1, %s5360_s21  }
 0x230   : > { %p14_p5 = scmp.ge.s32.totalorder %s17_s21, 4  }
 0x232   :  { %16 = sbr.rel (!%p14_p5) target bundleno = 1 (0x1), region = 98 }

</bundles_post_ra>
